<compile_context>
chip_gen: v5e
topology: v5e:2x2
jax: 0.10.0
libtpu: 0.0.40
codegen_flags: <defaults>
</compile_context>

<pallas_src>
import jax
import jax.numpy as jnp
from jax import lax
from jax.experimental import pallas as pl
from jax.experimental.pallas import tpu as pltpu

HIDDEN = 32
NUM_LAYERS = 16
NUM_BLOCKS = 6
NUM_FEATURES = 2   # -> upper split = 1, lower split = 1


# ---------------------------------------------------------------------------
# Kernel
# ---------------------------------------------------------------------------
def flow_kernel(xT_ref, wf_ref, bf_ref, wh_ref, bh_ref, wst_ref, bst_ref,
                out_ref):
    tm = out_ref.shape[1]

    xt = xT_ref[...]                            # (2, tm), batch on lanes
    x1 = xt[0:1, :]                             # (1, tm)
    x2 = xt[1:2, :]                             # (1, tm)
    ldj = jnp.zeros((1, tm), jnp.float32)

    def block_body(b, carry):
        x1, x2, ldj = carry

        # First layer (input size 1): broadcast multiply on the VPU instead
        # of a K=1 MXU outer product.
        wf = wf_ref[b]                          # (H, 1)
        bf = bf_ref[b]                          # (H, 1)
        h = jnp.maximum(wf * x1 + bf, 0.0)      # (H, tm)

        # Hidden layers: one wide matmul per layer, statically unrolled
        # inside the fori body.
        for l in range(NUM_LAYERS - 2):
            w = wh_ref[b, l]                    # (H, H), pre-transposed
            bias = bh_ref[b, l]                 # (H, 1)
            h = jnp.maximum(
                jnp.dot(w, h, preferred_element_type=jnp.float32) + bias,
                0.0)

        # Fused last layer: one matmul yields both s (row 0) and t (row 1).
        st = (jnp.dot(wst_ref[b], h, preferred_element_type=jnp.float32)
              + bst_ref[b])                     # (2, tm)
        s = st[0:1, :]
        t = st[1:2, :]

        abs_s = jnp.abs(s)
        new_x2 = abs_s * x2 + t                 # affine coupling
        ldj = ldj + jnp.log(abs_s)              # sum over dim=1 (single col)
        # x = cat(x1, x2)[:, [1, 0]]  ->  swap roles for the next block.
        return new_x2, x1, ldj

    x1, x2, ldj = lax.fori_loop(0, NUM_BLOCKS, block_body, (x1, x2, ldj))

    # Lane-dense direct stores into the (3, tm) output slab.
    out_ref[0:1, :] = x1
    out_ref[1:2, :] = x2
    out_ref[2:3, :] = ldj


# ---------------------------------------------------------------------------
# Wrapper
# ---------------------------------------------------------------------------
def pack_params(params):
    """Repack (in,out)-layout params into the transposed kernel layout."""
    wf, bf, wh, bh, wls, bls, wlt, blt = params
    wfT = jnp.transpose(wf, (0, 2, 1))                   # (B, H, 1)
    bfT = jnp.transpose(bf, (0, 2, 1))                   # (B, H, 1)
    whT = jnp.transpose(wh, (0, 1, 3, 2))                # (B, L-2, H, H)
    bhT = jnp.transpose(bh, (0, 1, 3, 2))                # (B, L-2, H, 1)
    wst = jnp.transpose(jnp.concatenate([wls, wlt], axis=2), (0, 2, 1))  # (B,2,H)
    bst = jnp.transpose(jnp.concatenate([bls, blt], axis=2), (0, 2, 1))  # (B,2,1)
    return wfT, bfT, whT, bhT, wst, bst


def flow_forward(x, params, *, tm=1024):
    """x: (N, 2) float32. Returns (x_out (N, 2), log_det_J (N,))."""
    assert tm % 128 == 0, "batch tile must be lane-aligned"
    N = x.shape[0]
    n_tiles = max(1, -(-N // tm))
    N_pad = n_tiles * tm

    # Pad tail with ones (not zeros) so log(|s|) on discarded lanes is finite.
    xT = jnp.ones((2, N_pad), jnp.float32).at[:, :N].set(jnp.transpose(x))
    wfT, bfT, whT, bhT, wst, bst = pack_params(params)

    def full_spec(a):
        nd = a.ndim
        return pl.BlockSpec(a.shape, lambda i, nd=nd: (0,) * nd)

    out = pl.pallas_call(
        flow_kernel,
        out_shape=jax.ShapeDtypeStruct((3, N_pad), jnp.float32),
        grid_spec=pltpu.PrefetchScalarGridSpec(
            num_scalar_prefetch=0,
            grid=(n_tiles,),
            in_specs=[
                pl.BlockSpec((2, tm), lambda i: (0, i)),   # x (feature-major)
                full_spec(wfT), full_spec(bfT),
                full_spec(whT), full_spec(bhT),
                full_spec(wst), full_spec(bst),
            ],
            out_specs=pl.BlockSpec((3, tm), lambda i: (0, i)),
        ),
        compiler_params=pltpu.CompilerParams(
            dimension_semantics=("parallel",)),
    )(xT, wfT, bfT, whT, bhT, wst, bst)

    x_out = jnp.transpose(out[:2, :N])                   # (N, 2)
    log_det = out[2, :N]                                 # (N,)
    return x_out, log_det


# ---------------------------------------------------------------------------
# Pure-JAX reference (PyTorch semantics, original (batch, feature) layout)
# ---------------------------------------------------------------------------
def flow_reference(x, params):
    wf, bf, wh, bh, wls, bls, wlt, blt = params
    hi = jax.lax.Precision.HIGHEST
    x1 = x[:, 0:1]
    x2 = x[:, 1:2]
    ldj = jnp.zeros((x.shape[0],), jnp.float32)
    for b in range(NUM_BLOCKS):
        h = jax.nn.relu(jnp.dot(x1, wf[b], precision=hi,
                                preferred_element_type=jnp.float32) + bf[b])
        for l in range(NUM_LAYERS - 2):
            h = jax.nn.relu(jnp.dot(h, wh[b, l], precision=hi,
                                    preferred_element_type=jnp.float32) + bh[b, l])
        s = jnp.dot(h, wls[b], precision=hi,
                    preferred_element_type=jnp.float32) + bls[b]
        t = jnp.dot(h, wlt[b], precision=hi,
                    preferred_element_type=jnp.float32) + blt[b]
        x2n = jnp.abs(s) * x2 + t
        ldj = ldj + jnp.log(jnp.abs(s))[:, 0]
        x1, x2 = x2n, x1
    return jnp.concatenate([x1, x2], axis=1), ldj


def init_params(key):
    """Deterministic synthetic init (PyTorch-Linear-like uniform(+-1/sqrt(fan_in)))."""
    ks = jax.random.split(key, 8)

    def u(k, shape, fan_in):
        bound = 1.0 / (fan_in ** 0.5)
        return jax.random.uniform(k, shape, jnp.float32, -bound, bound)

    wf = u(ks[0], (NUM_BLOCKS, 1, HIDDEN), 1)
    bf = u(ks[1], (NUM_BLOCKS, 1, HIDDEN), 1)
    wh = u(ks[2], (NUM_BLOCKS, NUM_LAYERS - 2, HIDDEN, HIDDEN), HIDDEN)
    bh = u(ks[3], (NUM_BLOCKS, NUM_LAYERS - 2, 1, HIDDEN), HIDDEN)
    wls = u(ks[4], (NUM_BLOCKS, HIDDEN, 1), HIDDEN)
    bls = u(ks[5], (NUM_BLOCKS, 1, 1), HIDDEN)
    wlt = u(ks[6], (NUM_BLOCKS, HIDDEN, 1), HIDDEN)
    blt = u(ks[7], (NUM_BLOCKS, 1, 1), HIDDEN)
    return wf, bf, wh, bh, wls, bls, wlt, blt


if __name__ == "__main__":
    key = jax.random.PRNGKey(0)
    k_param, k_x = jax.random.split(key)

    params = init_params(k_param)
    N = 4096                              # 4 grid steps at tm=1024 (even, >=4)
    x = jax.random.normal(k_x, (N, NUM_FEATURES), dtype=jnp.float32)

    x_out, log_det = flow_forward(x, params, tm=1024)
    x_out = jax.block_until_ready(x_out)
    log_det = jax.block_until_ready(log_det)

    x_ref, ldj_ref = flow_reference(x, params)
    assert x_out.shape == (N, NUM_FEATURES) and log_det.shape == (N,)
    assert jnp.allclose(x_out, x_ref, rtol=1e-2, atol=1e-2)
    assert jnp.allclose(log_det, ldj_ref, rtol=1e-2, atol=1e-2)

    print("KERNEL_OK")
</pallas_src>

<mosaic_0001>
module attributes {stable_mosaic.version = 11 : i64} {
  func.func @flow_kernel(%arg0: i32, %arg1: memref<2x1024xf32, #tpu.memory_space<vmem>>, %arg2: memref<6x32x1xf32, #tpu.memory_space<vmem>>, %arg3: memref<6x32x1xf32, #tpu.memory_space<vmem>>, %arg4: memref<6x14x32x32xf32, #tpu.memory_space<vmem>>, %arg5: memref<6x14x32x1xf32, #tpu.memory_space<vmem>>, %arg6: memref<6x2x32xf32, #tpu.memory_space<vmem>>, %arg7: memref<6x2x1xf32, #tpu.memory_space<vmem>>, %arg8: memref<3x1024xf32, #tpu.memory_space<vmem>>) attributes {dimension_semantics = [#tpu.dimension_semantics<parallel>], iteration_bounds = array<i64: 4>, scalar_prefetch = 0 : i64, scratch_operands = 0 : i64, tpu.core_type = #tpu.core_type<tc>, window_params = [{transform_indices = @transform_0, window_bounds = array<i64: 2, 1024>}, {pipeline_mode = #tpu.pipeline_mode<synchronous>, transform_indices = @transform_1, window_bounds = array<i64: 6, 32, 1>}, {pipeline_mode = #tpu.pipeline_mode<synchronous>, transform_indices = @transform_2, window_bounds = array<i64: 6, 32, 1>}, {pipeline_mode = #tpu.pipeline_mode<synchronous>, transform_indices = @transform_3, window_bounds = array<i64: 6, 14, 32, 32>}, {pipeline_mode = #tpu.pipeline_mode<synchronous>, transform_indices = @transform_4, window_bounds = array<i64: 6, 14, 32, 1>}, {pipeline_mode = #tpu.pipeline_mode<synchronous>, transform_indices = @transform_5, window_bounds = array<i64: 6, 2, 32>}, {pipeline_mode = #tpu.pipeline_mode<synchronous>, transform_indices = @transform_6, window_bounds = array<i64: 6, 2, 1>}, {transform_indices = @transform_7, window_bounds = array<i64: 3, 1024>}]} {
    %c0 = arith.constant 0 : index
    %c0_0 = arith.constant 0 : index
    %0 = vector.load %arg1[%c0, %c0_0] : memref<2x1024xf32, #tpu.memory_space<vmem>>, vector<2x1024xf32>
    %1 = vector.extract_strided_slice %0 {offsets = [0, 0], sizes = [1, 1024], strides = [1, 1]} : vector<2x1024xf32> to vector<1x1024xf32>
    %2 = vector.extract_strided_slice %0 {offsets = [1, 0], sizes = [1, 1024], strides = [1, 1]} : vector<2x1024xf32> to vector<1x1024xf32>
    %cst = arith.constant 0.000000e+00 : f32
    %3 = vector.broadcast %cst : f32 to vector<1x1024xf32>
    %c0_i32 = arith.constant 0 : i32
    %c6_i32 = arith.constant 6 : i32
    %4 = arith.addi %c0_i32, %c6_i32 : i32
    %c1_i32 = arith.constant 1 : i32
    %5:3 = scf.for %arg9 = %c0_i32 to %4 step %c1_i32 iter_args(%arg10 = %1, %arg11 = %2, %arg12 = %3) -> (vector<1x1024xf32>, vector<1x1024xf32>, vector<1x1024xf32>)  : i32 {
      %9 = arith.index_cast %arg9 : i32 to index
      %c0_6 = arith.constant 0 : index
      %c0_7 = arith.constant 0 : index
      %10 = vector.load %arg2[%9, %c0_6, %c0_7] : memref<6x32x1xf32, #tpu.memory_space<vmem>>, vector<1x32x1xf32>
      %11 = vector.shape_cast %10 : vector<1x32x1xf32> to vector<32x1xf32>
      %12 = arith.index_cast %arg9 : i32 to index
      %c0_8 = arith.constant 0 : index
      %c0_9 = arith.constant 0 : index
      %13 = vector.load %arg3[%12, %c0_8, %c0_9] : memref<6x32x1xf32, #tpu.memory_space<vmem>>, vector<1x32x1xf32>
      %14 = vector.shape_cast %13 : vector<1x32x1xf32> to vector<32x1xf32>
      %15 = vector.broadcast %11 : vector<32x1xf32> to vector<32x1024xf32>
      %16 = vector.broadcast %arg10 : vector<1x1024xf32> to vector<32x1024xf32>
      %17 = arith.mulf %15, %16 : vector<32x1024xf32>
      %18 = vector.broadcast %14 : vector<32x1xf32> to vector<32x1024xf32>
      %19 = arith.addf %17, %18 : vector<32x1024xf32>
      %cst_10 = arith.constant 0.000000e+00 : f32
      %20 = vector.broadcast %cst_10 : f32 to vector<32x1024xf32>
      %21 = arith.maximumf %19, %20 : vector<32x1024xf32>
      %22 = arith.index_cast %arg9 : i32 to index
      %c0_11 = arith.constant 0 : index
      %c0_12 = arith.constant 0 : index
      %c0_13 = arith.constant 0 : index
      %23 = vector.load %arg4[%22, %c0_11, %c0_12, %c0_13] : memref<6x14x32x32xf32, #tpu.memory_space<vmem>>, vector<1x1x32x32xf32>
      %24 = vector.shape_cast %23 : vector<1x1x32x32xf32> to vector<32x32xf32>
      %25 = arith.index_cast %arg9 : i32 to index
      %c0_14 = arith.constant 0 : index
      %c0_15 = arith.constant 0 : index
      %c0_16 = arith.constant 0 : index
      %26 = vector.load %arg5[%25, %c0_14, %c0_15, %c0_16] : memref<6x14x32x1xf32, #tpu.memory_space<vmem>>, vector<1x1x32x1xf32>
      %27 = vector.shape_cast %26 : vector<1x1x32x1xf32> to vector<32x1xf32>
      %cst_17 = arith.constant dense<0.000000e+00> : vector<32x1024xf32>
      %28 = tpu.matmul %24, %21, %cst_17 {dimension_numbers = #tpu.dot_dimension_numbers<[1], [0], [0], [1], [0, 0, 1, 1], [], []>} : vector<32x32xf32>, vector<32x1024xf32>, vector<32x1024xf32> -> vector<32x1024xf32>
      %29 = vector.broadcast %27 : vector<32x1xf32> to vector<32x1024xf32>
      %30 = arith.addf %28, %29 : vector<32x1024xf32>
      %cst_18 = arith.constant 0.000000e+00 : f32
      %31 = vector.broadcast %cst_18 : f32 to vector<32x1024xf32>
      %32 = arith.maximumf %30, %31 : vector<32x1024xf32>
      %33 = arith.index_cast %arg9 : i32 to index
      %c1_19 = arith.constant 1 : index
      %c0_20 = arith.constant 0 : index
      %c0_21 = arith.constant 0 : index
      %34 = vector.load %arg4[%33, %c1_19, %c0_20, %c0_21] : memref<6x14x32x32xf32, #tpu.memory_space<vmem>>, vector<1x1x32x32xf32>
      %35 = vector.shape_cast %34 : vector<1x1x32x32xf32> to vector<32x32xf32>
      %36 = arith.index_cast %arg9 : i32 to index
      %c1_22 = arith.constant 1 : index
      %c0_23 = arith.constant 0 : index
      %c0_24 = arith.constant 0 : index
      %37 = vector.load %arg5[%36, %c1_22, %c0_23, %c0_24] : memref<6x14x32x1xf32, #tpu.memory_space<vmem>>, vector<1x1x32x1xf32>
      %38 = vector.shape_cast %37 : vector<1x1x32x1xf32> to vector<32x1xf32>
      %cst_25 = arith.constant dense<0.000000e+00> : vector<32x1024xf32>
      %39 = tpu.matmul %35, %32, %cst_25 {dimension_numbers = #tpu.dot_dimension_numbers<[1], [0], [0], [1], [0, 0, 1, 1], [], []>} : vector<32x32xf32>, vector<32x1024xf32>, vector<32x1024xf32> -> vector<32x1024xf32>
      %40 = vector.broadcast %38 : vector<32x1xf32> to vector<32x1024xf32>
      %41 = arith.addf %39, %40 : vector<32x1024xf32>
      %cst_26 = arith.constant 0.000000e+00 : f32
      %42 = vector.broadcast %cst_26 : f32 to vector<32x1024xf32>
      %43 = arith.maximumf %41, %42 : vector<32x1024xf32>
      %44 = arith.index_cast %arg9 : i32 to index
      %c2_27 = arith.constant 2 : index
      %c0_28 = arith.constant 0 : index
      %c0_29 = arith.constant 0 : index
      %45 = vector.load %arg4[%44, %c2_27, %c0_28, %c0_29] : memref<6x14x32x32xf32, #tpu.memory_space<vmem>>, vector<1x1x32x32xf32>
      %46 = vector.shape_cast %45 : vector<1x1x32x32xf32> to vector<32x32xf32>
      %47 = arith.index_cast %arg9 : i32 to index
      %c2_30 = arith.constant 2 : index
      %c0_31 = arith.constant 0 : index
      %c0_32 = arith.constant 0 : index
      %48 = vector.load %arg5[%47, %c2_30, %c0_31, %c0_32] : memref<6x14x32x1xf32, #tpu.memory_space<vmem>>, vector<1x1x32x1xf32>
      %49 = vector.shape_cast %48 : vector<1x1x32x1xf32> to vector<32x1xf32>
      %cst_33 = arith.constant dense<0.000000e+00> : vector<32x1024xf32>
      %50 = tpu.matmul %46, %43, %cst_33 {dimension_numbers = #tpu.dot_dimension_numbers<[1], [0], [0], [1], [0, 0, 1, 1], [], []>} : vector<32x32xf32>, vector<32x1024xf32>, vector<32x1024xf32> -> vector<32x1024xf32>
      %51 = vector.broadcast %49 : vector<32x1xf32> to vector<32x1024xf32>
      %52 = arith.addf %50, %51 : vector<32x1024xf32>
      %cst_34 = arith.constant 0.000000e+00 : f32
      %53 = vector.broadcast %cst_34 : f32 to vector<32x1024xf32>
      %54 = arith.maximumf %52, %53 : vector<32x1024xf32>
      %55 = arith.index_cast %arg9 : i32 to index
      %c3 = arith.constant 3 : index
      %c0_35 = arith.constant 0 : index
      %c0_36 = arith.constant 0 : index
      %56 = vector.load %arg4[%55, %c3, %c0_35, %c0_36] : memref<6x14x32x32xf32, #tpu.memory_space<vmem>>, vector<1x1x32x32xf32>
      %57 = vector.shape_cast %56 : vector<1x1x32x32xf32> to vector<32x32xf32>
      %58 = arith.index_cast %arg9 : i32 to index
      %c3_37 = arith.constant 3 : index
      %c0_38 = arith.constant 0 : index
      %c0_39 = arith.constant 0 : index
      %59 = vector.load %arg5[%58, %c3_37, %c0_38, %c0_39] : memref<6x14x32x1xf32, #tpu.memory_space<vmem>>, vector<1x1x32x1xf32>
      %60 = vector.shape_cast %59 : vector<1x1x32x1xf32> to vector<32x1xf32>
      %cst_40 = arith.constant dense<0.000000e+00> : vector<32x1024xf32>
      %61 = tpu.matmul %57, %54, %cst_40 {dimension_numbers = #tpu.dot_dimension_numbers<[1], [0], [0], [1], [0, 0, 1, 1], [], []>} : vector<32x32xf32>, vector<32x1024xf32>, vector<32x1024xf32> -> vector<32x1024xf32>
      %62 = vector.broadcast %60 : vector<32x1xf32> to vector<32x1024xf32>
      %63 = arith.addf %61, %62 : vector<32x1024xf32>
      %cst_41 = arith.constant 0.000000e+00 : f32
      %64 = vector.broadcast %cst_41 : f32 to vector<32x1024xf32>
      %65 = arith.maximumf %63, %64 : vector<32x1024xf32>
      %66 = arith.index_cast %arg9 : i32 to index
      %c4 = arith.constant 4 : index
      %c0_42 = arith.constant 0 : index
      %c0_43 = arith.constant 0 : index
      %67 = vector.load %arg4[%66, %c4, %c0_42, %c0_43] : memref<6x14x32x32xf32, #tpu.memory_space<vmem>>, vector<1x1x32x32xf32>
      %68 = vector.shape_cast %67 : vector<1x1x32x32xf32> to vector<32x32xf32>
      %69 = arith.index_cast %arg9 : i32 to index
      %c4_44 = arith.constant 4 : index
      %c0_45 = arith.constant 0 : index
      %c0_46 = arith.constant 0 : index
      %70 = vector.load %arg5[%69, %c4_44, %c0_45, %c0_46] : memref<6x14x32x1xf32, #tpu.memory_space<vmem>>, vector<1x1x32x1xf32>
      %71 = vector.shape_cast %70 : vector<1x1x32x1xf32> to vector<32x1xf32>
      %cst_47 = arith.constant dense<0.000000e+00> : vector<32x1024xf32>
      %72 = tpu.matmul %68, %65, %cst_47 {dimension_numbers = #tpu.dot_dimension_numbers<[1], [0], [0], [1], [0, 0, 1, 1], [], []>} : vector<32x32xf32>, vector<32x1024xf32>, vector<32x1024xf32> -> vector<32x1024xf32>
      %73 = vector.broadcast %71 : vector<32x1xf32> to vector<32x1024xf32>
      %74 = arith.addf %72, %73 : vector<32x1024xf32>
      %cst_48 = arith.constant 0.000000e+00 : f32
      %75 = vector.broadcast %cst_48 : f32 to vector<32x1024xf32>
      %76 = arith.maximumf %74, %75 : vector<32x1024xf32>
      %77 = arith.index_cast %arg9 : i32 to index
      %c5 = arith.constant 5 : index
      %c0_49 = arith.constant 0 : index
      %c0_50 = arith.constant 0 : index
      %78 = vector.load %arg4[%77, %c5, %c0_49, %c0_50] : memref<6x14x32x32xf32, #tpu.memory_space<vmem>>, vector<1x1x32x32xf32>
      %79 = vector.shape_cast %78 : vector<1x1x32x32xf32> to vector<32x32xf32>
      %80 = arith.index_cast %arg9 : i32 to index
      %c5_51 = arith.constant 5 : index
      %c0_52 = arith.constant 0 : index
      %c0_53 = arith.constant 0 : index
      %81 = vector.load %arg5[%80, %c5_51, %c0_52, %c0_53] : memref<6x14x32x1xf32, #tpu.memory_space<vmem>>, vector<1x1x32x1xf32>
      %82 = vector.shape_cast %81 : vector<1x1x32x1xf32> to vector<32x1xf32>
      %cst_54 = arith.constant dense<0.000000e+00> : vector<32x1024xf32>
      %83 = tpu.matmul %79, %76, %cst_54 {dimension_numbers = #tpu.dot_dimension_numbers<[1], [0], [0], [1], [0, 0, 1, 1], [], []>} : vector<32x32xf32>, vector<32x1024xf32>, vector<32x1024xf32> -> vector<32x1024xf32>
      %84 = vector.broadcast %82 : vector<32x1xf32> to vector<32x1024xf32>
      %85 = arith.addf %83, %84 : vector<32x1024xf32>
      %cst_55 = arith.constant 0.000000e+00 : f32
      %86 = vector.broadcast %cst_55 : f32 to vector<32x1024xf32>
      %87 = arith.maximumf %85, %86 : vector<32x1024xf32>
      %88 = arith.index_cast %arg9 : i32 to index
      %c6 = arith.constant 6 : index
      %c0_56 = arith.constant 0 : index
      %c0_57 = arith.constant 0 : index
      %89 = vector.load %arg4[%88, %c6, %c0_56, %c0_57] : memref<6x14x32x32xf32, #tpu.memory_space<vmem>>, vector<1x1x32x32xf32>
      %90 = vector.shape_cast %89 : vector<1x1x32x32xf32> to vector<32x32xf32>
      %91 = arith.index_cast %arg9 : i32 to index
      %c6_58 = arith.constant 6 : index
      %c0_59 = arith.constant 0 : index
      %c0_60 = arith.constant 0 : index
      %92 = vector.load %arg5[%91, %c6_58, %c0_59, %c0_60] : memref<6x14x32x1xf32, #tpu.memory_space<vmem>>, vector<1x1x32x1xf32>
      %93 = vector.shape_cast %92 : vector<1x1x32x1xf32> to vector<32x1xf32>
      %cst_61 = arith.constant dense<0.000000e+00> : vector<32x1024xf32>
      %94 = tpu.matmul %90, %87, %cst_61 {dimension_numbers = #tpu.dot_dimension_numbers<[1], [0], [0], [1], [0, 0, 1, 1], [], []>} : vector<32x32xf32>, vector<32x1024xf32>, vector<32x1024xf32> -> vector<32x1024xf32>
      %95 = vector.broadcast %93 : vector<32x1xf32> to vector<32x1024xf32>
      %96 = arith.addf %94, %95 : vector<32x1024xf32>
      %cst_62 = arith.constant 0.000000e+00 : f32
      %97 = vector.broadcast %cst_62 : f32 to vector<32x1024xf32>
      %98 = arith.maximumf %96, %97 : vector<32x1024xf32>
      %99 = arith.index_cast %arg9 : i32 to index
      %c7 = arith.constant 7 : index
      %c0_63 = arith.constant 0 : index
      %c0_64 = arith.constant 0 : index
      %100 = vector.load %arg4[%99, %c7, %c0_63, %c0_64] : memref<6x14x32x32xf32, #tpu.memory_space<vmem>>, vector<1x1x32x32xf32>
      %101 = vector.shape_cast %100 : vector<1x1x32x32xf32> to vector<32x32xf32>
      %102 = arith.index_cast %arg9 : i32 to index
      %c7_65 = arith.constant 7 : index
      %c0_66 = arith.constant 0 : index
      %c0_67 = arith.constant 0 : index
      %103 = vector.load %arg5[%102, %c7_65, %c0_66, %c0_67] : memref<6x14x32x1xf32, #tpu.memory_space<vmem>>, vector<1x1x32x1xf32>
      %104 = vector.shape_cast %103 : vector<1x1x32x1xf32> to vector<32x1xf32>
      %cst_68 = arith.constant dense<0.000000e+00> : vector<32x1024xf32>
      %105 = tpu.matmul %101, %98, %cst_68 {dimension_numbers = #tpu.dot_dimension_numbers<[1], [0], [0], [1], [0, 0, 1, 1], [], []>} : vector<32x32xf32>, vector<32x1024xf32>, vector<32x1024xf32> -> vector<32x1024xf32>
      %106 = vector.broadcast %104 : vector<32x1xf32> to vector<32x1024xf32>
      %107 = arith.addf %105, %106 : vector<32x1024xf32>
      %cst_69 = arith.constant 0.000000e+00 : f32
      %108 = vector.broadcast %cst_69 : f32 to vector<32x1024xf32>
      %109 = arith.maximumf %107, %108 : vector<32x1024xf32>
      %110 = arith.index_cast %arg9 : i32 to index
      %c8 = arith.constant 8 : index
      %c0_70 = arith.constant 0 : index
      %c0_71 = arith.constant 0 : index
      %111 = vector.load %arg4[%110, %c8, %c0_70, %c0_71] : memref<6x14x32x32xf32, #tpu.memory_space<vmem>>, vector<1x1x32x32xf32>
      %112 = vector.shape_cast %111 : vector<1x1x32x32xf32> to vector<32x32xf32>
      %113 = arith.index_cast %arg9 : i32 to index
      %c8_72 = arith.constant 8 : index
      %c0_73 = arith.constant 0 : index
      %c0_74 = arith.constant 0 : index
      %114 = vector.load %arg5[%113, %c8_72, %c0_73, %c0_74] : memref<6x14x32x1xf32, #tpu.memory_space<vmem>>, vector<1x1x32x1xf32>
      %115 = vector.shape_cast %114 : vector<1x1x32x1xf32> to vector<32x1xf32>
      %cst_75 = arith.constant dense<0.000000e+00> : vector<32x1024xf32>
      %116 = tpu.matmul %112, %109, %cst_75 {dimension_numbers = #tpu.dot_dimension_numbers<[1], [0], [0], [1], [0, 0, 1, 1], [], []>} : vector<32x32xf32>, vector<32x1024xf32>, vector<32x1024xf32> -> vector<32x1024xf32>
      %117 = vector.broadcast %115 : vector<32x1xf32> to vector<32x1024xf32>
      %118 = arith.addf %116, %117 : vector<32x1024xf32>
      %cst_76 = arith.constant 0.000000e+00 : f32
      %119 = vector.broadcast %cst_76 : f32 to vector<32x1024xf32>
      %120 = arith.maximumf %118, %119 : vector<32x1024xf32>
      %121 = arith.index_cast %arg9 : i32 to index
      %c9 = arith.constant 9 : index
      %c0_77 = arith.constant 0 : index
      %c0_78 = arith.constant 0 : index
      %122 = vector.load %arg4[%121, %c9, %c0_77, %c0_78] : memref<6x14x32x32xf32, #tpu.memory_space<vmem>>, vector<1x1x32x32xf32>
      %123 = vector.shape_cast %122 : vector<1x1x32x32xf32> to vector<32x32xf32>
      %124 = arith.index_cast %arg9 : i32 to index
      %c9_79 = arith.constant 9 : index
      %c0_80 = arith.constant 0 : index
      %c0_81 = arith.constant 0 : index
      %125 = vector.load %arg5[%124, %c9_79, %c0_80, %c0_81] : memref<6x14x32x1xf32, #tpu.memory_space<vmem>>, vector<1x1x32x1xf32>
      %126 = vector.shape_cast %125 : vector<1x1x32x1xf32> to vector<32x1xf32>
      %cst_82 = arith.constant dense<0.000000e+00> : vector<32x1024xf32>
      %127 = tpu.matmul %123, %120, %cst_82 {dimension_numbers = #tpu.dot_dimension_numbers<[1], [0], [0], [1], [0, 0, 1, 1], [], []>} : vector<32x32xf32>, vector<32x1024xf32>, vector<32x1024xf32> -> vector<32x1024xf32>
      %128 = vector.broadcast %126 : vector<32x1xf32> to vector<32x1024xf32>
      %129 = arith.addf %127, %128 : vector<32x1024xf32>
      %cst_83 = arith.constant 0.000000e+00 : f32
      %130 = vector.broadcast %cst_83 : f32 to vector<32x1024xf32>
      %131 = arith.maximumf %129, %130 : vector<32x1024xf32>
      %132 = arith.index_cast %arg9 : i32 to index
      %c10 = arith.constant 10 : index
      %c0_84 = arith.constant 0 : index
      %c0_85 = arith.constant 0 : index
      %133 = vector.load %arg4[%132, %c10, %c0_84, %c0_85] : memref<6x14x32x32xf32, #tpu.memory_space<vmem>>, vector<1x1x32x32xf32>
      %134 = vector.shape_cast %133 : vector<1x1x32x32xf32> to vector<32x32xf32>
      %135 = arith.index_cast %arg9 : i32 to index
      %c10_86 = arith.constant 10 : index
      %c0_87 = arith.constant 0 : index
      %c0_88 = arith.constant 0 : index
      %136 = vector.load %arg5[%135, %c10_86, %c0_87, %c0_88] : memref<6x14x32x1xf32, #tpu.memory_space<vmem>>, vector<1x1x32x1xf32>
      %137 = vector.shape_cast %136 : vector<1x1x32x1xf32> to vector<32x1xf32>
      %cst_89 = arith.constant dense<0.000000e+00> : vector<32x1024xf32>
      %138 = tpu.matmul %134, %131, %cst_89 {dimension_numbers = #tpu.dot_dimension_numbers<[1], [0], [0], [1], [0, 0, 1, 1], [], []>} : vector<32x32xf32>, vector<32x1024xf32>, vector<32x1024xf32> -> vector<32x1024xf32>
      %139 = vector.broadcast %137 : vector<32x1xf32> to vector<32x1024xf32>
      %140 = arith.addf %138, %139 : vector<32x1024xf32>
      %cst_90 = arith.constant 0.000000e+00 : f32
      %141 = vector.broadcast %cst_90 : f32 to vector<32x1024xf32>
      %142 = arith.maximumf %140, %141 : vector<32x1024xf32>
      %143 = arith.index_cast %arg9 : i32 to index
      %c11 = arith.constant 11 : index
      %c0_91 = arith.constant 0 : index
      %c0_92 = arith.constant 0 : index
      %144 = vector.load %arg4[%143, %c11, %c0_91, %c0_92] : memref<6x14x32x32xf32, #tpu.memory_space<vmem>>, vector<1x1x32x32xf32>
      %145 = vector.shape_cast %144 : vector<1x1x32x32xf32> to vector<32x32xf32>
      %146 = arith.index_cast %arg9 : i32 to index
      %c11_93 = arith.constant 11 : index
      %c0_94 = arith.constant 0 : index
      %c0_95 = arith.constant 0 : index
      %147 = vector.load %arg5[%146, %c11_93, %c0_94, %c0_95] : memref<6x14x32x1xf32, #tpu.memory_space<vmem>>, vector<1x1x32x1xf32>
      %148 = vector.shape_cast %147 : vector<1x1x32x1xf32> to vector<32x1xf32>
      %cst_96 = arith.constant dense<0.000000e+00> : vector<32x1024xf32>
      %149 = tpu.matmul %145, %142, %cst_96 {dimension_numbers = #tpu.dot_dimension_numbers<[1], [0], [0], [1], [0, 0, 1, 1], [], []>} : vector<32x32xf32>, vector<32x1024xf32>, vector<32x1024xf32> -> vector<32x1024xf32>
      %150 = vector.broadcast %148 : vector<32x1xf32> to vector<32x1024xf32>
      %151 = arith.addf %149, %150 : vector<32x1024xf32>
      %cst_97 = arith.constant 0.000000e+00 : f32
      %152 = vector.broadcast %cst_97 : f32 to vector<32x1024xf32>
      %153 = arith.maximumf %151, %152 : vector<32x1024xf32>
      %154 = arith.index_cast %arg9 : i32 to index
      %c12 = arith.constant 12 : index
      %c0_98 = arith.constant 0 : index
      %c0_99 = arith.constant 0 : index
      %155 = vector.load %arg4[%154, %c12, %c0_98, %c0_99] : memref<6x14x32x32xf32, #tpu.memory_space<vmem>>, vector<1x1x32x32xf32>
      %156 = vector.shape_cast %155 : vector<1x1x32x32xf32> to vector<32x32xf32>
      %157 = arith.index_cast %arg9 : i32 to index
      %c12_100 = arith.constant 12 : index
      %c0_101 = arith.constant 0 : index
      %c0_102 = arith.constant 0 : index
      %158 = vector.load %arg5[%157, %c12_100, %c0_101, %c0_102] : memref<6x14x32x1xf32, #tpu.memory_space<vmem>>, vector<1x1x32x1xf32>
      %159 = vector.shape_cast %158 : vector<1x1x32x1xf32> to vector<32x1xf32>
      %cst_103 = arith.constant dense<0.000000e+00> : vector<32x1024xf32>
      %160 = tpu.matmul %156, %153, %cst_103 {dimension_numbers = #tpu.dot_dimension_numbers<[1], [0], [0], [1], [0, 0, 1, 1], [], []>} : vector<32x32xf32>, vector<32x1024xf32>, vector<32x1024xf32> -> vector<32x1024xf32>
      %161 = vector.broadcast %159 : vector<32x1xf32> to vector<32x1024xf32>
      %162 = arith.addf %160, %161 : vector<32x1024xf32>
      %cst_104 = arith.constant 0.000000e+00 : f32
      %163 = vector.broadcast %cst_104 : f32 to vector<32x1024xf32>
      %164 = arith.maximumf %162, %163 : vector<32x1024xf32>
      %165 = arith.index_cast %arg9 : i32 to index
      %c13 = arith.constant 13 : index
      %c0_105 = arith.constant 0 : index
      %c0_106 = arith.constant 0 : index
      %166 = vector.load %arg4[%165, %c13, %c0_105, %c0_106] : memref<6x14x32x32xf32, #tpu.memory_space<vmem>>, vector<1x1x32x32xf32>
      %167 = vector.shape_cast %166 : vector<1x1x32x32xf32> to vector<32x32xf32>
      %168 = arith.index_cast %arg9 : i32 to index
      %c13_107 = arith.constant 13 : index
      %c0_108 = arith.constant 0 : index
      %c0_109 = arith.constant 0 : index
      %169 = vector.load %arg5[%168, %c13_107, %c0_108, %c0_109] : memref<6x14x32x1xf32, #tpu.memory_space<vmem>>, vector<1x1x32x1xf32>
      %170 = vector.shape_cast %169 : vector<1x1x32x1xf32> to vector<32x1xf32>
      %cst_110 = arith.constant dense<0.000000e+00> : vector<32x1024xf32>
      %171 = tpu.matmul %167, %164, %cst_110 {dimension_numbers = #tpu.dot_dimension_numbers<[1], [0], [0], [1], [0, 0, 1, 1], [], []>} : vector<32x32xf32>, vector<32x1024xf32>, vector<32x1024xf32> -> vector<32x1024xf32>
      %172 = vector.broadcast %170 : vector<32x1xf32> to vector<32x1024xf32>
      %173 = arith.addf %171, %172 : vector<32x1024xf32>
      %cst_111 = arith.constant 0.000000e+00 : f32
      %174 = vector.broadcast %cst_111 : f32 to vector<32x1024xf32>
      %175 = arith.maximumf %173, %174 : vector<32x1024xf32>
      %176 = arith.index_cast %arg9 : i32 to index
      %c0_112 = arith.constant 0 : index
      %c0_113 = arith.constant 0 : index
      %177 = vector.load %arg6[%176, %c0_112, %c0_113] : memref<6x2x32xf32, #tpu.memory_space<vmem>>, vector<1x2x32xf32>
      %178 = vector.shape_cast %177 : vector<1x2x32xf32> to vector<2x32xf32>
      %cst_114 = arith.constant dense<0.000000e+00> : vector<2x1024xf32>
      %179 = tpu.matmul %178, %175, %cst_114 {dimension_numbers = #tpu.dot_dimension_numbers<[1], [0], [0], [1], [0, 0, 1, 1], [], []>} : vector<2x32xf32>, vector<32x1024xf32>, vector<2x1024xf32> -> vector<2x1024xf32>
      %180 = arith.index_cast %arg9 : i32 to index
      %c0_115 = arith.constant 0 : index
      %c0_116 = arith.constant 0 : index
      %181 = vector.load %arg7[%180, %c0_115, %c0_116] : memref<6x2x1xf32, #tpu.memory_space<vmem>>, vector<1x2x1xf32>
      %182 = vector.shape_cast %181 : vector<1x2x1xf32> to vector<2x1xf32>
      %183 = vector.broadcast %182 : vector<2x1xf32> to vector<2x1024xf32>
      %184 = arith.addf %179, %183 : vector<2x1024xf32>
      %185 = vector.extract_strided_slice %184 {offsets = [0, 0], sizes = [1, 1024], strides = [1, 1]} : vector<2x1024xf32> to vector<1x1024xf32>
      %186 = vector.extract_strided_slice %184 {offsets = [1, 0], sizes = [1, 1024], strides = [1, 1]} : vector<2x1024xf32> to vector<1x1024xf32>
      %187 = math.absf %185 : vector<1x1024xf32>
      %188 = arith.mulf %187, %arg11 : vector<1x1024xf32>
      %189 = arith.addf %188, %186 : vector<1x1024xf32>
      %190 = math.log %187 : vector<1x1024xf32>
      %191 = arith.addf %arg12, %190 : vector<1x1024xf32>
      scf.yield %189, %arg10, %191 : vector<1x1024xf32>, vector<1x1024xf32>, vector<1x1024xf32>
    }
    %c6_i32_1 = arith.constant 6 : i32
    %c0_2 = arith.constant 0 : index
    %c0_3 = arith.constant 0 : index
    %6 = vector.load %arg8[%c0_2, %c0_3] : memref<3x1024xf32, #tpu.memory_space<vmem>>, vector<1x1024xf32>
    tpu.vector_store %arg8[%c0_2, %c0_3], %5#0 {strides = array<i32>} : memref<3x1024xf32, #tpu.memory_space<vmem>>, vector<1x1024xf32>,
    %c1 = arith.constant 1 : index
    %c0_4 = arith.constant 0 : index
    %7 = vector.load %arg8[%c1, %c0_4] : memref<3x1024xf32, #tpu.memory_space<vmem>>, vector<1x1024xf32>
    tpu.vector_store %arg8[%c1, %c0_4], %5#1 {strides = array<i32>} : memref<3x1024xf32, #tpu.memory_space<vmem>>, vector<1x1024xf32>,
    %c2 = arith.constant 2 : index
    %c0_5 = arith.constant 0 : index
    %8 = vector.load %arg8[%c2, %c0_5] : memref<3x1024xf32, #tpu.memory_space<vmem>>, vector<1x1024xf32>
    tpu.vector_store %arg8[%c2, %c0_5], %5#2 {strides = array<i32>} : memref<3x1024xf32, #tpu.memory_space<vmem>>, vector<1x1024xf32>,
    return
  }
  func.func @transform_0(%arg0: i32) -> (i32, i32) {
    %c0_i32 = arith.constant 0 : i32
    %c0_i32_0 = arith.constant 0 : i32
    return %c0_i32, %arg0 : i32, i32
  }
  func.func @transform_1(%arg0: i32) -> (i32, i32, i32) {
    %c0_i32 = arith.constant 0 : i32
    %c0_i32_0 = arith.constant 0 : i32
    %c0_i32_1 = arith.constant 0 : i32
    %c0_i32_2 = arith.constant 0 : i32
    return %c0_i32, %c0_i32_0, %c0_i32_1 : i32, i32, i32
  }
  func.func @transform_2(%arg0: i32) -> (i32, i32, i32) {
    %c0_i32 = arith.constant 0 : i32
    %c0_i32_0 = arith.constant 0 : i32
    %c0_i32_1 = arith.constant 0 : i32
    %c0_i32_2 = arith.constant 0 : i32
    return %c0_i32, %c0_i32_0, %c0_i32_1 : i32, i32, i32
  }
  func.func @transform_3(%arg0: i32) -> (i32, i32, i32, i32) {
    %c0_i32 = arith.constant 0 : i32
    %c0_i32_0 = arith.constant 0 : i32
    %c0_i32_1 = arith.constant 0 : i32
    %c0_i32_2 = arith.constant 0 : i32
    %c0_i32_3 = arith.constant 0 : i32
    return %c0_i32, %c0_i32_0, %c0_i32_1, %c0_i32_2 : i32, i32, i32, i32
  }
  func.func @transform_4(%arg0: i32) -> (i32, i32, i32, i32) {
    %c0_i32 = arith.constant 0 : i32
    %c0_i32_0 = arith.constant 0 : i32
    %c0_i32_1 = arith.constant 0 : i32
    %c0_i32_2 = arith.constant 0 : i32
    %c0_i32_3 = arith.constant 0 : i32
    return %c0_i32, %c0_i32_0, %c0_i32_1, %c0_i32_2 : i32, i32, i32, i32
  }
  func.func @transform_5(%arg0: i32) -> (i32, i32, i32) {
    %c0_i32 = arith.constant 0 : i32
    %c0_i32_0 = arith.constant 0 : i32
    %c0_i32_1 = arith.constant 0 : i32
    %c0_i32_2 = arith.constant 0 : i32
    return %c0_i32, %c0_i32_0, %c0_i32_1 : i32, i32, i32
  }
  func.func @transform_6(%arg0: i32) -> (i32, i32, i32) {
    %c0_i32 = arith.constant 0 : i32
    %c0_i32_0 = arith.constant 0 : i32
    %c0_i32_1 = arith.constant 0 : i32
    %c0_i32_2 = arith.constant 0 : i32
    return %c0_i32, %c0_i32_0, %c0_i32_1 : i32, i32, i32
  }
  func.func @transform_7(%arg0: i32) -> (i32, i32) {
    %c0_i32 = arith.constant 0 : i32
    %c0_i32_0 = arith.constant 0 : i32
    return %c0_i32, %arg0 : i32, i32
  }
}

</mosaic_0001>

<bundles_post_ra>
// kernel: tpu_custom_call.1
= control target key start
LH: loop header
LB: loop body
LE: loop exit
PB: predicated region body
PF: predicated region fallthrough
CT: control target
= control target key end

     0   :  { %12 = vsyncpa [#allocation3], 0  ;;  %s8760_s0 = inlined_call_operand.vmem [shape: f32[2,4096], index: 0, kind: input, shape index: {}]   ;;  %s8761_s1 = inlined_call_operand.vmem [shape: f32[6,32,1], index: 1, kind: input, shape index: {}]   ;;  %s8762_s2 = inlined_call_operand.vmem [shape: f32[6,32,1], index: 2, kind: input, shape index: {}]   ;;  %s8763_s3 = inlined_call_operand.vmem [shape: f32[6,14,32,32], index: 3, kind: input, shape index: {}]   ;;  %s8764_s4 = inlined_call_operand.vmem [shape: f32[6,14,32,1], index: 4, kind: input, shape index: {}]   ;;  %s8765_s5 = inlined_call_operand.vmem [shape: f32[6,2,32], index: 5, kind: input, shape index: {}]   ;;  %s8766_s6 = inlined_call_operand.vmem [shape: f32[6,2,1], index: 6, kind: input, shape index: {}]   ;;  %s8767_s7 = inlined_call_operand.hbm [shape: f32[3,4096], index: 7, kind: output, shape index: {}]  }
   0x1   :  { %14 = vsyncpa [#allocation3 + $0x1], 0  ;;  %s6510_s24 = smov 0   ;;  %s6512_s25 = smov 0  }
   0x2   :  { %s6514_s26 = smov 0   ;;  %s6516_s27 = smov 0  }
   0x3 LB: > { %s6531_s28 = sadd.s32 4294967295, %s6367_s27   ;;  %s5369_s29 = sadd.s32 4294967294, %s6367_s27   ;;  %s6367_s27 = sphi %s6516_s27, %s8820_s27   ;;  %s6363_s26 = sphi %s6514_s26, %s8819_s26   ;;  %s6359_s25 = sphi %s6512_s25, %s8818_s25   ;;  %s6355_s24 = sphi %s6510_s24, %s8817_s24  }
   0x4   : > { %s6535_s30 = sadd.s32 1, %s6367_s27   ;;  %s179_s8 = sadd.s32 1, %s6363_s26 }
   0x5   : > { %s176_s9 = ssub.s32 %s6367_s27, %s6535_s30  ;;  %p189_p0 = scmp.ne.s32.totalorder %s6363_s26, %s6359_s25 }
   0x6   : > { %p177_p1 = scmp.eq.s32.totalorder %s176_s9, 0  ;;  %p190_p2 = scmp.eq.s32.totalorder %s6531_s28, 3 }
   0x7   : > { %p195_p3 = scmp.ne.s32.totalorder %s6359_s25, %s6355_s24  ;;  %p196_p4 = scmp.eq.s32.totalorder %s5369_s29, 3 }
   0x8   : > { %s6546_s10 = scalar_select %p177_p1, %s6363_s26, %s179_s8  }
   0x9   : > { %p6548_p5 = por %p190_p2, %p189_p0  ;;  %p6552_p6 = por %p196_p4, %p195_p3 }
   0xa   : > { %p5372_p7 = scmp.ge.s32.totalorder %s6367_s27, 1  ;;  %p241_p8 = scmp.lt.s32.totalorder %s6367_s27, 5 }
   0xc   : > { %p242_p9 = pnand %p5372_p7, %p241_p8 }
   0xd   : > { %s270_s13 = sand.u32 (!%p242_p9), 1, %s6359_s25   ;;  %s5374_s14 = sshll.u32 (!%p242_p9), %s6531_s28, 3 }
   0xe   : > { %245 = sbr.rel (%p242_p9) target bundleno = 2711 (0xa97), region = 48  ;;  %s5373_s15 = sshll.u32 (!%p242_p9), %s270_s13, 5 }
   0xf   : > { %p274_p10 = scmp.lt.s32.totalorder (!%p242_p9), %s5374_s14, 31  ;;  %s6565_s20 = scalar_lea.vmem (!%p242_p9), [#allocation2], %s5373_s15 }
  0x10   : > { %s6615_s21 = smov (!%p242_p9), 0  }
  0x13   : > { %s8822_s14 = smov (!%p274_p10, %s5374_s14), 31  ;;  %v6567_v18 = vmov 0.0   ;;  %v6569_v19 = vmov 0.0   ;;  %v6571_v20 = vmov 0.0   ;;  %v6573_v21 = vmov 0.0  }
  0x14   : > { %s5375_s16 = sshll.u32 %s8822_s14, 1  ;;  %v6575_v22 = vmov 0.0   ;;  %v6577_v23 = vmov 0.0   ;;  %v6579_v24 = vmov 0.0   ;;  %v6581_v25 = vmov 0.0  }
  0x15   : > { %s277_s19 = scalar_lea.vmem %s8760_s0, %s5375_s16 }
  0x16   : > { %v280_v0 = vld [vmem:[%s277_s19] sm:$0xff]  ;;  %v281_v1 = vld [vmem:[%s277_s19 + $0x8] sm:$0xff] }
  0x17   : > { %v284_v2 = vperm.slane %v280_v0, 0   ;;  %v285_v3 = vperm.slane %v280_v0, 2   ;;  %v286_v4 = vperm.slane %v280_v0, 4   ;;  %v287_v5 = vperm.slane %v280_v0, 6  }
  0x18   : > { %v288_v6 = vperm.slane %v281_v1, 0   ;;  %v289_v7 = vperm.slane %v281_v1, 2   ;;  %v290_v8 = vperm.slane %v281_v1, 4   ;;  %v291_v9 = vperm.slane %v281_v1, 6  }
  0x19   : > { %v300_v10 = vperm.slane %v280_v0, 1   ;;  %v301_v11 = vperm.slane %v280_v0, 3   ;;  %v302_v12 = vperm.slane %v280_v0, 5   ;;  %v303_v13 = vperm.slane %v280_v0, 7  }
  0x1a   : > { %v304_v14 = vperm.slane %v281_v1, 1   ;;  %v305_v15 = vperm.slane %v281_v1, 3   ;;  %v306_v16 = vperm.slane %v281_v1, 5   ;;  %v307_v17 = vperm.slane %v281_v1, 7  }
  0x1b LB: >> { %v8770_v26 = vmov %v6435_v9  ;;  %v8771_v27 = vmov %v6439_v8  ;;  %v8772_v28 = vmov %v6443_v7  ;;  %v8773_v29 = vmov %v6447_v6  ;;  %s5376_s22 = sshll.u32 %s6467_s21, 5  ;;  %s501_s16 = smul.u32 448, %s6467_s21  ;;  %s6467_s21 = sphi %s6615_s21, %s321_s21   ;;  %v6463_v2 = vphi %v284_v2, %v8816_v2   ;;  %v6459_v3 = vphi %v285_v3, %v8815_v3   ;;  %v6455_v4 = vphi %v286_v4, %v8814_v4   ;;  %v6451_v5 = vphi %v287_v5, %v8813_v5   ;;  %v6447_v6 = vphi %v288_v6, %v8812_v6   ;;  %v6443_v7 = vphi %v289_v7, %v8811_v7   ;;  %v6439_v8 = vphi %v290_v8, %v8810_v8   ;;  %v6435_v9 = vphi %v291_v9, %v8809_v9   ;;  %v6431_v10 = vphi %v300_v10, %v8808_v10   ;;  %v6427_v11 = vphi %v301_v11, %v8807_v11   ;;  %v6423_v12 = vphi %v302_v12, %v8806_v12   ;;  %v6419_v13 = vphi %v303_v13, %v8805_v13   ;;  %v6415_v14 = vphi %v304_v14, %v8804_v14   ;;  %v6411_v15 = vphi %v305_v15, %v8803_v15   ;;  %v6407_v16 = vphi %v306_v16, %v8802_v16   ;;  %v6403_v17 = vphi %v307_v17, %v8801_v17   ;;  %v6399_v25 = vphi %v6581_v25, %v8800_v25   ;;  %v6395_v24 = vphi %v6579_v24, %v8799_v24   ;;  %v6391_v23 = vphi %v6577_v23, %v8798_v23   ;;  %v6387_v22 = vphi %v6575_v22, %v8797_v22   ;;  %v6383_v21 = vphi %v6573_v21, %v8796_v21   ;;  %v6379_v20 = vphi %v6571_v20, %v8795_v20   ;;  %v6375_v19 = vphi %v6569_v19, %v8794_v19   ;;  %v6371_v18 = vphi %v6567_v18, %v8793_v18  }
  0x1c   : >> { %v8774_v30 = vmov %v6451_v5  ;;  %v8775_v31 = vmov %v6455_v4  ;;  %v8776_v32 = vmov %v6459_v3  ;;  %v8777_v33 = vmov %v6463_v2  ;;  %s352_s8 = scalar_lea.vmem %s8762_s2, %s5376_s22  ;;  %s347_s15 = scalar_lea.vmem %s8761_s1, %s5376_s22 }
  0x1d   : >> { %v6469_v34 = vmov 0   ;;  %v356_v35 = vld [vmem:[%s352_s8 + $0x18] sm:$0xff]  ;;  %v355_v36 = vld [vmem:[%s352_s8 + $0x10] sm:$0xff]  ;;  %v349_v38 = vld [vmem:[%s347_s15 + $0x8] sm:$0xff]  ;;  %s6705_s19 = scalar_lea.vmem %s8764_s4, %s501_s16  ;;  %s6826_s29 = scalar_lea.vmem %s8763_s3, %s501_s16  ;;  %vm532_vm0 = vcmask 261120  }
  0x1e   : >> { %6188 = vset.pattern.permute.xlu2 %v6469_v34  ;;  %6187 = vset.pattern.permute.xlu1 %v6469_v34  ;;  %v351_v37 = vld [vmem:[%s347_s15 + $0x18] sm:$0xff]  ;;  %v348_v39 = vld [vmem:[%s347_s15] sm:$0xff]  ;;  %v350_v40 = vld [vmem:[%s347_s15 + $0x10] sm:$0xff] }
  0x1f   : >> { %6186 = vset.pattern.permute.xlu0 %v6469_v34  ;;  %434 = vperm.xlu1 %6187, %v356_v35   ;;  %v353_v41 = vld [vmem:[%s352_s8] sm:$0xff]  ;;  %v511_v42 = vld [vmem:[%s6705_s19 + $0x18] sm:$0xff]  ;;  %v354_v43 = vld [vmem:[%s352_s8 + $0x8] sm:$0xff]  ;;  %s5929_s8 = sshll.u32 %s6467_s21, 1  ;;  %s321_s21 = sadd.s32 1, %s6467_s21  }
  0x20   : >> { %429 = vperm.xlu2 %6188, %v355_v36   ;;  %374 = vperm.xlu0 %6186, %v351_v37   ;;  %v509_v44 = vld [vmem:[%s6705_s19 + $0x8] sm:$0xff]  ;;  %v508_v45 = vld [vmem:[%s6705_s19] sm:$0xff]  ;;  %v510_v46 = vld [vmem:[%s6705_s19 + $0x10] sm:$0xff]  ;;  %s4803_s15 = scalar_lea.vmem %s8766_s6, %s5929_s8  ;;  %s4801_s18 = scalar_lea.vmem %s8765_s5, %s5929_s8 }
  0x21   : >> { %v5415_v47 = vld [vmem:[%s6705_s19 + $0x30] sm:$0xff]  ;;  %v5414_v48 = vld [vmem:[%s6705_s19 + $0x28] sm:$0xff]  ;;  %v5416_v49 = vld [vmem:[%s6705_s19 + $0x38] sm:$0xff]  ;;  %p8602_p11 = scmp.ge.s32.totalorder %s321_s21, 6  }
  0x22   : >> { %v5456_v50 = vld [vmem:[%s6705_s19 + $0x58] sm:$0xff]  ;;  %v5455_v51 = vld [vmem:[%s6705_s19 + $0x50] sm:$0xff]  ;;  %v5413_v52 = vld [vmem:[%s6705_s19 + $0x20] sm:$0xff]  ;;  %vm5060_vm1 = vcmask (%p8602_p11), 1040384   ;;  %vm5062_vm2 = vcmask (%p8602_p11), 1042434   ;;  %vm5064_vm3 = vcmask (%p8602_p11), 1041408  }
  0x23   : >> { %v5453_v53 = vld [vmem:[%s6705_s19 + $0x40] sm:$0xff]  ;;  %v5496_v54 = vld [vmem:[%s6705_s19 + $0x78] sm:$0xff]  ;;  %v5454_v55 = vld [vmem:[%s6705_s19 + $0x48] sm:$0xff]  ;;  %vm5066_vm4 = vcmask (%p8602_p11), 1044484   ;;  %vm5068_vm5 = vcmask (%p8602_p11), 1046534   ;;  %vm5070_vm6 = vcmask (%p8602_p11), 1045508  }
  0x24   : >> { %v5494_v56 = vld [vmem:[%s6705_s19 + $0x68] sm:$0xff]  ;;  %v5493_v57 = vld [vmem:[%s6705_s19 + $0x60] sm:$0xff]  ;;  %v5495_v58 = vld [vmem:[%s6705_s19 + $0x70] sm:$0xff]  ;;  %vm5072_vm7 = vcmask (%p8602_p11), 1043456   ;;  %s5945_s21 = sshll.u32 (%p8602_p11), %s6531_s28, 5  ;;  %s5127_s9 = scalar_lea.sflag (%p8602_p11), [#allocation3], %s270_s13 }
  0x25   : >> { %v5535_v59 = vld [vmem:[%s6705_s19 + $0x90] sm:$0xff]  ;;  %v5534_v60 = vld [vmem:[%s6705_s19 + $0x88] sm:$0xff]  ;;  %v5536_v61 = vld [vmem:[%s6705_s19 + $0x98] sm:$0xff]  ;;  %s5138_s23 = scalar_lea.hbm (%p8602_p11), %s8767_s7, %s5945_s21 }
  0x26   : >> { %v5576_v62 = vld [vmem:[%s6705_s19 + $0xb8] sm:$0xff]  ;;  %v5575_v63 = vld [vmem:[%s6705_s19 + $0xb0] sm:$0xff]  ;;  %v5533_v0 = vld [vmem:[%s6705_s19 + $0x80] sm:$0xff]  ;;  %s5142_s8 = sshll.u32 (%p8602_p11), %s5138_s23, 4  ;;  %s5143_s8 = int_to_ptr.hbm [resolvable:$true] %s5142_s8 }
  0x27   : >> { %364 = vperm.xlu1 %6187, %v349_v38   ;;  %v5573_v1 = vld [vmem:[%s6705_s19 + $0xa0] sm:$0xff]  ;;  %v5616_v2 = vld [vmem:[%s6705_s19 + $0xd8] sm:$0xff]  ;;  %v5574_v3 = vld [vmem:[%s6705_s19 + $0xa8] sm:$0xff]  ;;  %s6219_s14 = sshra.s32 (%p8602_p11), %s5143_s8, 4  ;;  %s6220_s14 = int_to_ptr.hbm [resolvable:$true] %s6219_s14 }
  0x28   : >> { %359 = vperm.xlu2 %6188, %v348_v39   ;;  %369 = vperm.xlu0 %6186, %v350_v40   ;;  %v5614_v4 = vld [vmem:[%s6705_s19 + $0xc8] sm:$0xff]  ;;  %v5613_v5 = vld [vmem:[%s6705_s19 + $0xc0] sm:$0xff]  ;;  %v5615_v6 = vld [vmem:[%s6705_s19 + $0xd0] sm:$0xff]  ;;  %v377_v40 = vperm.slane %v8777_v33, 0  ;;  %p6226_p1 = scmp.lt.s32.totalorder (%p8602_p11), %s6220_s14, %s8767_s7 }
  0x29   : >> { %v5655_v7 = vld [vmem:[%s6705_s19 + $0xf0] sm:$0xff]  ;;  %v5654_v8 = vld [vmem:[%s6705_s19 + $0xe8] sm:$0xff]  ;;  %v5656_v9 = vld [vmem:[%s6705_s19 + $0xf8] sm:$0xff] }
  0x2a   : >> { %v5696_v34 = vld [vmem:[%s6705_s19 + $0x118] sm:$0xff]  ;;  %v5695_v35 = vld [vmem:[%s6705_s19 + $0x110] sm:$0xff]  ;;  %v5653_v36 = vld [vmem:[%s6705_s19 + $0xe0] sm:$0xff] }
  0x2b   : >> { %v5693_v37 = vld [vmem:[%s6705_s19 + $0x100] sm:$0xff]  ;;  %v5736_v38 = vld [vmem:[%s6705_s19 + $0x138] sm:$0xff]  ;;  %v5694_v39 = vld [vmem:[%s6705_s19 + $0x108] sm:$0xff] }
  0x2f   : >> { %419 = vperm.xlu1 %6187, %v353_v41   ;;  %v378_v41 = vperm.slane %v8776_v32, 0 }
  0x30   : >> { %529 = vperm.xlu2 %6188, %v511_v42   ;;  %424 = vperm.xlu0 %6186, %v354_v43   ;;  %v379_v42 = vperm.slane %v8775_v31, 0  ;;  %v380_v43 = vperm.slane %v8774_v30, 0 }
  0x37   : >> { %519 = vperm.xlu1 %6187, %v509_v44  }
  0x38   : >> { %514 = vperm.xlu2 %6188, %v508_v45   ;;  %524 = vperm.xlu0 %6186, %v510_v46  }
  0x3f   : >> { %832 = vperm.xlu1 %6187, %v5415_v47  }
  0x40   : >> { %827 = vperm.xlu2 %6188, %v5414_v48   ;;  %837 = vperm.xlu0 %6186, %v5416_v49  }
  0x47   : >> { %1144 = vperm.xlu1 %6187, %v5456_v50  }
  0x48   : >> { %1139 = vperm.xlu2 %6188, %v5455_v51   ;;  %822 = vperm.xlu0 %6186, %v5413_v52   ;;  %v5734_v51 = vld [vmem:[%s6705_s19 + $0x128] sm:$0xff]  ;;  %v5733_v52 = vld [vmem:[%s6705_s19 + $0x120] sm:$0xff] }
  0x4f   : >> { %1129 = vperm.xlu1 %6187, %v5453_v53   ;;  %v5735_v53 = vld [vmem:[%s6705_s19 + $0x130] sm:$0xff] }
  0x50   : >> { %1451 = vperm.xlu2 %6188, %v5496_v54   ;;  %1134 = vperm.xlu0 %6186, %v5454_v55  }
  0x57   : >> { %1441 = vperm.xlu1 %6187, %v5494_v56  }
  0x58   : >> { %1436 = vperm.xlu2 %6188, %v5493_v57   ;;  %1446 = vperm.xlu0 %6186, %v5495_v58  }
  0x5f   : >> { %1753 = vperm.xlu1 %6187, %v5535_v59  }
  0x60   : >> { %1748 = vperm.xlu2 %6188, %v5534_v60   ;;  %1758 = vperm.xlu0 %6186, %v5536_v61  }
  0x67   : >> { %2065 = vperm.xlu1 %6187, %v5576_v62  }
  0x68   : >> { %2060 = vperm.xlu2 %6188, %v5575_v63   ;;  %1743 = vperm.xlu0 %6186, %v5533_v0  }
  0x6f   : >> { %2050 = vperm.xlu1 %6187, %v5573_v1  }
  0x70   : >> { %2372 = vperm.xlu2 %6188, %v5616_v2   ;;  %2055 = vperm.xlu0 %6186, %v5574_v3  }
  0x77   : >> { %2362 = vperm.xlu1 %6187, %v5614_v4   ;;  %v5775_v4 = vld [vmem:[%s6705_s19 + $0x150] sm:$0xff] }
  0x78   : >> { %2357 = vperm.xlu2 %6188, %v5613_v5   ;;  %2367 = vperm.xlu0 %6186, %v5615_v6   ;;  %v5774_v5 = vld [vmem:[%s6705_s19 + $0x148] sm:$0xff]  ;;  %v6776_v6 = vperm.slane %v8773_v29, 0 }
  0x7a   : >> { %v6752_v46 = vpop.permute.xlu2 %429 }
  0x7f   : >> { %2674 = vperm.xlu1 %6187, %v5655_v7  }
  0x80   : >> { %2669 = vperm.xlu2 %6188, %v5654_v8   ;;  %2679 = vperm.xlu0 %6186, %v5656_v9   ;;  %v5776_v8 = vld [vmem:[%s6705_s19 + $0x158] sm:$0xff] }
  0x82   : >> { %v6778_v7 = vpop.permute.xlu2 %359 }
  0x87   : >> { %2986 = vperm.xlu1 %6187, %v5696_v34  }
  0x88   : >> { %2981 = vperm.xlu2 %6188, %v5695_v35   ;;  %2664 = vperm.xlu0 %6186, %v5653_v36  }
  0x8f   : >> { %2971 = vperm.xlu1 %6187, %v5693_v37   ;;  %v385_v37 = vmul.f32 %v377_v40, %v6778_v7 }
  0x90   : >> { %3293 = vperm.xlu2 %6188, %v5736_v38   ;;  %2976 = vperm.xlu0 %6186, %v5694_v39   ;;  %v6787_v38 = vperm.slane %v8772_v28, 0  ;;  %v6790_v39 = vperm.slane %v8771_v27, 0 }
  0x91   : >> { %v6748_v44 = vpop.permute.xlu1 %434 }
  0x92   : >> { %v6750_v45 = vpop.permute.xlu0 %374 }
  0x93   : >> { %v409_v47 = vmul.f32 %v377_v40, %v6750_v45  ;;  %v410_v48 = vmul.f32 %v378_v41, %v6750_v45  ;;  %v411_v49 = vmul.f32 %v379_v42, %v6750_v45  ;;  %v412_v50 = vmul.f32 %v380_v43, %v6750_v45 }
  0x95   : >> { %v461_v54 = vadd.f32 %v6748_v44, %v409_v47  ;;  %v462_v55 = vadd.f32 %v6748_v44, %v410_v48  ;;  %v463_v56 = vadd.f32 %v6748_v44, %v411_v49  ;;  %v464_v57 = vadd.f32 %v6748_v44, %v412_v50 }
  0x96   : >> { %v6793_v47 = vperm.slane %v8770_v26, 0 }
  0x97   : >> { %3283 = vperm.xlu1 %6187, %v5734_v51   ;;  %v493_v58 = vmax.f32 %v461_v54, 0.0  ;;  %v494_v59 = vmax.f32 %v462_v55, 0.0  ;;  %v495_v60 = vmax.f32 %v463_v56, 0.0  ;;  %v496_v61 = vmax.f32 %v464_v57, 0.0 }
  0x98   : >> { %3278 = vperm.xlu2 %6188, %v5733_v52   ;;  %3288 = vperm.xlu0 %6186, %v5735_v53   ;;  %v386_v53 = vmul.f32 %v378_v41, %v6778_v7  ;;  %v387_v54 = vmul.f32 %v379_v42, %v6778_v7  ;;  %v388_v55 = vmul.f32 %v380_v43, %v6778_v7 }
  0x99   : >> { %557 = vmatpush.msra.mxu0 %v493_v58  ;;  %586 = vmatpush.msra.mxu1 %v494_v59  ;;  %v6765_v62 = vpop.permute.xlu1 %364 }
  0x9a   : >> { %615 = vmatpush.msra.mxu2 %v495_v60  ;;  %644 = vmatpush.msra.mxu3 %v496_v61  ;;  %v6767_v63 = vpop.permute.xlu0 %369  ;;  %v393_v52 = vmul.f32 %v377_v40, %v6765_v62  ;;  %v394_v57 = vmul.f32 %v378_v41, %v6765_v62  ;;  %v395_v58 = vmul.f32 %v379_v42, %v6765_v62 }
  0x9b   : >> { %v401_v0 = vmul.f32 %v377_v40, %v6767_v63  ;;  %v402_v1 = vmul.f32 %v378_v41, %v6767_v63  ;;  %v403_v2 = vmul.f32 %v379_v42, %v6767_v63  ;;  %v404_v3 = vmul.f32 %v380_v43, %v6767_v63 }
  0x9c   : >> { %v396_v59 = vmul.f32 %v380_v43, %v6765_v62  ;;  %v413_v40 = vmul.f32 %v6776_v6, %v6750_v45  ;;  %v414_v61 = vmul.f32 %v6787_v38, %v6750_v45  ;;  %v415_v41 = vmul.f32 %v6790_v39, %v6750_v45 }
  0x9d   : >> { %v453_v9 = vadd.f32 %v6752_v46, %v401_v0  ;;  %v454_v34 = vadd.f32 %v6752_v46, %v402_v1  ;;  %v455_v35 = vadd.f32 %v6752_v46, %v403_v2  ;;  %v456_v36 = vadd.f32 %v6752_v46, %v404_v3 }
  0x9f   : >> { %3595 = vperm.xlu1 %6187, %v5775_v4   ;;  %v485_v48 = vmax.f32 %v453_v9, 0.0  ;;  %v486_v49 = vmax.f32 %v454_v34, 0.0  ;;  %v487_v50 = vmax.f32 %v455_v35, 0.0  ;;  %v488_v51 = vmax.f32 %v456_v36, 0.0  ;;  %v5773_v36 = vld [vmem:[%s6705_s19 + $0x140] sm:$0xff] }
  0xa0   : >> { %3590 = vperm.xlu2 %6188, %v5774_v5   ;;  %3600 = vperm.xlu0 %6186, %v5776_v8   ;;  %v416_v5 = vmul.f32 %v6793_v47, %v6750_v45  ;;  %v406_v45 = vmul.f32 %v6787_v38, %v6767_v63 }
  0xa1   : >> { %558 = vmatpush.msra.mxu0 %v485_v48  ;;  %587 = vmatpush.msra.mxu1 %v486_v49  ;;  %v6799_v56 = vpop.permute.xlu1 %419  ;;  %v405_v49 = vmul.f32 %v6776_v6, %v6767_v63 }
  0xa2   : >> { %616 = vmatpush.msra.mxu2 %v487_v50  ;;  %645 = vmatpush.msra.mxu3 %v488_v51  ;;  %v6804_v60 = vpop.permute.xlu0 %424  ;;  %v437_v2 = vadd.f32 %v6799_v56, %v385_v37  ;;  %v438_v3 = vadd.f32 %v6799_v56, %v386_v53  ;;  %v439_v4 = vadd.f32 %v6799_v56, %v387_v54  ;;  %v5816_v37 = vld [vmem:[%s6705_s19 + $0x178] sm:$0xff]  ;;  %v5815_v50 = vld [vmem:[%s6705_s19 + $0x170] sm:$0xff] }
  0xa3   : >> { %v445_v42 = vadd.f32 %v6804_v60, %v393_v52  ;;  %v446_v43 = vadd.f32 %v6804_v60, %v394_v57  ;;  %v447_v0 = vadd.f32 %v6804_v60, %v395_v58  ;;  %v448_v1 = vadd.f32 %v6804_v60, %v396_v59 }
  0xa4   : >> { %v440_v48 = vadd.f32 %v6799_v56, %v388_v55  ;;  %v407_v51 = vmul.f32 %v6790_v39, %v6767_v63  ;;  %v389_v52 = vmul.f32 %v6776_v6, %v6778_v7  ;;  %v469_v53 = vmax.f32 %v437_v2, 0.0 }
  0xa5   : >> { %v477_v8 = vmax.f32 %v445_v42, 0.0  ;;  %v478_v9 = vmax.f32 %v446_v43, 0.0  ;;  %v479_v34 = vmax.f32 %v447_v0, 0.0  ;;  %v480_v35 = vmax.f32 %v448_v1, 0.0  ;;  %v6845_v42 = vld [vmem:[%s6826_s29] sm:$0xff] }
  0xa6   : >> { %v465_v54 = vadd.f32 %v6748_v44, %v413_v40  ;;  %v466_v55 = vadd.f32 %v6748_v44, %v414_v61  ;;  %v408_v57 = vmul.f32 %v6793_v47, %v6767_v63  ;;  %v470_v58 = vmax.f32 %v438_v3, 0.0 }
  0xa7   : >> { %559 = vmatpush.msra.mxu0 %v477_v8  ;;  %588 = vmatpush.msra.mxu1 %v478_v9  ;;  %v471_v59 = vmax.f32 %v439_v4, 0.0  ;;  %v467_v43 = vadd.f32 %v6748_v44, %v415_v41  ;;  %v468_v0 = vadd.f32 %v6748_v44, %v416_v5  ;;  %v472_v1 = vmax.f32 %v440_v48, 0.0 }
  0xa8   : >> { %617 = vmatpush.msra.mxu2 %v479_v34  ;;  %646 = vmatpush.msra.mxu3 %v480_v35  ;;  %v457_v40 = vadd.f32 %v6752_v46, %v405_v49  ;;  %v458_v61 = vadd.f32 %v6752_v46, %v406_v45  ;;  %v397_v63 = vmul.f32 %v6776_v6, %v6765_v62  ;;  %v497_v41 = vmax.f32 %v465_v54, 0.0 }
  0xa9   : >> { %3585 = vperm.xlu0 %6186, %v5773_v36   ;;  %3907 = vperm.xlu1 %6187, %v5816_v37   ;;  %v459_v2 = vadd.f32 %v6752_v46, %v407_v51  ;;  %v398_v3 = vmul.f32 %v6787_v38, %v6765_v62  ;;  %v399_v44 = vmul.f32 %v6790_v39, %v6765_v62  ;;  %v498_v8 = vmax.f32 %v466_v55, 0.0 }
  0xaa   : >> { %3902 = vperm.xlu2 %6188, %v5815_v50   ;;  %560 = vmatpush.msra.mxu0 %v469_v53  ;;  %v460_v4 = vadd.f32 %v6752_v46, %v408_v57  ;;  %v449_v5 = vadd.f32 %v6804_v60, %v397_v63  ;;  %v400_v6 = vmul.f32 %v6793_v47, %v6765_v62  ;;  %v499_v9 = vmax.f32 %v467_v43, 0.0  ;;  %v5814_v57 = vld [vmem:[%s6705_s19 + $0x168] sm:$0xff]  ;;  %v5853_v63 = vld [vmem:[%s6705_s19 + $0x180] sm:$0xff] }
  0xab   : >> { %589 = vmatpush.msra.mxu1 %v470_v58  ;;  %618 = vmatpush.msra.mxu2 %v471_v59  ;;  %v450_v34 = vadd.f32 %v6804_v60, %v398_v3  ;;  %v451_v35 = vadd.f32 %v6804_v60, %v399_v44  ;;  %v500_v46 = vmax.f32 %v468_v0, 0.0  ;;  %v489_v36 = vmax.f32 %v457_v40, 0.0  ;;  %v5856_v59 = vld [vmem:[%s6705_s19 + $0x198] sm:$0xff]  ;;  %v5855_v40 = vld [vmem:[%s6705_s19 + $0x190] sm:$0xff] }
  0xac   : >> { %647 = vmatpush.msra.mxu3 %v472_v1  ;;  %5377 = vmatmul.msk.f32.vlgmr.msra.gmra.mxu0 %vm532_vm0, %v6845_v42  ;;  %v452_v62 = vadd.f32 %v6804_v60, %v400_v6  ;;  %v390_v37 = vmul.f32 %v6787_v38, %v6778_v7  ;;  %v490_v48 = vmax.f32 %v458_v61, 0.0  ;;  %v491_v49 = vmax.f32 %v459_v2, 0.0  ;;  %v5854_v61 = vld [vmem:[%s6705_s19 + $0x188] sm:$0xff]  ;;  %v505_v2 = vld [vmem:[%s6826_s29 + $0x10] sm:$0xff]  ;;  %v5896_v3 = vld [vmem:[%s6705_s19 + $0x1b8] sm:$0xff] }
  0xad   : >> { %5381 = vmatmul.msk.f32.vlgmr.msra.gmra.mxu1 %vm532_vm0, %v6845_v42  ;;  %5385 = vmatmul.msk.f32.vlgmr.msra.gmra.mxu2 %vm532_vm0, %v6845_v42  ;;  %v391_v45 = vmul.f32 %v6790_v39, %v6778_v7  ;;  %v392_v50 = vmul.f32 %v6793_v47, %v6778_v7  ;;  %v492_v51 = vmax.f32 %v460_v4, 0.0  ;;  %v481_v60 = vmax.f32 %v449_v5, 0.0  ;;  %v5813_v47 = vld [vmem:[%s6705_s19 + $0x160] sm:$0xff]  ;;  %v5895_v44 = vld [vmem:[%s6705_s19 + $0x1b0] sm:$0xff]  ;;  %v506_v4 = vld [vmem:[%s6826_s29 + $0x18] sm:$0xff] }
  0xae   : >> { %5389 = vmatmul.msk.f32.vlgmr.msra.gmra.mxu3 %vm532_vm0, %v6845_v42  ;;  %673 = vmatpush.msrb.mxu0 %v497_v41  ;;  %v441_v53 = vadd.f32 %v6799_v56, %v389_v52  ;;  %v442_v38 = vadd.f32 %v6799_v56, %v390_v37  ;;  %v482_v54 = vmax.f32 %v450_v34, 0.0  ;;  %v483_v55 = vmax.f32 %v451_v35, 0.0  ;;  %v5894_v41 = vld [vmem:[%s6705_s19 + $0x1a8] sm:$0xff]  ;;  %v5893_v5 = vld [vmem:[%s6705_s19 + $0x1a0] sm:$0xff] }
  0xaf   : >> { %702 = vmatpush.msrb.mxu1 %v498_v8  ;;  %731 = vmatpush.msrb.mxu2 %v499_v9  ;;  %v443_v39 = vadd.f32 %v6799_v56, %v391_v45  ;;  %v444_v58 = vadd.f32 %v6799_v56, %v392_v50  ;;  %v484_v7 = vmax.f32 %v452_v62, 0.0  ;;  %v504_v56 = vld [vmem:[%s6826_s29 + $0x8] sm:$0xff]  ;;  %v4804_v6 = vld [vmem:[%s4803_s15] sm:$0x3]  ;;  %v6936_v45 = vpop.permute.xlu0 %524  ;;  %s6221_s15 = scalar_lea.hbm (%p8602_p11), %s6220_s14, 32 }
  0xb0   : >> { %760 = vmatpush.msrb.mxu3 %v500_v46  ;;  %674 = vmatpush.msrb.mxu0 %v489_v36  ;;  %v473_v52 = vmax.f32 %v441_v53, 0.0  ;;  %v474_v43 = vmax.f32 %v442_v38, 0.0  ;;  %p6222_p12 = scmp.ne.s32.totalorder (%p8602_p11), %s6220_s14, %s6221_s15 }
  0xb1   : >> { %703 = vmatpush.msrb.mxu1 %v490_v48  ;;  %732 = vmatpush.msrb.mxu2 %v491_v49  ;;  %v475_v0 = vmax.f32 %v443_v39, 0.0  ;;  %v476_v1 = vmax.f32 %v444_v58, 0.0  ;;  %v6934_v49 = vpop.permute.xlu2 %529  ;;  %v6942_v39 = vpop.permute.xlu1 %519 }
  0xb2   : >> { %761 = vmatpush.msrb.mxu3 %v492_v51  ;;  %675 = vmatpush.msrb.mxu0 %v481_v60  ;;  %p6223_p13 = pnand (%p8602_p11), %p6222_p12, %p6548_p5 }
  0xb3   : >> { %704 = vmatpush.msrb.mxu1 %v482_v54  ;;  %733 = vmatpush.msrb.mxu2 %v483_v55 }
  0xb4   : >> { %762 = vmatpush.msrb.mxu3 %v484_v7  ;;  %3897 = vperm.xlu0 %6186, %v5814_v57   ;;  %p6224_p0 = pneg (%p8602_p11), %p6223_p13 }
  0xb5   : >> { %3892 = vperm.xlu1 %6187, %v5813_v47   ;;  %4214 = vperm.xlu2 %6188, %v5856_v59  }
  0xb6   : >> { %676 = vmatpush.msrb.mxu0 %v473_v52  ;;  %705 = vmatpush.msrb.mxu1 %v474_v43 }
  0xb7   : >> { %734 = vmatpush.msrb.mxu2 %v475_v0  ;;  %763 = vmatpush.msrb.mxu3 %v476_v1 }
  0xb8   : >> { %5378 = vmatmul.msk.f32.gmra.mxu0 %vm532_vm0, %v504_v56  ;;  %5382 = vmatmul.msk.f32.gmra.mxu1 %vm532_vm0, %v504_v56 }
  0xb9   : >> { %5386 = vmatmul.msk.f32.gmra.mxu2 %vm532_vm0, %v504_v56  ;;  %5390 = vmatmul.msk.f32.gmra.mxu3 %vm532_vm0, %v504_v56  ;;  %v6946_v52 = vpop.permute.xlu2 %514 }
  0xbc   : >> { %4209 = vperm.xlu0 %6186, %v5855_v40  }
  0xbd   : >> { %4204 = vperm.xlu1 %6187, %v5854_v61   ;;  %4199 = vperm.xlu2 %6188, %v5853_v63  }
  0xc0   : >> { %5379 = vmatmul.msk.f32.gmra.mxu0 %vm532_vm0, %v505_v2  ;;  %5383 = vmatmul.msk.f32.gmra.mxu1 %vm532_vm0, %v505_v2 }
  0xc1   : >> { %5387 = vmatmul.msk.f32.gmra.mxu2 %vm532_vm0, %v505_v2  ;;  %5391 = vmatmul.msk.f32.gmra.mxu3 %vm532_vm0, %v505_v2 }
  0xc4   : >> { %4521 = vperm.xlu0 %6186, %v5896_v3  }
  0xc5   : >> { %4516 = vperm.xlu1 %6187, %v5895_v44   ;;  %4511 = vperm.xlu2 %6188, %v5894_v41  }
  0xc8   : >> { %5380 = vmatmul.msk.f32.gmra.mxu0 %vm532_vm0, %v506_v4  ;;  %5384 = vmatmul.msk.f32.gmra.mxu1 %vm532_vm0, %v506_v4 }
  0xc9   : >> { %5388 = vmatmul.msk.f32.gmra.mxu2 %vm532_vm0, %v506_v4  ;;  %5392 = vmatmul.msk.f32.gmra.mxu3 %vm532_vm0, %v506_v4 }
  0xcc   : >> { %4506 = vperm.xlu0 %6186, %v5893_v5  }
  0xcd   : >> { %4807 = vperm.xlu1 %6187, %v4804_v6  }
  0xd0   : >> { %5393 = vmatmul.msk.f32.vlgmr.msrb.gmra.mxu0 %vm532_vm0, %v6845_v42  ;;  %5397 = vmatmul.msk.f32.vlgmr.msrb.gmra.mxu1 %vm532_vm0, %v6845_v42 }
  0xd1   : >> { %5401 = vmatmul.msk.f32.vlgmr.msrb.gmra.mxu2 %vm532_vm0, %v6845_v42  ;;  %5405 = vmatmul.msk.f32.vlgmr.msrb.gmra.mxu3 %vm532_vm0, %v6845_v42 }
  0xd8   : >> { %5394 = vmatmul.msk.f32.gmra.mxu0 %vm532_vm0, %v504_v56  ;;  %5398 = vmatmul.msk.f32.gmra.mxu1 %vm532_vm0, %v504_v56 }
  0xd9   : >> { %5402 = vmatmul.msk.f32.gmra.mxu2 %vm532_vm0, %v504_v56  ;;  %5406 = vmatmul.msk.f32.gmra.mxu3 %vm532_vm0, %v504_v56 }
  0xe0   : >> { %5395 = vmatmul.msk.f32.gmra.mxu0 %vm532_vm0, %v505_v2  ;;  %5399 = vmatmul.msk.f32.gmra.mxu1 %vm532_vm0, %v505_v2 }
  0xe1   : >> { %5403 = vmatmul.msk.f32.gmra.mxu2 %vm532_vm0, %v505_v2  ;;  %5407 = vmatmul.msk.f32.gmra.mxu3 %vm532_vm0, %v505_v2 }
  0xe8   : >> { %5396 = vmatmul.msk.f32.gmra.mxu0 %vm532_vm0, %v506_v4  ;;  %5400 = vmatmul.msk.f32.gmra.mxu1 %vm532_vm0, %v506_v4 }
  0xe9   : >> { %5404 = vmatmul.msk.f32.gmra.mxu2 %vm532_vm0, %v506_v4  ;;  %5408 = vmatmul.msk.f32.gmra.mxu3 %vm532_vm0, %v506_v4 }
 0x129   : >> { %v562_v42 = vpop.f32.mrf.mxu0 }
 0x12a   : >> { %v591_v8 = vpop.f32.mrf.mxu1  ;;  %v563_v43 = vadd.f32 %v562_v42, %v6946_v52 }
 0x12b   : >> { %v592_v0 = vadd.f32 %v591_v8, %v6946_v52 }
 0x12c   : >> { %v777_v42 = vmax.f32 %v563_v43, 0.0 }
 0x12d   : >> { %v778_v8 = vmax.f32 %v592_v0, 0.0 }
 0x130   : >> { %v620_v9 = vpop.f32.mrf.mxu2 }
 0x131   : >> { %v649_v34 = vpop.f32.mrf.mxu3 }
 0x135   : >> { %v565_v35 = vpop.f32.mrf.mxu0  ;;  %v594_v46 = vpop.f32.mrf.mxu1 }
 0x136   : >> { %v566_v58 = vadd.f32 %v565_v35, %v6942_v39  ;;  %v595_v7 = vadd.f32 %v594_v46, %v6942_v39 }
 0x138   : >> { %v785_v40 = vmax.f32 %v566_v58, 0.0  ;;  %v786_v61 = vmax.f32 %v595_v7, 0.0  ;;  %v6974_v7 = vld [vmem:[%s6826_s29 + $0x28] sm:$0xff] }
 0x13c   : >> { %v623_v36 = vpop.f32.mrf.mxu2  ;;  %v652_v62 = vpop.f32.mrf.mxu3 }
 0x13d   : >> { %v568_v37 = vpop.f32.mrf.mxu0  ;;  %v597_v48 = vpop.f32.mrf.mxu1  ;;  %v624_v35 = vadd.f32 %v623_v36, %v6942_v39  ;;  %v653_v46 = vadd.f32 %v652_v62, %v6942_v39 }
 0x13e   : >> { %v569_v38 = vadd.f32 %v568_v37, %v6936_v45  ;;  %v598_v54 = vadd.f32 %v597_v48, %v6936_v45 }
 0x13f   : >> { %v787_v36 = vmax.f32 %v624_v35, 0.0  ;;  %v788_v62 = vmax.f32 %v653_v46, 0.0 }
 0x140   : >> { %v793_v1 = vmax.f32 %v569_v38, 0.0  ;;  %v794_v56 = vmax.f32 %v598_v54, 0.0 }
 0x144   : >> { %v626_v50 = vpop.f32.mrf.mxu2  ;;  %v655_v51 = vpop.f32.mrf.mxu3 }
 0x145   : >> { %v571_v60 = vpop.f32.mrf.mxu0  ;;  %v600_v53 = vpop.f32.mrf.mxu1  ;;  %v627_v3 = vadd.f32 %v626_v50, %v6936_v45  ;;  %v656_v44 = vadd.f32 %v655_v51, %v6936_v45  ;;  %v6961_v50 = vld [vmem:[%s6826_s29 + $0x20] sm:$0xff]  ;;  %v621_v51 = vadd.f32 %v620_v9, %v6946_v52 }
 0x146   : >> { %v572_v55 = vadd.f32 %v571_v60, %v6934_v49  ;;  %v601_v57 = vadd.f32 %v600_v53, %v6934_v49  ;;  %v650_v60 = vadd.f32 %v649_v34, %v6946_v52 }
 0x147   : >> { %v795_v53 = vmax.f32 %v627_v3, 0.0  ;;  %v796_v38 = vmax.f32 %v656_v44, 0.0  ;;  %v779_v34 = vmax.f32 %v621_v51, 0.0 }
 0x148   : >> { %v801_v47 = vmax.f32 %v572_v55, 0.0  ;;  %v802_v59 = vmax.f32 %v601_v57, 0.0  ;;  %v780_v55 = vmax.f32 %v650_v60, 0.0 }
 0x14a   : >> { %864 = vmatpush.msra.mxu0 %v801_v47  ;;  %893 = vmatpush.msra.mxu1 %v802_v59 }
 0x14c   : >> { %v629_v63 = vpop.f32.mrf.mxu2  ;;  %v658_v2 = vpop.f32.mrf.mxu3  ;;  %865 = vmatpush.msra.mxu0 %v793_v1  ;;  %894 = vmatpush.msra.mxu1 %v794_v56  ;;  %v6985_v1 = vld [vmem:[%s6826_s29 + $0x30] sm:$0xff] }
 0x14d   : >> { %v630_v41 = vadd.f32 %v629_v63, %v6934_v49  ;;  %v659_v4 = vadd.f32 %v658_v2, %v6934_v49  ;;  %v6954_v5 = vpop.f32.mrf.mxu0  ;;  %v6956_v6 = vpop.f32.mrf.mxu1 }
 0x14e   : >> { %866 = vmatpush.msra.mxu0 %v785_v40  ;;  %895 = vmatpush.msra.mxu1 %v786_v61 }
 0x14f   : >> { %v803_v37 = vmax.f32 %v630_v41, 0.0  ;;  %v804_v48 = vmax.f32 %v659_v4, 0.0  ;;  %v7000_v4 = vld [vmem:[%s6826_s29 + $0x38] sm:$0xff] }
 0x150   : >> { %867 = vmatpush.msra.mxu0 %v777_v42  ;;  %896 = vmatpush.msra.mxu1 %v778_v8 }
 0x151   : >> { %922 = vmatpush.msra.mxu2 %v803_v37  ;;  %951 = vmatpush.msra.mxu3 %v804_v48  ;;  %v679_v37 = vadd.f32 %v6954_v5, %v6946_v52  ;;  %v708_v48 = vadd.f32 %v6956_v6, %v6946_v52 }
 0x152   : >> { %5417 = vmatmul.msk.f32.vlgmr.msra.gmra.mxu0 %vm532_vm0, %v6961_v50  ;;  %5421 = vmatmul.msk.f32.vlgmr.msra.gmra.mxu1 %vm532_vm0, %v6961_v50 }
 0x153   : >> { %923 = vmatpush.msra.mxu2 %v795_v53  ;;  %952 = vmatpush.msra.mxu3 %v796_v38  ;;  %v782_v6 = vmax.f32 %v708_v48, 0.0 }
 0x154   : >> { %v6969_v54 = vpop.f32.mrf.mxu2  ;;  %v6971_v9 = vpop.f32.mrf.mxu3 }
 0x155   : >> { %924 = vmatpush.msra.mxu2 %v787_v36  ;;  %953 = vmatpush.msra.mxu3 %v788_v62  ;;  %v681_v57 = vpop.f32.mrf.mxu0  ;;  %v710_v58 = vpop.f32.mrf.mxu1 }
 0x156   : >> { %v682_v35 = vadd.f32 %v681_v57, %v6942_v39  ;;  %v711_v46 = vadd.f32 %v710_v58, %v6942_v39  ;;  %v781_v58 = vmax.f32 %v679_v37, 0.0 }
 0x157   : >> { %925 = vmatpush.msra.mxu2 %v779_v34  ;;  %954 = vmatpush.msra.mxu3 %v780_v55 }
 0x158   : >> { %5425 = vmatmul.msk.f32.vlgmr.msra.gmra.mxu2 %vm532_vm0, %v6961_v50  ;;  %5429 = vmatmul.msk.f32.vlgmr.msra.gmra.mxu3 %vm532_vm0, %v6961_v50  ;;  %v789_v36 = vmax.f32 %v682_v35, 0.0  ;;  %v790_v62 = vmax.f32 %v711_v46, 0.0  ;;  %v7064_v35 = vpop.permute.xlu1 %832 }
 0x15a   : >> { %5418 = vmatmul.msk.f32.gmra.mxu0 %vm532_vm0, %v6974_v7  ;;  %5422 = vmatmul.msk.f32.gmra.mxu1 %vm532_vm0, %v6974_v7 }
 0x15c   : >> { %v739_v47 = vpop.f32.mrf.mxu2  ;;  %v768_v59 = vpop.f32.mrf.mxu3 }
 0x15d   : >> { %v684_v43 = vpop.f32.mrf.mxu0  ;;  %v713_v0 = vpop.f32.mrf.mxu1 }
 0x15e   : >> { %v685_v44 = vadd.f32 %v684_v43, %v6936_v45  ;;  %v714_v41 = vadd.f32 %v713_v0, %v6936_v45 }
 0x160   : >> { %5426 = vmatmul.msk.f32.gmra.mxu2 %vm532_vm0, %v6974_v7  ;;  %5430 = vmatmul.msk.f32.gmra.mxu3 %vm532_vm0, %v6974_v7  ;;  %v797_v51 = vmax.f32 %v685_v44, 0.0  ;;  %v798_v60 = vmax.f32 %v714_v41, 0.0  ;;  %v7062_v41 = vpop.permute.xlu0 %837 }
 0x162   : >> { %5419 = vmatmul.msk.f32.gmra.mxu0 %vm532_vm0, %v6985_v1  ;;  %5423 = vmatmul.msk.f32.gmra.mxu1 %vm532_vm0, %v6985_v1 }
 0x164   : >> { %v742_v56 = vpop.f32.mrf.mxu2  ;;  %v771_v40 = vpop.f32.mrf.mxu3 }
 0x165   : >> { %v687_v61 = vpop.f32.mrf.mxu0  ;;  %v716_v63 = vpop.f32.mrf.mxu1  ;;  %v743_v57 = vadd.f32 %v742_v56, %v6936_v45  ;;  %v772_v5 = vadd.f32 %v771_v40, %v6936_v45  ;;  %v766_v45 = vadd.f32 %v6971_v9, %v6946_v52 }
 0x166   : >> { %v688_v2 = vadd.f32 %v687_v61, %v6934_v49  ;;  %v717_v3 = vadd.f32 %v716_v63, %v6934_v49  ;;  %v740_v61 = vadd.f32 %v739_v47, %v6942_v39  ;;  %v769_v63 = vadd.f32 %v768_v59, %v6942_v39 }
 0x167   : >> { %v799_v56 = vmax.f32 %v743_v57, 0.0  ;;  %v800_v40 = vmax.f32 %v772_v5, 0.0 }
 0x168   : >> { %v805_v42 = vmax.f32 %v688_v2, 0.0  ;;  %v806_v8 = vmax.f32 %v717_v3, 0.0  ;;  %5427 = vmatmul.msk.f32.gmra.mxu2 %vm532_vm0, %v6985_v1  ;;  %5431 = vmatmul.msk.f32.gmra.mxu3 %vm532_vm0, %v6985_v1  ;;  %v791_v39 = vmax.f32 %v740_v61, 0.0  ;;  %v792_v47 = vmax.f32 %v769_v63, 0.0 }
 0x169   : >> { %v784_v2 = vmax.f32 %v766_v45, 0.0 }
 0x16a   : >> { %5420 = vmatmul.msk.f32.gmra.mxu0 %vm532_vm0, %v7000_v4  ;;  %5424 = vmatmul.msk.f32.gmra.mxu1 %vm532_vm0, %v7000_v4 }
 0x16b   : >> { %980 = vmatpush.msrb.mxu0 %v805_v42  ;;  %1009 = vmatpush.msrb.mxu1 %v806_v8 }
 0x16c   : >> { %v745_v53 = vpop.f32.mrf.mxu2  ;;  %v774_v38 = vpop.f32.mrf.mxu3 }
 0x16d   : >> { %v746_v34 = vadd.f32 %v745_v53, %v6934_v49  ;;  %v775_v55 = vadd.f32 %v774_v38, %v6934_v49  ;;  %981 = vmatpush.msrb.mxu0 %v797_v51  ;;  %1010 = vmatpush.msrb.mxu1 %v798_v60  ;;  %v737_v49 = vadd.f32 %v6969_v54, %v6946_v52  ;;  %v7070_v53 = vpop.permute.xlu2 %827  ;;  %v7072_v38 = vpop.permute.xlu0 %822 }
 0x16f   : >> { %v807_v43 = vmax.f32 %v746_v34, 0.0  ;;  %v808_v0 = vmax.f32 %v775_v55, 0.0  ;;  %982 = vmatpush.msrb.mxu0 %v789_v36  ;;  %1011 = vmatpush.msrb.mxu1 %v790_v62  ;;  %v783_v59 = vmax.f32 %v737_v49, 0.0 }
 0x170   : >> { %5428 = vmatmul.msk.f32.gmra.mxu2 %vm532_vm0, %v7000_v4  ;;  %5432 = vmatmul.msk.f32.gmra.mxu3 %vm532_vm0, %v7000_v4 }
 0x171   : >> { %983 = vmatpush.msrb.mxu0 %v781_v58  ;;  %1012 = vmatpush.msrb.mxu1 %v782_v6 }
 0x172   : >> { %1038 = vmatpush.msrb.mxu2 %v807_v43  ;;  %1067 = vmatpush.msrb.mxu3 %v808_v0 }
 0x173   : >> { %5433 = vmatmul.msk.f32.vlgmr.msrb.gmra.mxu0 %vm532_vm0, %v6961_v50  ;;  %5437 = vmatmul.msk.f32.vlgmr.msrb.gmra.mxu1 %vm532_vm0, %v6961_v50 }
 0x174   : >> { %1039 = vmatpush.msrb.mxu2 %v799_v56  ;;  %1068 = vmatpush.msrb.mxu3 %v800_v40 }
 0x176   : >> { %1040 = vmatpush.msrb.mxu2 %v791_v39  ;;  %1069 = vmatpush.msrb.mxu3 %v792_v47  ;;  %v7083_v39 = vld [vmem:[%s6826_s29 + $0x40] sm:$0xff] }
 0x178   : >> { %1041 = vmatpush.msrb.mxu2 %v783_v59  ;;  %1070 = vmatpush.msrb.mxu3 %v784_v2 }
 0x179   : >> { %5441 = vmatmul.msk.f32.vlgmr.msrb.gmra.mxu2 %vm532_vm0, %v6961_v50  ;;  %5445 = vmatmul.msk.f32.vlgmr.msrb.gmra.mxu3 %vm532_vm0, %v6961_v50 }
 0x17b   : >> { %5434 = vmatmul.msk.f32.gmra.mxu0 %vm532_vm0, %v6974_v7  ;;  %5438 = vmatmul.msk.f32.gmra.mxu1 %vm532_vm0, %v6974_v7 }
 0x181   : >> { %5442 = vmatmul.msk.f32.gmra.mxu2 %vm532_vm0, %v6974_v7  ;;  %5446 = vmatmul.msk.f32.gmra.mxu3 %vm532_vm0, %v6974_v7 }
 0x183   : >> { %5435 = vmatmul.msk.f32.gmra.mxu0 %vm532_vm0, %v6985_v1  ;;  %5439 = vmatmul.msk.f32.gmra.mxu1 %vm532_vm0, %v6985_v1 }
 0x189   : >> { %5443 = vmatmul.msk.f32.gmra.mxu2 %vm532_vm0, %v6985_v1  ;;  %5447 = vmatmul.msk.f32.gmra.mxu3 %vm532_vm0, %v6985_v1 }
 0x18b   : >> { %5436 = vmatmul.msk.f32.gmra.mxu0 %vm532_vm0, %v7000_v4  ;;  %5440 = vmatmul.msk.f32.gmra.mxu1 %vm532_vm0, %v7000_v4 }
 0x191   : >> { %5444 = vmatmul.msk.f32.gmra.mxu2 %vm532_vm0, %v7000_v4  ;;  %5448 = vmatmul.msk.f32.gmra.mxu3 %vm532_vm0, %v7000_v4 }
 0x1cf   : >> { %v869_v52 = vpop.f32.mrf.mxu0  ;;  %v898_v50 = vpop.f32.mrf.mxu1 }
 0x1d0   : >> { %v870_v58 = vadd.f32 %v869_v52, %v7072_v38  ;;  %v899_v6 = vadd.f32 %v898_v50, %v7072_v38 }
 0x1d2   : >> { %v1084_v49 = vmax.f32 %v870_v58, 0.0  ;;  %v1085_v45 = vmax.f32 %v899_v6, 0.0  ;;  %v7113_v58 = vld [vmem:[%s6826_s29 + $0x50] sm:$0xff] }
 0x1d7   : >> { %v872_v54 = vpop.f32.mrf.mxu0  ;;  %v901_v9 = vpop.f32.mrf.mxu1 }
 0x1d8   : >> { %v873_v36 = vadd.f32 %v872_v54, %v7070_v53  ;;  %v902_v62 = vadd.f32 %v901_v9, %v7070_v53 }
 0x1da   : >> { %v1092_v61 = vmax.f32 %v873_v36, 0.0  ;;  %v1093_v63 = vmax.f32 %v902_v62, 0.0  ;;  %v7098_v62 = vld [vmem:[%s6826_s29 + $0x48] sm:$0xff] }
 0x1db   : >> { %v927_v7 = vpop.f32.mrf.mxu2  ;;  %v956_v3 = vpop.f32.mrf.mxu3 }
 0x1df   : >> { %v875_v44 = vpop.f32.mrf.mxu0  ;;  %v904_v1 = vpop.f32.mrf.mxu1 }
 0x1e0   : >> { %v876_v48 = vadd.f32 %v875_v44, %v7064_v35  ;;  %v905_v4 = vadd.f32 %v904_v1, %v7064_v35 }
 0x1e2   : >> { %v1100_v43 = vmax.f32 %v876_v48, 0.0  ;;  %v1101_v0 = vmax.f32 %v905_v4, 0.0  ;;  %v957_v48 = vadd.f32 %v956_v3, %v7072_v38 }
 0x1e3   : >> { %v930_v42 = vpop.f32.mrf.mxu2  ;;  %v959_v8 = vpop.f32.mrf.mxu3 }
 0x1e4   : >> { %v931_v9 = vadd.f32 %v930_v42, %v7070_v53  ;;  %v960_v44 = vadd.f32 %v959_v8, %v7070_v53  ;;  %v1087_v3 = vmax.f32 %v957_v48, 0.0 }
 0x1e7   : >> { %v878_v46 = vpop.f32.mrf.mxu0  ;;  %v907_v37 = vpop.f32.mrf.mxu1 }
 0x1e8   : >> { %v879_v51 = vadd.f32 %v878_v46, %v7062_v41  ;;  %v908_v60 = vadd.f32 %v907_v37, %v7062_v41  ;;  %v928_v37 = vadd.f32 %v927_v7, %v7072_v38 }
 0x1ea   : >> { %v1108_v34 = vmax.f32 %v879_v51, 0.0  ;;  %v1109_v55 = vmax.f32 %v908_v60, 0.0  ;;  %v1086_v7 = vmax.f32 %v928_v37, 0.0 }
 0x1eb   : >> { %v933_v57 = vpop.f32.mrf.mxu2  ;;  %v962_v5 = vpop.f32.mrf.mxu3 }
 0x1ec   : >> { %1171 = vmatpush.msra.mxu0 %v1108_v34  ;;  %1200 = vmatpush.msra.mxu1 %v1109_v55  ;;  %v934_v2 = vadd.f32 %v933_v57, %v7064_v35  ;;  %v963_v52 = vadd.f32 %v962_v5, %v7064_v35  ;;  %v1094_v34 = vmax.f32 %v931_v9, 0.0  ;;  %v1095_v55 = vmax.f32 %v960_v44, 0.0 }
 0x1ee   : >> { %1172 = vmatpush.msra.mxu0 %v1100_v43  ;;  %1201 = vmatpush.msra.mxu1 %v1101_v0  ;;  %v1102_v4 = vmax.f32 %v934_v2, 0.0  ;;  %v1103_v51 = vmax.f32 %v963_v52, 0.0 }
 0x1f0   : >> { %v7078_v56 = vpop.f32.mrf.mxu0  ;;  %v7080_v40 = vpop.f32.mrf.mxu1  ;;  %1173 = vmatpush.msra.mxu0 %v1092_v61  ;;  %1202 = vmatpush.msra.mxu1 %v1093_v63  ;;  %v7124_v63 = vld [vmem:[%s6826_s29 + $0x58] sm:$0xff] }
 0x1f2   : >> { %1174 = vmatpush.msra.mxu0 %v1084_v49  ;;  %1203 = vmatpush.msra.mxu1 %v1085_v45 }
 0x1f3   : >> { %v936_v47 = vpop.f32.mrf.mxu2  ;;  %v965_v59 = vpop.f32.mrf.mxu3  ;;  %5457 = vmatmul.msk.f32.vlgmr.msra.gmra.mxu0 %vm532_vm0, %v7083_v39  ;;  %5461 = vmatmul.msk.f32.vlgmr.msra.gmra.mxu1 %vm532_vm0, %v7083_v39 }
 0x1f4   : >> { %v937_v50 = vadd.f32 %v936_v47, %v7062_v41  ;;  %v966_v54 = vadd.f32 %v965_v59, %v7062_v41 }
 0x1f6   : >> { %v1110_v1 = vmax.f32 %v937_v50, 0.0  ;;  %v1111_v46 = vmax.f32 %v966_v54, 0.0 }
 0x1f8   : >> { %v988_v60 = vpop.f32.mrf.mxu0  ;;  %v1017_v36 = vpop.f32.mrf.mxu1  ;;  %1229 = vmatpush.msra.mxu2 %v1110_v1  ;;  %1258 = vmatpush.msra.mxu3 %v1111_v46  ;;  %v986_v1 = vadd.f32 %v7078_v56, %v7072_v38  ;;  %v1015_v46 = vadd.f32 %v7080_v40, %v7072_v38 }
 0x1f9   : >> { %v989_v2 = vadd.f32 %v988_v60, %v7070_v53  ;;  %v1018_v52 = vadd.f32 %v1017_v36, %v7070_v53 }
 0x1fa   : >> { %1230 = vmatpush.msra.mxu2 %v1102_v4  ;;  %1259 = vmatpush.msra.mxu3 %v1103_v51  ;;  %v1088_v60 = vmax.f32 %v986_v1, 0.0  ;;  %v1089_v36 = vmax.f32 %v1015_v46, 0.0 }
 0x1fb   : >> { %5458 = vmatmul.msk.f32.gmra.mxu0 %vm532_vm0, %v7098_v62  ;;  %5462 = vmatmul.msk.f32.gmra.mxu1 %vm532_vm0, %v7098_v62  ;;  %v1096_v4 = vmax.f32 %v989_v2, 0.0  ;;  %v1097_v51 = vmax.f32 %v1018_v52, 0.0  ;;  %v7190_v2 = vpop.permute.xlu1 %1144 }
 0x1fc   : >> { %v7104_v42 = vpop.f32.mrf.mxu2  ;;  %v7106_v8 = vpop.f32.mrf.mxu3  ;;  %1231 = vmatpush.msra.mxu2 %v1094_v34  ;;  %1260 = vmatpush.msra.mxu3 %v1095_v55 }
 0x1fe   : >> { %1232 = vmatpush.msra.mxu2 %v1086_v7  ;;  %1261 = vmatpush.msra.mxu3 %v1087_v3 }
 0x1ff   : >> { %5465 = vmatmul.msk.f32.vlgmr.msra.gmra.mxu2 %vm532_vm0, %v7083_v39  ;;  %5469 = vmatmul.msk.f32.vlgmr.msra.gmra.mxu3 %vm532_vm0, %v7083_v39 }
 0x200   : >> { %v991_v57 = vpop.f32.mrf.mxu0  ;;  %v1020_v5 = vpop.f32.mrf.mxu1 }
 0x201   : >> { %v992_v49 = vadd.f32 %v991_v57, %v7064_v35  ;;  %v1021_v45 = vadd.f32 %v1020_v5, %v7064_v35 }
 0x203   : >> { %5459 = vmatmul.msk.f32.gmra.mxu0 %vm532_vm0, %v7113_v58  ;;  %5463 = vmatmul.msk.f32.gmra.mxu1 %vm532_vm0, %v7113_v58  ;;  %v1104_v37 = vmax.f32 %v992_v49, 0.0  ;;  %v1105_v48 = vmax.f32 %v1021_v45, 0.0  ;;  %v1044_v49 = vadd.f32 %v7104_v42, %v7072_v38 }
 0x204   : >> { %v1046_v6 = vpop.f32.mrf.mxu2  ;;  %v1075_v43 = vpop.f32.mrf.mxu3 }
 0x205   : >> { %v1047_v57 = vadd.f32 %v1046_v6, %v7070_v53  ;;  %v1076_v5 = vadd.f32 %v1075_v43, %v7070_v53  ;;  %v1090_v43 = vmax.f32 %v1044_v49, 0.0 }
 0x207   : >> { %5466 = vmatmul.msk.f32.gmra.mxu2 %vm532_vm0, %v7098_v62  ;;  %5470 = vmatmul.msk.f32.gmra.mxu3 %vm532_vm0, %v7098_v62  ;;  %v1098_v6 = vmax.f32 %v1047_v57, 0.0  ;;  %v1099_v53 = vmax.f32 %v1076_v5, 0.0 }
 0x208   : >> { %v994_v0 = vpop.f32.mrf.mxu0  ;;  %v1023_v61 = vpop.f32.mrf.mxu1 }
 0x209   : >> { %v995_v47 = vadd.f32 %v994_v0, %v7062_v41  ;;  %v1024_v59 = vadd.f32 %v1023_v61, %v7062_v41 }
 0x20b   : >> { %v1112_v50 = vmax.f32 %v995_v47, 0.0  ;;  %v1113_v54 = vmax.f32 %v1024_v59, 0.0  ;;  %5460 = vmatmul.msk.f32.gmra.mxu0 %vm532_vm0, %v7124_v63  ;;  %5464 = vmatmul.msk.f32.gmra.mxu1 %vm532_vm0, %v7124_v63 }
 0x20c   : >> { %v1049_v9 = vpop.f32.mrf.mxu2  ;;  %v1078_v44 = vpop.f32.mrf.mxu3 }
 0x20d   : >> { %1287 = vmatpush.msrb.mxu0 %v1112_v50  ;;  %1316 = vmatpush.msrb.mxu1 %v1113_v54  ;;  %v1050_v34 = vadd.f32 %v1049_v9, %v7064_v35  ;;  %v1079_v55 = vadd.f32 %v1078_v44, %v7064_v35  ;;  %v1073_v35 = vadd.f32 %v7106_v8, %v7072_v38  ;;  %v7192_v54 = vpop.permute.xlu2 %1139  ;;  %v7194_v44 = vpop.permute.xlu0 %1134 }
 0x20f   : >> { %1288 = vmatpush.msrb.mxu0 %v1104_v37  ;;  %1317 = vmatpush.msrb.mxu1 %v1105_v48  ;;  %v1106_v45 = vmax.f32 %v1050_v34, 0.0  ;;  %v1091_v47 = vmax.f32 %v1073_v35, 0.0 }
 0x210   : >> { %5467 = vmatmul.msk.f32.gmra.mxu2 %vm532_vm0, %v7113_v58  ;;  %5471 = vmatmul.msk.f32.gmra.mxu3 %vm532_vm0, %v7113_v58 }
 0x211   : >> { %1289 = vmatpush.msrb.mxu0 %v1096_v4  ;;  %1318 = vmatpush.msrb.mxu1 %v1097_v51 }
 0x213   : >> { %1290 = vmatpush.msrb.mxu0 %v1088_v60  ;;  %1319 = vmatpush.msrb.mxu1 %v1089_v36 }
 0x214   : >> { %v1052_v56 = vpop.f32.mrf.mxu2  ;;  %v1081_v40 = vpop.f32.mrf.mxu3  ;;  %5473 = vmatmul.msk.f32.vlgmr.msrb.gmra.mxu0 %vm532_vm0, %v7083_v39  ;;  %5477 = vmatmul.msk.f32.vlgmr.msrb.gmra.mxu1 %vm532_vm0, %v7083_v39 }
 0x215   : >> { %v1053_v7 = vadd.f32 %v1052_v56, %v7062_v41  ;;  %v1082_v3 = vadd.f32 %v1081_v40, %v7062_v41  ;;  %v1107_v41 = vmax.f32 %v1079_v55, 0.0  ;;  %v7202_v40 = vpop.permute.xlu1 %1129 }
 0x217   : >> { %v1114_v0 = vmax.f32 %v1053_v7, 0.0  ;;  %v1115_v61 = vmax.f32 %v1082_v3, 0.0 }
 0x218   : >> { %5468 = vmatmul.msk.f32.gmra.mxu2 %vm532_vm0, %v7124_v63  ;;  %5472 = vmatmul.msk.f32.gmra.mxu3 %vm532_vm0, %v7124_v63 }
 0x219   : >> { %1345 = vmatpush.msrb.mxu2 %v1114_v0  ;;  %1374 = vmatpush.msrb.mxu3 %v1115_v61 }
 0x21b   : >> { %1346 = vmatpush.msrb.mxu2 %v1106_v45  ;;  %1375 = vmatpush.msrb.mxu3 %v1107_v41  ;;  %v7211_v45 = vld [vmem:[%s6826_s29 + $0x60] sm:$0xff] }
 0x21c   : >> { %5474 = vmatmul.msk.f32.gmra.mxu0 %vm532_vm0, %v7098_v62  ;;  %5478 = vmatmul.msk.f32.gmra.mxu1 %vm532_vm0, %v7098_v62 }
 0x21d   : >> { %1347 = vmatpush.msrb.mxu2 %v1098_v6  ;;  %1376 = vmatpush.msrb.mxu3 %v1099_v53 }
 0x21f   : >> { %1348 = vmatpush.msrb.mxu2 %v1090_v43  ;;  %1377 = vmatpush.msrb.mxu3 %v1091_v47  ;;  %v7218_v47 = vld [vmem:[%s6826_s29 + $0x68] sm:$0xff] }
 0x220   : >> { %5481 = vmatmul.msk.f32.vlgmr.msrb.gmra.mxu2 %vm532_vm0, %v7083_v39  ;;  %5485 = vmatmul.msk.f32.vlgmr.msrb.gmra.mxu3 %vm532_vm0, %v7083_v39 }
 0x224   : >> { %5475 = vmatmul.msk.f32.gmra.mxu0 %vm532_vm0, %v7113_v58  ;;  %5479 = vmatmul.msk.f32.gmra.mxu1 %vm532_vm0, %v7113_v58 }
 0x228   : >> { %5482 = vmatmul.msk.f32.gmra.mxu2 %vm532_vm0, %v7098_v62  ;;  %5486 = vmatmul.msk.f32.gmra.mxu3 %vm532_vm0, %v7098_v62 }
 0x22c   : >> { %5476 = vmatmul.msk.f32.gmra.mxu0 %vm532_vm0, %v7124_v63  ;;  %5480 = vmatmul.msk.f32.gmra.mxu1 %vm532_vm0, %v7124_v63 }
 0x230   : >> { %5483 = vmatmul.msk.f32.gmra.mxu2 %vm532_vm0, %v7113_v58  ;;  %5487 = vmatmul.msk.f32.gmra.mxu3 %vm532_vm0, %v7113_v58 }
 0x238   : >> { %5484 = vmatmul.msk.f32.gmra.mxu2 %vm532_vm0, %v7124_v63  ;;  %5488 = vmatmul.msk.f32.gmra.mxu3 %vm532_vm0, %v7124_v63 }
 0x270   : >> { %v1176_v38 = vpop.f32.mrf.mxu0  ;;  %v1205_v39 = vpop.f32.mrf.mxu1 }
 0x271   : >> { %v1177_v34 = vadd.f32 %v1176_v38, %v7202_v40  ;;  %v1206_v55 = vadd.f32 %v1205_v39, %v7202_v40 }
 0x273   : >> { %v1391_v0 = vmax.f32 %v1177_v34, 0.0  ;;  %v1392_v61 = vmax.f32 %v1206_v55, 0.0 }
 0x278   : >> { %v1179_v62 = vpop.f32.mrf.mxu0  ;;  %v1208_v42 = vpop.f32.mrf.mxu1 }
 0x279   : >> { %v1180_v51 = vadd.f32 %v1179_v62, %v7194_v44  ;;  %v1209_v60 = vadd.f32 %v1208_v42, %v7194_v44 }
 0x27b   : >> { %v1399_v57 = vmax.f32 %v1180_v51, 0.0  ;;  %v1400_v5 = vmax.f32 %v1209_v60, 0.0 }
 0x280   : >> { %v1182_v8 = vpop.f32.mrf.mxu0  ;;  %v1211_v59 = vpop.f32.mrf.mxu1 }
 0x281   : >> { %v1183_v1 = vadd.f32 %v1182_v8, %v7192_v54  ;;  %v1212_v63 = vadd.f32 %v1211_v59, %v7192_v54 }
 0x282   : >> { %v1234_v52 = vpop.f32.mrf.mxu2  ;;  %v1263_v50 = vpop.f32.mrf.mxu3 }
 0x283   : >> { %v1407_v7 = vmax.f32 %v1183_v1, 0.0  ;;  %v1408_v3 = vmax.f32 %v1212_v63, 0.0 }
 0x288   : >> { %v1185_v9 = vpop.f32.mrf.mxu0  ;;  %v1214_v58 = vpop.f32.mrf.mxu1 }
 0x289   : >> { %v1186_v46 = vadd.f32 %v1185_v9, %v7190_v2  ;;  %v1215_v37 = vadd.f32 %v1214_v58, %v7190_v2 }
 0x28a   : >> { %v1237_v48 = vpop.f32.mrf.mxu2  ;;  %v1266_v4 = vpop.f32.mrf.mxu3 }
 0x28b   : >> { %v1415_v36 = vmax.f32 %v1186_v46, 0.0  ;;  %v1416_v56 = vmax.f32 %v1215_v37, 0.0  ;;  %v1238_v9 = vadd.f32 %v1237_v48, %v7194_v44  ;;  %v1267_v58 = vadd.f32 %v1266_v4, %v7194_v44  ;;  %v7233_v48 = vld [vmem:[%s6826_s29 + $0x70] sm:$0xff] }
 0x28c   : >> { %v1235_v46 = vadd.f32 %v1234_v52, %v7202_v40  ;;  %v1264_v37 = vadd.f32 %v1263_v50, %v7202_v40 }
 0x28d   : >> { %1478 = vmatpush.msra.mxu0 %v1415_v36  ;;  %1507 = vmatpush.msra.mxu1 %v1416_v56  ;;  %v1401_v34 = vmax.f32 %v1238_v9, 0.0  ;;  %v1402_v55 = vmax.f32 %v1267_v58, 0.0 }
 0x28e   : >> { %v1394_v52 = vmax.f32 %v1264_v37, 0.0 }
 0x28f   : >> { %1479 = vmatpush.msra.mxu0 %v1407_v7  ;;  %1508 = vmatpush.msra.mxu1 %v1408_v3  ;;  %v1393_v3 = vmax.f32 %v1235_v46, 0.0 }
 0x291   : >> { %v7206_v49 = vpop.f32.mrf.mxu0  ;;  %v7208_v35 = vpop.f32.mrf.mxu1  ;;  %1480 = vmatpush.msra.mxu0 %v1399_v57  ;;  %1509 = vmatpush.msra.mxu1 %v1400_v5 }
 0x292   : >> { %v1293_v9 = vadd.f32 %v7206_v49, %v7202_v40  ;;  %v1322_v58 = vadd.f32 %v7208_v35, %v7202_v40 }
 0x293   : >> { %v1240_v41 = vpop.f32.mrf.mxu2  ;;  %v1269_v6 = vpop.f32.mrf.mxu3  ;;  %1481 = vmatpush.msra.mxu0 %v1391_v0  ;;  %1510 = vmatpush.msra.mxu1 %v1392_v61 }
 0x294   : >> { %5497 = vmatmul.msk.f32.vlgmr.msra.gmra.mxu0 %vm532_vm0, %v7211_v45  ;;  %5501 = vmatmul.msk.f32.vlgmr.msra.gmra.mxu1 %vm532_vm0, %v7211_v45  ;;  %v1241_v38 = vadd.f32 %v1240_v41, %v7192_v54  ;;  %v1270_v42 = vadd.f32 %v1269_v6, %v7192_v54  ;;  %v7252_v6 = vld [vmem:[%s6826_s29 + $0x78] sm:$0xff]  ;;  %v1395_v46 = vmax.f32 %v1293_v9, 0.0  ;;  %v1396_v37 = vmax.f32 %v1322_v58, 0.0 }
 0x296   : >> { %v1409_v51 = vmax.f32 %v1241_v38, 0.0  ;;  %v1410_v60 = vmax.f32 %v1270_v42, 0.0 }
 0x299   : >> { %v1295_v53 = vpop.f32.mrf.mxu0  ;;  %v1324_v43 = vpop.f32.mrf.mxu1 }
 0x29a   : >> { %v1325_v42 = vadd.f32 %v1324_v43, %v7194_v44 }
 0x29b   : >> { %v1243_v39 = vpop.f32.mrf.mxu2  ;;  %v1272_v62 = vpop.f32.mrf.mxu3 }
 0x29c   : >> { %v1244_v8 = vadd.f32 %v1243_v39, %v7190_v2  ;;  %v1273_v59 = vadd.f32 %v1272_v62, %v7190_v2  ;;  %5498 = vmatmul.msk.f32.gmra.mxu0 %vm532_vm0, %v7218_v47  ;;  %5502 = vmatmul.msk.f32.gmra.mxu1 %vm532_vm0, %v7218_v47  ;;  %v1296_v62 = vadd.f32 %v1295_v53, %v7194_v44  ;;  %v1404_v43 = vmax.f32 %v1325_v42, 0.0  ;;  %v7318_v42 = vpop.permute.xlu2 %1451 }
 0x29e   : >> { %v1417_v1 = vmax.f32 %v1244_v8, 0.0  ;;  %v1418_v63 = vmax.f32 %v1273_v59, 0.0  ;;  %v1403_v53 = vmax.f32 %v1296_v62, 0.0 }
 0x2a0   : >> { %1536 = vmatpush.msra.mxu2 %v1417_v1  ;;  %1565 = vmatpush.msra.mxu3 %v1418_v63 }
 0x2a1   : >> { %v1298_v36 = vpop.f32.mrf.mxu0  ;;  %v1327_v56 = vpop.f32.mrf.mxu1 }
 0x2a2   : >> { %1537 = vmatpush.msra.mxu2 %v1409_v51  ;;  %1566 = vmatpush.msra.mxu3 %v1410_v60  ;;  %v1299_v5 = vadd.f32 %v1298_v36, %v7192_v54  ;;  %v1328_v0 = vadd.f32 %v1327_v56, %v7192_v54 }
 0x2a3   : >> { %v7235_v7 = vpop.f32.mrf.mxu2  ;;  %v7237_v4 = vpop.f32.mrf.mxu3 }
 0x2a4   : >> { %1538 = vmatpush.msra.mxu2 %v1401_v34  ;;  %1567 = vmatpush.msra.mxu3 %v1402_v55  ;;  %v1411_v1 = vmax.f32 %v1299_v5, 0.0  ;;  %v1412_v63 = vmax.f32 %v1328_v0, 0.0 }
 0x2a5   : >> { %5499 = vmatmul.msk.f32.gmra.mxu0 %vm532_vm0, %v7233_v48  ;;  %5503 = vmatmul.msk.f32.gmra.mxu1 %vm532_vm0, %v7233_v48 }
 0x2a6   : >> { %1539 = vmatpush.msra.mxu2 %v1393_v3  ;;  %1568 = vmatpush.msra.mxu3 %v1394_v52 }
 0x2a7   : >> { %5505 = vmatmul.msk.f32.vlgmr.msra.gmra.mxu2 %vm532_vm0, %v7211_v45  ;;  %5509 = vmatmul.msk.f32.vlgmr.msra.gmra.mxu3 %vm532_vm0, %v7211_v45 }
 0x2a9   : >> { %v1301_v50 = vpop.f32.mrf.mxu0  ;;  %v1330_v57 = vpop.f32.mrf.mxu1 }
 0x2aa   : >> { %v1302_v61 = vadd.f32 %v1301_v50, %v7190_v2  ;;  %v1331_v41 = vadd.f32 %v1330_v57, %v7190_v2 }
 0x2ab   : >> { %v1353_v38 = vpop.f32.mrf.mxu2  ;;  %v1382_v39 = vpop.f32.mrf.mxu3 }
 0x2ac   : >> { %v1419_v8 = vmax.f32 %v1302_v61, 0.0  ;;  %v1420_v59 = vmax.f32 %v1331_v41, 0.0  ;;  %v1354_v3 = vadd.f32 %v1353_v38, %v7194_v44  ;;  %v1383_v52 = vadd.f32 %v1382_v39, %v7194_v44 }
 0x2ad   : >> { %5500 = vmatmul.msk.f32.gmra.mxu0 %vm532_vm0, %v7252_v6  ;;  %5504 = vmatmul.msk.f32.gmra.mxu1 %vm532_vm0, %v7252_v6 }
 0x2ae   : >> { %1594 = vmatpush.msrb.mxu0 %v1419_v8  ;;  %1623 = vmatpush.msrb.mxu1 %v1420_v59  ;;  %v1405_v61 = vmax.f32 %v1354_v3, 0.0  ;;  %v1406_v44 = vmax.f32 %v1383_v52, 0.0 }
 0x2af   : >> { %5506 = vmatmul.msk.f32.gmra.mxu2 %vm532_vm0, %v7218_v47  ;;  %5510 = vmatmul.msk.f32.gmra.mxu3 %vm532_vm0, %v7218_v47 }
 0x2b0   : >> { %1595 = vmatpush.msrb.mxu0 %v1411_v1  ;;  %1624 = vmatpush.msrb.mxu1 %v1412_v63 }
 0x2b2   : >> { %1596 = vmatpush.msrb.mxu0 %v1403_v53  ;;  %1625 = vmatpush.msrb.mxu1 %v1404_v43  ;;  %v7326_v53 = vpop.permute.xlu1 %1441 }
 0x2b3   : >> { %v1356_v49 = vpop.f32.mrf.mxu2  ;;  %v1385_v35 = vpop.f32.mrf.mxu3 }
 0x2b4   : >> { %1597 = vmatpush.msrb.mxu0 %v1395_v46  ;;  %1626 = vmatpush.msrb.mxu1 %v1396_v37  ;;  %v1357_v36 = vadd.f32 %v1356_v49, %v7192_v54  ;;  %v1386_v56 = vadd.f32 %v1385_v35, %v7192_v54  ;;  %v1380_v54 = vadd.f32 %v7237_v4, %v7202_v40  ;;  %v7330_v35 = vpop.permute.xlu2 %1436 }
 0x2b5   : >> { %5513 = vmatmul.msk.f32.vlgmr.msrb.gmra.mxu0 %vm532_vm0, %v7211_v45  ;;  %5517 = vmatmul.msk.f32.vlgmr.msrb.gmra.mxu1 %vm532_vm0, %v7211_v45 }
 0x2b6   : >> { %v1413_v5 = vmax.f32 %v1357_v36, 0.0  ;;  %v1414_v0 = vmax.f32 %v1386_v56, 0.0  ;;  %v1398_v38 = vmax.f32 %v1380_v54, 0.0 }
 0x2b7   : >> { %5507 = vmatmul.msk.f32.gmra.mxu2 %vm532_vm0, %v7233_v48  ;;  %5511 = vmatmul.msk.f32.gmra.mxu3 %vm532_vm0, %v7233_v48 }
 0x2bb   : >> { %v1359_v51 = vpop.f32.mrf.mxu2  ;;  %v1388_v60 = vpop.f32.mrf.mxu3 }
 0x2bc   : >> { %v1360_v34 = vadd.f32 %v1359_v51, %v7190_v2  ;;  %v1389_v55 = vadd.f32 %v1388_v60, %v7190_v2  ;;  %v1351_v2 = vadd.f32 %v7235_v7, %v7202_v40 }
 0x2bd   : >> { %5514 = vmatmul.msk.f32.gmra.mxu0 %vm532_vm0, %v7218_v47  ;;  %5518 = vmatmul.msk.f32.gmra.mxu1 %vm532_vm0, %v7218_v47 }
 0x2be   : >> { %v1421_v50 = vmax.f32 %v1360_v34, 0.0  ;;  %v1422_v57 = vmax.f32 %v1389_v55, 0.0  ;;  %v1397_v41 = vmax.f32 %v1351_v2, 0.0 }
 0x2bf   : >> { %5508 = vmatmul.msk.f32.gmra.mxu2 %vm532_vm0, %v7252_v6  ;;  %5512 = vmatmul.msk.f32.gmra.mxu3 %vm532_vm0, %v7252_v6 }
 0x2c0   : >> { %1652 = vmatpush.msrb.mxu2 %v1421_v50  ;;  %1681 = vmatpush.msrb.mxu3 %v1422_v57 }
 0x2c2   : >> { %1653 = vmatpush.msrb.mxu2 %v1413_v5  ;;  %1682 = vmatpush.msrb.mxu3 %v1414_v0  ;;  %v7339_v5 = vld [vmem:[%s6826_s29 + $0x80] sm:$0xff] }
 0x2c4   : >> { %1654 = vmatpush.msrb.mxu2 %v1405_v61  ;;  %1683 = vmatpush.msrb.mxu3 %v1406_v44 }
 0x2c5   : >> { %5515 = vmatmul.msk.f32.gmra.mxu0 %vm532_vm0, %v7233_v48  ;;  %5519 = vmatmul.msk.f32.gmra.mxu1 %vm532_vm0, %v7233_v48 }
 0x2c6   : >> { %1655 = vmatpush.msrb.mxu2 %v1397_v41  ;;  %1684 = vmatpush.msrb.mxu3 %v1398_v38  ;;  %v7346_v38 = vld [vmem:[%s6826_s29 + $0x88] sm:$0xff] }
 0x2c7   : >> { %5521 = vmatmul.msk.f32.vlgmr.msrb.gmra.mxu2 %vm532_vm0, %v7211_v45  ;;  %5525 = vmatmul.msk.f32.vlgmr.msrb.gmra.mxu3 %vm532_vm0, %v7211_v45 }
 0x2cd   : >> { %5516 = vmatmul.msk.f32.gmra.mxu0 %vm532_vm0, %v7252_v6  ;;  %5520 = vmatmul.msk.f32.gmra.mxu1 %vm532_vm0, %v7252_v6 }
 0x2cf   : >> { %5522 = vmatmul.msk.f32.gmra.mxu2 %vm532_vm0, %v7218_v47  ;;  %5526 = vmatmul.msk.f32.gmra.mxu3 %vm532_vm0, %v7218_v47  ;;  %v7320_v47 = vpop.permute.xlu0 %1446 }
 0x2d7   : >> { %5523 = vmatmul.msk.f32.gmra.mxu2 %vm532_vm0, %v7233_v48  ;;  %5527 = vmatmul.msk.f32.gmra.mxu3 %vm532_vm0, %v7233_v48 }
 0x2df   : >> { %5524 = vmatmul.msk.f32.gmra.mxu2 %vm532_vm0, %v7252_v6  ;;  %5528 = vmatmul.msk.f32.gmra.mxu3 %vm532_vm0, %v7252_v6 }
 0x311   : >> { %v1483_v40 = vpop.f32.mrf.mxu0  ;;  %v1512_v45 = vpop.f32.mrf.mxu1 }
 0x312   : >> { %v1484_v51 = vadd.f32 %v1483_v40, %v7330_v35  ;;  %v1513_v60 = vadd.f32 %v1512_v45, %v7330_v35 }
 0x314   : >> { %v1698_v50 = vmax.f32 %v1484_v51, 0.0  ;;  %v1699_v57 = vmax.f32 %v1513_v60, 0.0 }
 0x319   : >> { %v1486_v7 = vpop.f32.mrf.mxu0  ;;  %v1515_v4 = vpop.f32.mrf.mxu1 }
 0x31a   : >> { %v1487_v43 = vadd.f32 %v1486_v7, %v7326_v53  ;;  %v1516_v46 = vadd.f32 %v1515_v4, %v7326_v53 }
 0x31c   : >> { %v1706_v34 = vmax.f32 %v1487_v43, 0.0  ;;  %v1707_v55 = vmax.f32 %v1516_v46, 0.0 }
 0x322   : >> { %v1489_v39 = vpop.f32.mrf.mxu0  ;;  %v1518_v62 = vpop.f32.mrf.mxu1 }
 0x323   : >> { %v1490_v48 = vadd.f32 %v1489_v39, %v7320_v47  ;;  %v1519_v9 = vadd.f32 %v1518_v62, %v7320_v47  ;;  %v7353_v39 = vld [vmem:[%s6826_s29 + $0x90] sm:$0xff] }
 0x325   : >> { %v1714_v36 = vmax.f32 %v1490_v48, 0.0  ;;  %v1715_v56 = vmax.f32 %v1519_v9, 0.0 }
 0x32a   : >> { %v1492_v8 = vpop.f32.mrf.mxu0  ;;  %v1521_v59 = vpop.f32.mrf.mxu1 }
 0x32b   : >> { %v1493_v58 = vadd.f32 %v1492_v8, %v7318_v42  ;;  %v1522_v6 = vadd.f32 %v1521_v59, %v7318_v42  ;;  %v1541_v1 = vpop.f32.mrf.mxu2  ;;  %v1570_v63 = vpop.f32.mrf.mxu3 }
 0x32c   : >> { %v1542_v46 = vadd.f32 %v1541_v1, %v7330_v35 }
 0x32d   : >> { %v1722_v37 = vmax.f32 %v1493_v58, 0.0  ;;  %v1723_v49 = vmax.f32 %v1522_v6, 0.0 }
 0x32e   : >> { %v1700_v1 = vmax.f32 %v1542_v46, 0.0 }
 0x32f   : >> { %1785 = vmatpush.msra.mxu0 %v1722_v37  ;;  %1814 = vmatpush.msra.mxu1 %v1723_v49  ;;  %v1571_v37 = vadd.f32 %v1570_v63, %v7330_v35  ;;  %v7370_v63 = vld [vmem:[%s6826_s29 + $0x98] sm:$0xff] }
 0x331   : >> { %1786 = vmatpush.msra.mxu0 %v1714_v36  ;;  %1815 = vmatpush.msra.mxu1 %v1715_v56 }
 0x332   : >> { %v7334_v3 = vpop.f32.mrf.mxu0  ;;  %v7336_v52 = vpop.f32.mrf.mxu1 }
 0x333   : >> { %v1544_v2 = vpop.f32.mrf.mxu2  ;;  %v1573_v54 = vpop.f32.mrf.mxu3  ;;  %1787 = vmatpush.msra.mxu0 %v1706_v34  ;;  %1816 = vmatpush.msra.mxu1 %v1707_v55 }
 0x334   : >> { %v1545_v9 = vadd.f32 %v1544_v2, %v7326_v53  ;;  %v1574_v58 = vadd.f32 %v1573_v54, %v7326_v53  ;;  %v1701_v54 = vmax.f32 %v1571_v37, 0.0 }
 0x335   : >> { %1788 = vmatpush.msra.mxu0 %v1698_v50  ;;  %1817 = vmatpush.msra.mxu1 %v1699_v57 }
 0x336   : >> { %5537 = vmatmul.msk.f32.vlgmr.msra.gmra.mxu0 %vm532_vm0, %v7339_v5  ;;  %5541 = vmatmul.msk.f32.vlgmr.msra.gmra.mxu1 %vm532_vm0, %v7339_v5  ;;  %v1708_v60 = vmax.f32 %v1545_v9, 0.0  ;;  %v1709_v36 = vmax.f32 %v1574_v58, 0.0 }
 0x33a   : >> { %v1602_v0 = vpop.f32.mrf.mxu0  ;;  %v1631_v61 = vpop.f32.mrf.mxu1 }
 0x33b   : >> { %v1547_v44 = vpop.f32.mrf.mxu2  ;;  %v1576_v41 = vpop.f32.mrf.mxu3 }
 0x33c   : >> { %v1548_v62 = vadd.f32 %v1547_v44, %v7320_v47  ;;  %v1577_v8 = vadd.f32 %v1576_v41, %v7320_v47 }
 0x33e   : >> { %5538 = vmatmul.msk.f32.gmra.mxu0 %vm532_vm0, %v7346_v38  ;;  %5542 = vmatmul.msk.f32.gmra.mxu1 %vm532_vm0, %v7346_v38  ;;  %v1716_v49 = vmax.f32 %v1548_v62, 0.0  ;;  %v1717_v51 = vmax.f32 %v1577_v8, 0.0  ;;  %v1603_v62 = vadd.f32 %v1602_v0, %v7326_v53  ;;  %v1632_v8 = vadd.f32 %v1631_v61, %v7326_v53 }
 0x33f   : >> { %v1629_v0 = vadd.f32 %v7336_v52, %v7330_v35 }
 0x342   : >> { %v1605_v40 = vpop.f32.mrf.mxu0  ;;  %v1634_v45 = vpop.f32.mrf.mxu1 }
 0x343   : >> { %v1550_v7 = vpop.f32.mrf.mxu2  ;;  %v1579_v4 = vpop.f32.mrf.mxu3  ;;  %v1606_v44 = vadd.f32 %v1605_v40, %v7320_v47  ;;  %v1635_v41 = vadd.f32 %v1634_v45, %v7320_v47  ;;  %v1600_v40 = vadd.f32 %v7334_v3, %v7330_v35 }
 0x344   : >> { %v1551_v59 = vadd.f32 %v1550_v7, %v7318_v42  ;;  %v1580_v48 = vadd.f32 %v1579_v4, %v7318_v42 }
 0x345   : >> { %v1718_v45 = vmax.f32 %v1606_v44, 0.0  ;;  %v1719_v61 = vmax.f32 %v1635_v41, 0.0 }
 0x346   : >> { %v1724_v6 = vmax.f32 %v1551_v59, 0.0  ;;  %v1725_v43 = vmax.f32 %v1580_v48, 0.0  ;;  %5539 = vmatmul.msk.f32.gmra.mxu0 %vm532_vm0, %v7353_v39  ;;  %5543 = vmatmul.msk.f32.gmra.mxu1 %vm532_vm0, %v7353_v39  ;;  %v1710_v59 = vmax.f32 %v1603_v62, 0.0  ;;  %v1711_v48 = vmax.f32 %v1632_v8, 0.0  ;;  %v7440_v8 = vpop.permute.xlu0 %1758 }
 0x348   : >> { %1843 = vmatpush.msra.mxu2 %v1724_v6  ;;  %1872 = vmatpush.msra.mxu3 %v1725_v43  ;;  %v1702_v6 = vmax.f32 %v1600_v40, 0.0  ;;  %v1703_v43 = vmax.f32 %v1629_v0, 0.0 }
 0x34a   : >> { %1844 = vmatpush.msra.mxu2 %v1716_v49  ;;  %1873 = vmatpush.msra.mxu3 %v1717_v51  ;;  %v1608_v56 = vpop.f32.mrf.mxu0  ;;  %v1637_v34 = vpop.f32.mrf.mxu1 }
 0x34b   : >> { %v1609_v55 = vadd.f32 %v1608_v56, %v7318_v42  ;;  %v1638_v50 = vadd.f32 %v1637_v34, %v7318_v42  ;;  %v1657_v57 = vpop.f32.mrf.mxu2  ;;  %v1686_v2 = vpop.f32.mrf.mxu3 }
 0x34c   : >> { %1845 = vmatpush.msra.mxu2 %v1708_v60  ;;  %1874 = vmatpush.msra.mxu3 %v1709_v36 }
 0x34d   : >> { %v1726_v7 = vmax.f32 %v1609_v55, 0.0  ;;  %v1727_v4 = vmax.f32 %v1638_v50, 0.0 }
 0x34e   : >> { %1846 = vmatpush.msra.mxu2 %v1700_v1  ;;  %1875 = vmatpush.msra.mxu3 %v1701_v54 }
 0x34f   : >> { %5540 = vmatmul.msk.f32.gmra.mxu0 %vm532_vm0, %v7370_v63  ;;  %5544 = vmatmul.msk.f32.gmra.mxu1 %vm532_vm0, %v7370_v63 }
 0x350   : >> { %5545 = vmatmul.msk.f32.vlgmr.msra.gmra.mxu2 %vm532_vm0, %v7339_v5  ;;  %5549 = vmatmul.msk.f32.vlgmr.msra.gmra.mxu3 %vm532_vm0, %v7339_v5 }
 0x351   : >> { %1901 = vmatpush.msrb.mxu0 %v1726_v7  ;;  %1930 = vmatpush.msrb.mxu1 %v1727_v4 }
 0x353   : >> { %1902 = vmatpush.msrb.mxu0 %v1718_v45  ;;  %1931 = vmatpush.msrb.mxu1 %v1719_v61  ;;  %v1660_v9 = vpop.f32.mrf.mxu2  ;;  %v1689_v58 = vpop.f32.mrf.mxu3 }
 0x354   : >> { %v1661_v55 = vadd.f32 %v1660_v9, %v7326_v53  ;;  %v1690_v50 = vadd.f32 %v1689_v58, %v7326_v53 }
 0x355   : >> { %1903 = vmatpush.msrb.mxu0 %v1710_v59  ;;  %1932 = vmatpush.msrb.mxu1 %v1711_v48  ;;  %v7448_v59 = vpop.permute.xlu2 %1748 }
 0x356   : >> { %v1712_v53 = vmax.f32 %v1661_v55, 0.0  ;;  %v1713_v44 = vmax.f32 %v1690_v50, 0.0  ;;  %v7457_v55 = vld [vmem:[%s6826_s29 + $0xa0] sm:$0xff] }
 0x357   : >> { %1904 = vmatpush.msrb.mxu0 %v1702_v6  ;;  %1933 = vmatpush.msrb.mxu1 %v1703_v43  ;;  %v7452_v43 = vpop.permute.xlu0 %1743 }
 0x358   : >> { %5546 = vmatmul.msk.f32.gmra.mxu2 %vm532_vm0, %v7346_v38  ;;  %5550 = vmatmul.msk.f32.gmra.mxu3 %vm532_vm0, %v7346_v38 }
 0x359   : >> { %5553 = vmatmul.msk.f32.vlgmr.msrb.gmra.mxu0 %vm532_vm0, %v7339_v5  ;;  %5557 = vmatmul.msk.f32.vlgmr.msrb.gmra.mxu1 %vm532_vm0, %v7339_v5 }
 0x35b   : >> { %v1663_v3 = vpop.f32.mrf.mxu2  ;;  %v1692_v52 = vpop.f32.mrf.mxu3 }
 0x35c   : >> { %v1664_v60 = vadd.f32 %v1663_v3, %v7320_v47  ;;  %v1693_v36 = vadd.f32 %v1692_v52, %v7320_v47  ;;  %v1687_v47 = vadd.f32 %v1686_v2, %v7330_v35 }
 0x35e   : >> { %v1720_v1 = vmax.f32 %v1664_v60, 0.0  ;;  %v1721_v54 = vmax.f32 %v1693_v36, 0.0  ;;  %v1705_v7 = vmax.f32 %v1687_v47, 0.0 }
 0x360   : >> { %5547 = vmatmul.msk.f32.gmra.mxu2 %vm532_vm0, %v7353_v39  ;;  %5551 = vmatmul.msk.f32.gmra.mxu3 %vm532_vm0, %v7353_v39 }
 0x361   : >> { %5554 = vmatmul.msk.f32.gmra.mxu0 %vm532_vm0, %v7346_v38  ;;  %5558 = vmatmul.msk.f32.gmra.mxu1 %vm532_vm0, %v7346_v38 }
 0x363   : >> { %v1666_v46 = vpop.f32.mrf.mxu2  ;;  %v1695_v37 = vpop.f32.mrf.mxu3 }
 0x364   : >> { %v1667_v49 = vadd.f32 %v1666_v46, %v7318_v42  ;;  %v1696_v51 = vadd.f32 %v1695_v37, %v7318_v42  ;;  %v1658_v42 = vadd.f32 %v1657_v57, %v7330_v35 }
 0x366   : >> { %v1728_v56 = vmax.f32 %v1667_v49, 0.0  ;;  %v1729_v34 = vmax.f32 %v1696_v51, 0.0  ;;  %v1704_v41 = vmax.f32 %v1658_v42, 0.0 }
 0x368   : >> { %5548 = vmatmul.msk.f32.gmra.mxu2 %vm532_vm0, %v7370_v63  ;;  %5552 = vmatmul.msk.f32.gmra.mxu3 %vm532_vm0, %v7370_v63 }
 0x369   : >> { %5555 = vmatmul.msk.f32.gmra.mxu0 %vm532_vm0, %v7353_v39  ;;  %5559 = vmatmul.msk.f32.gmra.mxu1 %vm532_vm0, %v7353_v39 }
 0x36a   : >> { %1959 = vmatpush.msrb.mxu2 %v1728_v56  ;;  %1988 = vmatpush.msrb.mxu3 %v1729_v34 }
 0x36c   : >> { %1960 = vmatpush.msrb.mxu2 %v1720_v1  ;;  %1989 = vmatpush.msrb.mxu3 %v1721_v54  ;;  %v7464_v54 = vld [vmem:[%s6826_s29 + $0xa8] sm:$0xff] }
 0x36e   : >> { %1961 = vmatpush.msrb.mxu2 %v1712_v53  ;;  %1990 = vmatpush.msrb.mxu3 %v1713_v44 }
 0x370   : >> { %1962 = vmatpush.msrb.mxu2 %v1704_v41  ;;  %1991 = vmatpush.msrb.mxu3 %v1705_v7 }
 0x371   : >> { %5556 = vmatmul.msk.f32.gmra.mxu0 %vm532_vm0, %v7370_v63  ;;  %5560 = vmatmul.msk.f32.gmra.mxu1 %vm532_vm0, %v7370_v63 }
 0x372   : >> { %5561 = vmatmul.msk.f32.vlgmr.msrb.gmra.mxu2 %vm532_vm0, %v7339_v5  ;;  %5565 = vmatmul.msk.f32.vlgmr.msrb.gmra.mxu3 %vm532_vm0, %v7339_v5 }
 0x37a   : >> { %5562 = vmatmul.msk.f32.gmra.mxu2 %vm532_vm0, %v7346_v38  ;;  %5566 = vmatmul.msk.f32.gmra.mxu3 %vm532_vm0, %v7346_v38  ;;  %v7442_v38 = vpop.permute.xlu1 %1753 }
 0x382   : >> { %5563 = vmatmul.msk.f32.gmra.mxu2 %vm532_vm0, %v7353_v39  ;;  %5567 = vmatmul.msk.f32.gmra.mxu3 %vm532_vm0, %v7353_v39 }
 0x38a   : >> { %5564 = vmatmul.msk.f32.gmra.mxu2 %vm532_vm0, %v7370_v63  ;;  %5568 = vmatmul.msk.f32.gmra.mxu3 %vm532_vm0, %v7370_v63 }
 0x3b3   : >> { %v1790_v35 = vpop.f32.mrf.mxu0  ;;  %v1819_v5 = vpop.f32.mrf.mxu1 }
 0x3b4   : >> { %v1791_v3 = vadd.f32 %v1790_v35, %v7452_v43  ;;  %v1820_v52 = vadd.f32 %v1819_v5, %v7452_v43  ;;  %v7471_v35 = vld [vmem:[%s6826_s29 + $0xb0] sm:$0xff] }
 0x3b6   : >> { %v2005_v56 = vmax.f32 %v1791_v3, 0.0  ;;  %v2006_v34 = vmax.f32 %v1820_v52, 0.0 }
 0x3bb   : >> { %v1793_v57 = vpop.f32.mrf.mxu0  ;;  %v1822_v2 = vpop.f32.mrf.mxu1 }
 0x3bc   : >> { %v1794_v48 = vadd.f32 %v1793_v57, %v7448_v59  ;;  %v1823_v9 = vadd.f32 %v1822_v2, %v7448_v59 }
 0x3be   : >> { %v2013_v49 = vmax.f32 %v1794_v48, 0.0  ;;  %v2014_v51 = vmax.f32 %v1823_v9, 0.0 }
 0x3c3   : >> { %v1796_v4 = vpop.f32.mrf.mxu0  ;;  %v1825_v62 = vpop.f32.mrf.mxu1 }
 0x3c4   : >> { %v1797_v39 = vadd.f32 %v1796_v4, %v7442_v38  ;;  %v1826_v45 = vadd.f32 %v1825_v62, %v7442_v38 }
 0x3c6   : >> { %v2021_v46 = vmax.f32 %v1797_v39, 0.0  ;;  %v2022_v37 = vmax.f32 %v1826_v45, 0.0 }
 0x3cc   : >> { %v1799_v40 = vpop.f32.mrf.mxu0  ;;  %v1828_v0 = vpop.f32.mrf.mxu1 }
 0x3cd   : >> { %v1800_v61 = vadd.f32 %v1799_v40, %v7440_v8  ;;  %v1829_v63 = vadd.f32 %v1828_v0, %v7440_v8 }
 0x3cf   : >> { %v2029_v58 = vmax.f32 %v1800_v61, 0.0  ;;  %v2030_v6 = vmax.f32 %v1829_v63, 0.0 }
 0x3d1   : >> { %2092 = vmatpush.msra.mxu0 %v2029_v58  ;;  %2121 = vmatpush.msra.mxu1 %v2030_v6  ;;  %v7484_v6 = vld [vmem:[%s6826_s29 + $0xb8] sm:$0xff] }
 0x3d3   : >> { %v1848_v60 = vpop.f32.mrf.mxu2  ;;  %v1877_v36 = vpop.f32.mrf.mxu3  ;;  %2093 = vmatpush.msra.mxu0 %v2021_v46  ;;  %2122 = vmatpush.msra.mxu1 %v2022_v37 }
 0x3d5   : >> { %2094 = vmatpush.msra.mxu0 %v2013_v49  ;;  %2123 = vmatpush.msra.mxu1 %v2014_v51  ;;  %v1849_v49 = vadd.f32 %v1848_v60, %v7452_v43  ;;  %v1878_v51 = vadd.f32 %v1877_v36, %v7452_v43 }
 0x3d6   : >> { %v1906_v50 = vpop.f32.mrf.mxu0  ;;  %v1935_v42 = vpop.f32.mrf.mxu1 }
 0x3d7   : >> { %2095 = vmatpush.msra.mxu0 %v2005_v56  ;;  %2124 = vmatpush.msra.mxu1 %v2006_v34  ;;  %v1907_v36 = vadd.f32 %v1906_v50, %v7452_v43 }
 0x3d8   : >> { %5577 = vmatmul.msk.f32.vlgmr.msra.gmra.mxu0 %vm532_vm0, %v7457_v55  ;;  %5581 = vmatmul.msk.f32.vlgmr.msra.gmra.mxu1 %vm532_vm0, %v7457_v55 }
 0x3db   : >> { %v1851_v47 = vpop.f32.mrf.mxu2  ;;  %v1880_v1 = vpop.f32.mrf.mxu3 }
 0x3dc   : >> { %v1852_v45 = vadd.f32 %v1851_v47, %v7448_v59  ;;  %v1881_v61 = vadd.f32 %v1880_v1, %v7448_v59 }
 0x3de   : >> { %v1909_v53 = vpop.f32.mrf.mxu0  ;;  %v1938_v44 = vpop.f32.mrf.mxu1  ;;  %v2016_v60 = vmax.f32 %v1881_v61, 0.0 }
 0x3df   : >> { %v1910_v47 = vadd.f32 %v1909_v53, %v7448_v59  ;;  %v1939_v1 = vadd.f32 %v1938_v44, %v7448_v59  ;;  %v2007_v44 = vmax.f32 %v1849_v49, 0.0 }
 0x3e0   : >> { %5578 = vmatmul.msk.f32.gmra.mxu0 %vm532_vm0, %v7464_v54  ;;  %5582 = vmatmul.msk.f32.gmra.mxu1 %vm532_vm0, %v7464_v54 }
 0x3e3   : >> { %v1854_v41 = vpop.f32.mrf.mxu2  ;;  %v1883_v7 = vpop.f32.mrf.mxu3 }
 0x3e4   : >> { %v1855_v62 = vadd.f32 %v1854_v41, %v7442_v38  ;;  %v1884_v40 = vadd.f32 %v1883_v7, %v7442_v38 }
 0x3e6   : >> { %v1912_v5 = vpop.f32.mrf.mxu0  ;;  %v1941_v57 = vpop.f32.mrf.mxu1  ;;  %v2023_v56 = vmax.f32 %v1855_v62, 0.0  ;;  %v2024_v34 = vmax.f32 %v1884_v40, 0.0  ;;  %v2017_v62 = vmax.f32 %v1910_v47, 0.0  ;;  %v2018_v40 = vmax.f32 %v1939_v1, 0.0 }
 0x3e7   : >> { %v1913_v3 = vadd.f32 %v1912_v5, %v7442_v38  ;;  %v1942_v52 = vadd.f32 %v1941_v57, %v7442_v38  ;;  %v2015_v5 = vmax.f32 %v1852_v45, 0.0  ;;  %v1936_v57 = vadd.f32 %v1935_v42, %v7452_v43 }
 0x3e8   : >> { %5579 = vmatmul.msk.f32.gmra.mxu0 %vm532_vm0, %v7471_v35  ;;  %5583 = vmatmul.msk.f32.gmra.mxu1 %vm532_vm0, %v7471_v35  ;;  %v2009_v45 = vmax.f32 %v1907_v36, 0.0 }
 0x3e9   : >> { %v2026_v53 = vmax.f32 %v1942_v52, 0.0  ;;  %v2010_v50 = vmax.f32 %v1936_v57, 0.0 }
 0x3eb   : >> { %v1857_v2 = vpop.f32.mrf.mxu2  ;;  %v1886_v4 = vpop.f32.mrf.mxu3 }
 0x3ec   : >> { %v1858_v0 = vadd.f32 %v1857_v2, %v7440_v8  ;;  %v1887_v39 = vadd.f32 %v1886_v4, %v7440_v8  ;;  %v2025_v2 = vmax.f32 %v1913_v3, 0.0  ;;  %v2008_v4 = vmax.f32 %v1878_v51, 0.0 }
 0x3ee   : >> { %v2031_v63 = vmax.f32 %v1858_v0, 0.0  ;;  %v2032_v48 = vmax.f32 %v1887_v39, 0.0  ;;  %v1915_v9 = vpop.f32.mrf.mxu0  ;;  %v1944_v58 = vpop.f32.mrf.mxu1 }
 0x3ef   : >> { %v1916_v46 = vadd.f32 %v1915_v9, %v7440_v8  ;;  %v1945_v37 = vadd.f32 %v1944_v58, %v7440_v8 }
 0x3f0   : >> { %2150 = vmatpush.msra.mxu2 %v2031_v63  ;;  %2179 = vmatpush.msra.mxu3 %v2032_v48 }
 0x3f1   : >> { %v2033_v41 = vmax.f32 %v1916_v46, 0.0  ;;  %v2034_v7 = vmax.f32 %v1945_v37, 0.0  ;;  %5580 = vmatmul.msk.f32.gmra.mxu0 %vm532_vm0, %v7484_v6  ;;  %5584 = vmatmul.msk.f32.gmra.mxu1 %vm532_vm0, %v7484_v6 }
 0x3f2   : >> { %2151 = vmatpush.msra.mxu2 %v2023_v56  ;;  %2180 = vmatpush.msra.mxu3 %v2024_v34 }
 0x3f3   : >> { %2208 = vmatpush.msrb.mxu0 %v2033_v41  ;;  %2237 = vmatpush.msrb.mxu1 %v2034_v7 }
 0x3f4   : >> { %2152 = vmatpush.msra.mxu2 %v2015_v5  ;;  %2181 = vmatpush.msra.mxu3 %v2016_v60 }
 0x3f5   : >> { %v1964_v0 = vpop.f32.mrf.mxu2  ;;  %v1993_v39 = vpop.f32.mrf.mxu3  ;;  %2209 = vmatpush.msrb.mxu0 %v2025_v2  ;;  %2238 = vmatpush.msrb.mxu1 %v2026_v53 }
 0x3f6   : >> { %2153 = vmatpush.msra.mxu2 %v2007_v44  ;;  %2182 = vmatpush.msra.mxu3 %v2008_v4  ;;  %v1965_v47 = vadd.f32 %v1964_v0, %v7452_v43  ;;  %v7556_v53 = vpop.permute.xlu1 %2065  ;;  %v7564_v0 = vpop.permute.xlu0 %2055 }
 0x3f7   : >> { %2210 = vmatpush.msrb.mxu0 %v2017_v62  ;;  %2239 = vmatpush.msrb.mxu1 %v2018_v40 }
 0x3f8   : >> { %5585 = vmatmul.msk.f32.vlgmr.msra.gmra.mxu2 %vm532_vm0, %v7457_v55  ;;  %5589 = vmatmul.msk.f32.vlgmr.msra.gmra.mxu3 %vm532_vm0, %v7457_v55  ;;  %v2011_v7 = vmax.f32 %v1965_v47, 0.0 }
 0x3f9   : >> { %2211 = vmatpush.msrb.mxu0 %v2009_v45  ;;  %2240 = vmatpush.msrb.mxu1 %v2010_v50 }
 0x3fa   : >> { %5593 = vmatmul.msk.f32.vlgmr.msrb.gmra.mxu0 %vm532_vm0, %v7457_v55  ;;  %5597 = vmatmul.msk.f32.vlgmr.msrb.gmra.mxu1 %vm532_vm0, %v7457_v55 }
 0x3fd   : >> { %v1967_v42 = vpop.f32.mrf.mxu2  ;;  %v1996_v61 = vpop.f32.mrf.mxu3 }
 0x3fe   : >> { %v1968_v49 = vadd.f32 %v1967_v42, %v7448_v59  ;;  %v1997_v51 = vadd.f32 %v1996_v61, %v7448_v59  ;;  %v7568_v61 = vpop.permute.xlu1 %2050 }
 0x400   : >> { %5586 = vmatmul.msk.f32.gmra.mxu2 %vm532_vm0, %v7464_v54  ;;  %5590 = vmatmul.msk.f32.gmra.mxu3 %vm532_vm0, %v7464_v54  ;;  %v2020_v59 = vmax.f32 %v1997_v51, 0.0 }
 0x402   : >> { %5594 = vmatmul.msk.f32.gmra.mxu0 %vm532_vm0, %v7464_v54  ;;  %5598 = vmatmul.msk.f32.gmra.mxu1 %vm532_vm0, %v7464_v54 }
 0x405   : >> { %v1970_v63 = vpop.f32.mrf.mxu2  ;;  %v1999_v48 = vpop.f32.mrf.mxu3 }
 0x406   : >> { %v1971_v3 = vadd.f32 %v1970_v63, %v7442_v38  ;;  %v2000_v52 = vadd.f32 %v1999_v48, %v7442_v38  ;;  %v1994_v38 = vadd.f32 %v1993_v39, %v7452_v43 }
 0x408   : >> { %5587 = vmatmul.msk.f32.gmra.mxu2 %vm532_vm0, %v7471_v35  ;;  %5591 = vmatmul.msk.f32.gmra.mxu3 %vm532_vm0, %v7471_v35  ;;  %v2027_v1 = vmax.f32 %v1971_v3, 0.0  ;;  %v2028_v41 = vmax.f32 %v2000_v52, 0.0  ;;  %v2012_v5 = vmax.f32 %v1994_v38, 0.0 }
 0x40a   : >> { %5595 = vmatmul.msk.f32.gmra.mxu0 %vm532_vm0, %v7471_v35  ;;  %5599 = vmatmul.msk.f32.gmra.mxu1 %vm532_vm0, %v7471_v35 }
 0x40d   : >> { %v1973_v9 = vpop.f32.mrf.mxu2  ;;  %v2002_v58 = vpop.f32.mrf.mxu3 }
 0x40e   : >> { %v1974_v46 = vadd.f32 %v1973_v9, %v7440_v8  ;;  %v2003_v37 = vadd.f32 %v2002_v58, %v7440_v8  ;;  %v2019_v8 = vmax.f32 %v1968_v49, 0.0 }
 0x410   : >> { %v2035_v56 = vmax.f32 %v1974_v46, 0.0  ;;  %v2036_v34 = vmax.f32 %v2003_v37, 0.0  ;;  %5588 = vmatmul.msk.f32.gmra.mxu2 %vm532_vm0, %v7484_v6  ;;  %5592 = vmatmul.msk.f32.gmra.mxu3 %vm532_vm0, %v7484_v6 }
 0x412   : >> { %2266 = vmatpush.msrb.mxu2 %v2035_v56  ;;  %2295 = vmatpush.msrb.mxu3 %v2036_v34  ;;  %v7573_v56 = vld [vmem:[%s6826_s29 + $0xc0] sm:$0xff] }
 0x413   : >> { %5596 = vmatmul.msk.f32.gmra.mxu0 %vm532_vm0, %v7484_v6  ;;  %5600 = vmatmul.msk.f32.gmra.mxu1 %vm532_vm0, %v7484_v6 }
 0x414   : >> { %2267 = vmatpush.msrb.mxu2 %v2027_v1  ;;  %2296 = vmatpush.msrb.mxu3 %v2028_v41  ;;  %v7580_v41 = vld [vmem:[%s6826_s29 + $0xc8] sm:$0xff] }
 0x416   : >> { %2268 = vmatpush.msrb.mxu2 %v2019_v8  ;;  %2297 = vmatpush.msrb.mxu3 %v2020_v59 }
 0x418   : >> { %2269 = vmatpush.msrb.mxu2 %v2011_v7  ;;  %2298 = vmatpush.msrb.mxu3 %v2012_v5 }
 0x419   : >> { %5601 = vmatmul.msk.f32.vlgmr.msrb.gmra.mxu2 %vm532_vm0, %v7457_v55  ;;  %5605 = vmatmul.msk.f32.vlgmr.msrb.gmra.mxu3 %vm532_vm0, %v7457_v55 }
 0x421   : >> { %5602 = vmatmul.msk.f32.gmra.mxu2 %vm532_vm0, %v7464_v54  ;;  %5606 = vmatmul.msk.f32.gmra.mxu3 %vm532_vm0, %v7464_v54  ;;  %v7558_v54 = vpop.permute.xlu2 %2060 }
 0x429   : >> { %5603 = vmatmul.msk.f32.gmra.mxu2 %vm532_vm0, %v7471_v35  ;;  %5607 = vmatmul.msk.f32.gmra.mxu3 %vm532_vm0, %v7471_v35 }
 0x431   : >> { %5604 = vmatmul.msk.f32.gmra.mxu2 %vm532_vm0, %v7484_v6  ;;  %5608 = vmatmul.msk.f32.gmra.mxu3 %vm532_vm0, %v7484_v6 }
 0x455   : >> { %v2097_v43 = vpop.f32.mrf.mxu0  ;;  %v2126_v55 = vpop.f32.mrf.mxu1 }
 0x456   : >> { %v2098_v63 = vadd.f32 %v2097_v43, %v7568_v61  ;;  %v2127_v48 = vadd.f32 %v2126_v55, %v7568_v61  ;;  %v7587_v43 = vld [vmem:[%s6826_s29 + $0xd0] sm:$0xff] }
 0x458   : >> { %v2312_v46 = vmax.f32 %v2098_v63, 0.0  ;;  %v2313_v37 = vmax.f32 %v2127_v48, 0.0 }
 0x45d   : >> { %v2100_v60 = vpop.f32.mrf.mxu0  ;;  %v2129_v36 = vpop.f32.mrf.mxu1 }
 0x45e   : >> { %v2101_v39 = vadd.f32 %v2100_v60, %v7564_v0  ;;  %v2130_v45 = vadd.f32 %v2129_v36, %v7564_v0  ;;  %v7594_v36 = vld [vmem:[%s6826_s29 + $0xd8] sm:$0xff] }
 0x460   : >> { %v2320_v3 = vmax.f32 %v2101_v39, 0.0  ;;  %v2321_v52 = vmax.f32 %v2130_v45, 0.0 }
 0x465   : >> { %v2103_v57 = vpop.f32.mrf.mxu0  ;;  %v2132_v2 = vpop.f32.mrf.mxu1 }
 0x466   : >> { %v2104_v35 = vadd.f32 %v2103_v57, %v7558_v54  ;;  %v2133_v62 = vadd.f32 %v2132_v2, %v7558_v54 }
 0x468   : >> { %v2328_v9 = vmax.f32 %v2104_v35, 0.0  ;;  %v2329_v58 = vmax.f32 %v2133_v62, 0.0 }
 0x46e   : >> { %v2106_v44 = vpop.f32.mrf.mxu0  ;;  %v2135_v4 = vpop.f32.mrf.mxu1 }
 0x46f   : >> { %v2107_v40 = vadd.f32 %v2106_v44, %v7556_v53  ;;  %v2136_v6 = vadd.f32 %v2135_v4, %v7556_v53 }
 0x471   : >> { %v2336_v50 = vmax.f32 %v2107_v40, 0.0  ;;  %v2337_v42 = vmax.f32 %v2136_v6, 0.0 }
 0x473   : >> { %2399 = vmatpush.msra.mxu0 %v2336_v50  ;;  %2428 = vmatpush.msra.mxu1 %v2337_v42 }
 0x475   : >> { %2400 = vmatpush.msra.mxu0 %v2328_v9  ;;  %2429 = vmatpush.msra.mxu1 %v2329_v58 }
 0x477   : >> { %v2213_v49 = vpop.f32.mrf.mxu0  ;;  %v2242_v51 = vpop.f32.mrf.mxu1  ;;  %2401 = vmatpush.msra.mxu0 %v2320_v3  ;;  %2430 = vmatpush.msra.mxu1 %v2321_v52 }
 0x478   : >> { %v2214_v3 = vadd.f32 %v2213_v49, %v7568_v61  ;;  %v2243_v52 = vadd.f32 %v2242_v51, %v7568_v61 }
 0x479   : >> { %2402 = vmatpush.msra.mxu0 %v2312_v46  ;;  %2431 = vmatpush.msra.mxu1 %v2313_v37 }
 0x47a   : >> { %5617 = vmatmul.msk.f32.vlgmr.msra.gmra.mxu0 %vm532_vm0, %v7573_v56  ;;  %5621 = vmatmul.msk.f32.vlgmr.msra.gmra.mxu1 %vm532_vm0, %v7573_v56  ;;  %v2316_v49 = vmax.f32 %v2214_v3, 0.0  ;;  %v2317_v51 = vmax.f32 %v2243_v52, 0.0 }
 0x47b   : >> { %v2155_v34 = vpop.f32.mrf.mxu2  ;;  %v2184_v47 = vpop.f32.mrf.mxu3 }
 0x47f   : >> { %v2216_v38 = vpop.f32.mrf.mxu0  ;;  %v2245_v1 = vpop.f32.mrf.mxu1 }
 0x480   : >> { %v2217_v40 = vadd.f32 %v2216_v38, %v7564_v0  ;;  %v2246_v6 = vadd.f32 %v2245_v1, %v7564_v0 }
 0x482   : >> { %5618 = vmatmul.msk.f32.gmra.mxu0 %vm532_vm0, %v7580_v41  ;;  %5622 = vmatmul.msk.f32.gmra.mxu1 %vm532_vm0, %v7580_v41 }
 0x483   : >> { %v2158_v8 = vpop.f32.mrf.mxu2  ;;  %v2187_v59 = vpop.f32.mrf.mxu3 }
 0x487   : >> { %v2219_v7 = vpop.f32.mrf.mxu0  ;;  %v2248_v5 = vpop.f32.mrf.mxu1 }
 0x488   : >> { %v2220_v44 = vadd.f32 %v2219_v7, %v7558_v54  ;;  %v2249_v4 = vadd.f32 %v2248_v5, %v7558_v54  ;;  %v2324_v7 = vmax.f32 %v2217_v40, 0.0  ;;  %v2325_v5 = vmax.f32 %v2246_v6, 0.0 }
 0x48a   : >> { %5619 = vmatmul.msk.f32.gmra.mxu0 %vm532_vm0, %v7587_v43  ;;  %5623 = vmatmul.msk.f32.gmra.mxu1 %vm532_vm0, %v7587_v43  ;;  %v2332_v46 = vmax.f32 %v2220_v44, 0.0  ;;  %v2333_v37 = vmax.f32 %v2249_v4, 0.0  ;;  %v2156_v44 = vadd.f32 %v2155_v34, %v7568_v61  ;;  %v2185_v4 = vadd.f32 %v2184_v47, %v7568_v61 }
 0x48b   : >> { %v2161_v55 = vpop.f32.mrf.mxu2  ;;  %v2190_v60 = vpop.f32.mrf.mxu3 }
 0x48c   : >> { %v2162_v63 = vadd.f32 %v2161_v55, %v7558_v54  ;;  %v2191_v48 = vadd.f32 %v2190_v60, %v7558_v54  ;;  %v2159_v55 = vadd.f32 %v2158_v8, %v7564_v0  ;;  %v2188_v60 = vadd.f32 %v2187_v59, %v7564_v0 }
 0x48d   : >> { %v2314_v40 = vmax.f32 %v2156_v44, 0.0  ;;  %v2315_v34 = vmax.f32 %v2185_v4, 0.0 }
 0x48e   : >> { %v2323_v8 = vmax.f32 %v2188_v60, 0.0 }
 0x490   : >> { %v2222_v57 = vpop.f32.mrf.mxu0  ;;  %v2251_v2 = vpop.f32.mrf.mxu1 }
 0x491   : >> { %v2223_v35 = vadd.f32 %v2222_v57, %v7556_v53  ;;  %v2252_v62 = vadd.f32 %v2251_v2, %v7556_v53  ;;  %v2330_v57 = vmax.f32 %v2162_v63, 0.0  ;;  %v2331_v2 = vmax.f32 %v2191_v48, 0.0 }
 0x492   : >> { %5620 = vmatmul.msk.f32.gmra.mxu0 %vm532_vm0, %v7594_v36  ;;  %5624 = vmatmul.msk.f32.gmra.mxu1 %vm532_vm0, %v7594_v36 }
 0x493   : >> { %v2340_v39 = vmax.f32 %v2223_v35, 0.0  ;;  %v2341_v45 = vmax.f32 %v2252_v62, 0.0  ;;  %v2164_v50 = vpop.f32.mrf.mxu2  ;;  %v2193_v42 = vpop.f32.mrf.mxu3  ;;  %v2322_v35 = vmax.f32 %v2159_v55, 0.0 }
 0x494   : >> { %v2165_v9 = vadd.f32 %v2164_v50, %v7556_v53  ;;  %v2194_v58 = vadd.f32 %v2193_v42, %v7556_v53 }
 0x495   : >> { %2515 = vmatpush.msrb.mxu0 %v2340_v39  ;;  %2544 = vmatpush.msrb.mxu1 %v2341_v45 }
 0x496   : >> { %v2338_v38 = vmax.f32 %v2165_v9, 0.0  ;;  %v2339_v1 = vmax.f32 %v2194_v58, 0.0 }
 0x497   : >> { %2516 = vmatpush.msrb.mxu0 %v2332_v46  ;;  %2545 = vmatpush.msrb.mxu1 %v2333_v37 }
 0x498   : >> { %2457 = vmatpush.msra.mxu2 %v2338_v38  ;;  %2486 = vmatpush.msra.mxu3 %v2339_v1 }
 0x499   : >> { %2517 = vmatpush.msrb.mxu0 %v2324_v7  ;;  %2546 = vmatpush.msrb.mxu1 %v2325_v5 }
 0x49a   : >> { %2458 = vmatpush.msra.mxu2 %v2330_v57  ;;  %2487 = vmatpush.msra.mxu3 %v2331_v2 }
 0x49b   : >> { %2518 = vmatpush.msrb.mxu0 %v2316_v49  ;;  %2547 = vmatpush.msrb.mxu1 %v2317_v51  ;;  %v7672_v51 = vpop.permute.xlu2 %2372 }
 0x49c   : >> { %v2271_v59 = vpop.f32.mrf.mxu2  ;;  %v2300_v62 = vpop.f32.mrf.mxu3  ;;  %5633 = vmatmul.msk.f32.vlgmr.msrb.gmra.mxu0 %vm532_vm0, %v7573_v56  ;;  %5637 = vmatmul.msk.f32.vlgmr.msrb.gmra.mxu1 %vm532_vm0, %v7573_v56 }
 0x49d   : >> { %2459 = vmatpush.msra.mxu2 %v2322_v35  ;;  %2488 = vmatpush.msra.mxu3 %v2323_v8  ;;  %v2272_v38 = vadd.f32 %v2271_v59, %v7568_v61  ;;  %v7680_v59 = vpop.permute.xlu1 %2362 }
 0x49f   : >> { %2460 = vmatpush.msra.mxu2 %v2314_v40  ;;  %2489 = vmatpush.msra.mxu3 %v2315_v34 }
 0x4a0   : >> { %5625 = vmatmul.msk.f32.vlgmr.msra.gmra.mxu2 %vm532_vm0, %v7573_v56  ;;  %5629 = vmatmul.msk.f32.vlgmr.msra.gmra.mxu3 %vm532_vm0, %v7573_v56 }
 0x4a4   : >> { %v2274_v47 = vpop.f32.mrf.mxu2  ;;  %v2303_v6 = vpop.f32.mrf.mxu3  ;;  %5634 = vmatmul.msk.f32.gmra.mxu0 %vm532_vm0, %v7580_v41  ;;  %5638 = vmatmul.msk.f32.gmra.mxu1 %vm532_vm0, %v7580_v41 }
 0x4a5   : >> { %v2275_v3 = vadd.f32 %v2274_v47, %v7564_v0  ;;  %v2304_v52 = vadd.f32 %v2303_v6, %v7564_v0  ;;  %v2318_v0 = vmax.f32 %v2272_v38, 0.0  ;;  %v7684_v6 = vpop.permute.xlu2 %2357 }
 0x4a7   : >> { %v2327_v5 = vmax.f32 %v2304_v52, 0.0 }
 0x4a8   : >> { %5626 = vmatmul.msk.f32.gmra.mxu2 %vm532_vm0, %v7580_v41  ;;  %5630 = vmatmul.msk.f32.gmra.mxu3 %vm532_vm0, %v7580_v41 }
 0x4ac   : >> { %v2277_v39 = vpop.f32.mrf.mxu2  ;;  %v2306_v45 = vpop.f32.mrf.mxu3  ;;  %5635 = vmatmul.msk.f32.gmra.mxu0 %vm532_vm0, %v7587_v43  ;;  %5639 = vmatmul.msk.f32.gmra.mxu1 %vm532_vm0, %v7587_v43 }
 0x4ad   : >> { %v2278_v63 = vadd.f32 %v2277_v39, %v7558_v54  ;;  %v2307_v48 = vadd.f32 %v2306_v45, %v7558_v54  ;;  %v2301_v54 = vadd.f32 %v2300_v62, %v7568_v61 }
 0x4af   : >> { %v2334_v1 = vmax.f32 %v2278_v63, 0.0  ;;  %v2335_v7 = vmax.f32 %v2307_v48, 0.0  ;;  %v2319_v55 = vmax.f32 %v2301_v54, 0.0 }
 0x4b0   : >> { %5627 = vmatmul.msk.f32.gmra.mxu2 %vm532_vm0, %v7587_v43  ;;  %5631 = vmatmul.msk.f32.gmra.mxu3 %vm532_vm0, %v7587_v43 }
 0x4b4   : >> { %v2280_v50 = vpop.f32.mrf.mxu2  ;;  %v2309_v42 = vpop.f32.mrf.mxu3  ;;  %5636 = vmatmul.msk.f32.gmra.mxu0 %vm532_vm0, %v7594_v36  ;;  %5640 = vmatmul.msk.f32.gmra.mxu1 %vm532_vm0, %v7594_v36 }
 0x4b5   : >> { %v2281_v9 = vadd.f32 %v2280_v50, %v7556_v53  ;;  %v2310_v58 = vadd.f32 %v2309_v42, %v7556_v53  ;;  %v2326_v53 = vmax.f32 %v2275_v3, 0.0  ;;  %v7689_v3 = vld [vmem:[%s6826_s29 + $0xe0] sm:$0xff] }
 0x4b7   : >> { %v2342_v46 = vmax.f32 %v2281_v9, 0.0  ;;  %v2343_v37 = vmax.f32 %v2310_v58, 0.0 }
 0x4b8   : >> { %5628 = vmatmul.msk.f32.gmra.mxu2 %vm532_vm0, %v7594_v36  ;;  %5632 = vmatmul.msk.f32.gmra.mxu3 %vm532_vm0, %v7594_v36 }
 0x4b9   : >> { %2573 = vmatpush.msrb.mxu2 %v2342_v46  ;;  %2602 = vmatpush.msrb.mxu3 %v2343_v37  ;;  %v7696_v37 = vld [vmem:[%s6826_s29 + $0xe8] sm:$0xff] }
 0x4bb   : >> { %2574 = vmatpush.msrb.mxu2 %v2334_v1  ;;  %2603 = vmatpush.msrb.mxu3 %v2335_v7 }
 0x4bd   : >> { %2575 = vmatpush.msrb.mxu2 %v2326_v53  ;;  %2604 = vmatpush.msrb.mxu3 %v2327_v5  ;;  %v7703_v53 = vld [vmem:[%s6826_s29 + $0xf0] sm:$0xff] }
 0x4bf   : >> { %2576 = vmatpush.msrb.mxu2 %v2318_v0  ;;  %2605 = vmatpush.msrb.mxu3 %v2319_v55 }
 0x4c0   : >> { %5641 = vmatmul.msk.f32.vlgmr.msrb.gmra.mxu2 %vm532_vm0, %v7573_v56  ;;  %5645 = vmatmul.msk.f32.vlgmr.msrb.gmra.mxu3 %vm532_vm0, %v7573_v56 }
 0x4c8   : >> { %5642 = vmatmul.msk.f32.gmra.mxu2 %vm532_vm0, %v7580_v41  ;;  %5646 = vmatmul.msk.f32.gmra.mxu3 %vm532_vm0, %v7580_v41  ;;  %v7674_v41 = vpop.permute.xlu0 %2367 }
 0x4d0   : >> { %5643 = vmatmul.msk.f32.gmra.mxu2 %vm532_vm0, %v7587_v43  ;;  %5647 = vmatmul.msk.f32.gmra.mxu3 %vm532_vm0, %v7587_v43 }
 0x4d8   : >> { %5644 = vmatmul.msk.f32.gmra.mxu2 %vm532_vm0, %v7594_v36  ;;  %5648 = vmatmul.msk.f32.gmra.mxu3 %vm532_vm0, %v7594_v36 }
 0x4f7   : >> { %v2404_v61 = vpop.f32.mrf.mxu0  ;;  %v2433_v56 = vpop.f32.mrf.mxu1 }
 0x4f8   : >> { %v2405_v39 = vadd.f32 %v2404_v61, %v7684_v6  ;;  %v2434_v45 = vadd.f32 %v2433_v56, %v7684_v6  ;;  %v7710_v56 = vld [vmem:[%s6826_s29 + $0xf8] sm:$0xff] }
 0x4fa   : >> { %v2619_v9 = vmax.f32 %v2405_v39, 0.0  ;;  %v2620_v58 = vmax.f32 %v2434_v45, 0.0 }
 0x4ff   : >> { %v2407_v60 = vpop.f32.mrf.mxu0  ;;  %v2436_v57 = vpop.f32.mrf.mxu1 }
 0x500   : >> { %v2408_v62 = vadd.f32 %v2407_v60, %v7680_v59  ;;  %v2437_v40 = vadd.f32 %v2436_v57, %v7680_v59 }
 0x502   : >> { %v2627_v63 = vmax.f32 %v2408_v62, 0.0  ;;  %v2628_v48 = vmax.f32 %v2437_v40, 0.0 }
 0x507   : >> { %v2410_v2 = vpop.f32.mrf.mxu0  ;;  %v2439_v49 = vpop.f32.mrf.mxu1 }
 0x508   : >> { %v2411_v43 = vadd.f32 %v2410_v2, %v7674_v41  ;;  %v2440_v35 = vadd.f32 %v2439_v49, %v7674_v41 }
 0x50a   : >> { %v2635_v50 = vmax.f32 %v2411_v43, 0.0  ;;  %v2636_v42 = vmax.f32 %v2440_v35, 0.0 }
 0x50f   : >> { %v2413_v44 = vpop.f32.mrf.mxu0  ;;  %v2442_v4 = vpop.f32.mrf.mxu1 }
 0x510   : >> { %v2414_v8 = vadd.f32 %v2413_v44, %v7672_v51  ;;  %v2443_v36 = vadd.f32 %v2442_v4, %v7672_v51 }
 0x512   : >> { %v2643_v34 = vmax.f32 %v2414_v8, 0.0  ;;  %v2644_v47 = vmax.f32 %v2443_v36, 0.0 }
 0x514   : >> { %2706 = vmatpush.msra.mxu0 %v2643_v34  ;;  %2735 = vmatpush.msra.mxu1 %v2644_v47 }
 0x516   : >> { %2707 = vmatpush.msra.mxu0 %v2635_v50  ;;  %2736 = vmatpush.msra.mxu1 %v2636_v42 }
 0x518   : >> { %2708 = vmatpush.msra.mxu0 %v2627_v63  ;;  %2737 = vmatpush.msra.mxu1 %v2628_v48 }
 0x519   : >> { %v2520_v52 = vpop.f32.mrf.mxu0  ;;  %v2549_v46 = vpop.f32.mrf.mxu1 }
 0x51a   : >> { %2709 = vmatpush.msra.mxu0 %v2619_v9  ;;  %2738 = vmatpush.msra.mxu1 %v2620_v58  ;;  %v2521_v34 = vadd.f32 %v2520_v52, %v7684_v6  ;;  %v2550_v47 = vadd.f32 %v2549_v46, %v7684_v6 }
 0x51b   : >> { %5657 = vmatmul.msk.f32.vlgmr.msra.gmra.mxu0 %vm532_vm0, %v7689_v3  ;;  %5661 = vmatmul.msk.f32.vlgmr.msra.gmra.mxu1 %vm532_vm0, %v7689_v3 }
 0x51c   : >> { %v2623_v63 = vmax.f32 %v2521_v34, 0.0  ;;  %v2624_v48 = vmax.f32 %v2550_v47, 0.0 }
 0x521   : >> { %v2523_v38 = vpop.f32.mrf.mxu0  ;;  %v2552_v54 = vpop.f32.mrf.mxu1 }
 0x522   : >> { %v2524_v8 = vadd.f32 %v2523_v38, %v7680_v59  ;;  %v2553_v36 = vadd.f32 %v2552_v54, %v7680_v59 }
 0x523   : >> { %v2462_v1 = vpop.f32.mrf.mxu2  ;;  %v2491_v7 = vpop.f32.mrf.mxu3  ;;  %5658 = vmatmul.msk.f32.gmra.mxu0 %vm532_vm0, %v7696_v37  ;;  %5662 = vmatmul.msk.f32.gmra.mxu1 %vm532_vm0, %v7696_v37 }
 0x524   : >> { %v2631_v50 = vmax.f32 %v2524_v8, 0.0  ;;  %v2632_v42 = vmax.f32 %v2553_v36, 0.0 }
 0x529   : >> { %v2526_v5 = vpop.f32.mrf.mxu0  ;;  %v2555_v0 = vpop.f32.mrf.mxu1 }
 0x52a   : >> { %v2527_v2 = vadd.f32 %v2526_v5, %v7674_v41  ;;  %v2556_v49 = vadd.f32 %v2555_v0, %v7674_v41 }
 0x52b   : >> { %v2465_v55 = vpop.f32.mrf.mxu2  ;;  %v2494_v61 = vpop.f32.mrf.mxu3  ;;  %5659 = vmatmul.msk.f32.gmra.mxu0 %vm532_vm0, %v7703_v53  ;;  %5663 = vmatmul.msk.f32.gmra.mxu1 %vm532_vm0, %v7703_v53 }
 0x52c   : >> { %v2639_v39 = vmax.f32 %v2527_v2, 0.0  ;;  %v2640_v45 = vmax.f32 %v2556_v49, 0.0  ;;  %v2466_v5 = vadd.f32 %v2465_v55, %v7680_v59  ;;  %v2495_v0 = vadd.f32 %v2494_v61, %v7680_v59 }
 0x52d   : >> { %v2463_v2 = vadd.f32 %v2462_v1, %v7684_v6  ;;  %v2492_v49 = vadd.f32 %v2491_v7, %v7684_v6 }
 0x52f   : >> { %v2622_v55 = vmax.f32 %v2492_v49, 0.0  ;;  %v7788_v49 = vpop.permute.xlu0 %2679 }
 0x531   : >> { %v2529_v60 = vpop.f32.mrf.mxu0  ;;  %v2558_v57 = vpop.f32.mrf.mxu1 }
 0x532   : >> { %v2530_v44 = vadd.f32 %v2529_v60, %v7672_v51  ;;  %v2559_v4 = vadd.f32 %v2558_v57, %v7672_v51 }
 0x533   : >> { %v2468_v43 = vpop.f32.mrf.mxu2  ;;  %v2497_v35 = vpop.f32.mrf.mxu3  ;;  %5660 = vmatmul.msk.f32.gmra.mxu0 %vm532_vm0, %v7710_v56  ;;  %5664 = vmatmul.msk.f32.gmra.mxu1 %vm532_vm0, %v7710_v56 }
 0x534   : >> { %v2647_v62 = vmax.f32 %v2530_v44, 0.0  ;;  %v2648_v40 = vmax.f32 %v2559_v4, 0.0  ;;  %v2469_v9 = vadd.f32 %v2468_v43, %v7674_v41  ;;  %v2498_v52 = vadd.f32 %v2497_v35, %v7674_v41 }
 0x535   : >> { %v2629_v43 = vmax.f32 %v2466_v5, 0.0  ;;  %v2630_v35 = vmax.f32 %v2495_v0, 0.0 }
 0x536   : >> { %2822 = vmatpush.msrb.mxu0 %v2647_v62  ;;  %2851 = vmatpush.msrb.mxu1 %v2648_v40  ;;  %v2637_v44 = vmax.f32 %v2469_v9, 0.0  ;;  %v2638_v4 = vmax.f32 %v2498_v52, 0.0  ;;  %v2621_v62 = vmax.f32 %v2463_v2, 0.0 }
 0x538   : >> { %2823 = vmatpush.msrb.mxu0 %v2639_v39  ;;  %2852 = vmatpush.msrb.mxu1 %v2640_v45 }
 0x53a   : >> { %2824 = vmatpush.msrb.mxu0 %v2631_v50  ;;  %2853 = vmatpush.msrb.mxu1 %v2632_v42 }
 0x53b   : >> { %v2471_v58 = vpop.f32.mrf.mxu2  ;;  %v2500_v38 = vpop.f32.mrf.mxu3 }
 0x53c   : >> { %v2472_v46 = vadd.f32 %v2471_v58, %v7672_v51  ;;  %v2501_v54 = vadd.f32 %v2500_v38, %v7672_v51  ;;  %2825 = vmatpush.msrb.mxu0 %v2623_v63  ;;  %2854 = vmatpush.msrb.mxu1 %v2624_v48 }
 0x53d   : >> { %5673 = vmatmul.msk.f32.vlgmr.msrb.gmra.mxu0 %vm532_vm0, %v7689_v3  ;;  %5677 = vmatmul.msk.f32.vlgmr.msrb.gmra.mxu1 %vm532_vm0, %v7689_v3 }
 0x53e   : >> { %v2645_v60 = vmax.f32 %v2472_v46, 0.0  ;;  %v2646_v57 = vmax.f32 %v2501_v54, 0.0 }
 0x540   : >> { %2764 = vmatpush.msra.mxu2 %v2645_v60  ;;  %2793 = vmatpush.msra.mxu3 %v2646_v57 }
 0x542   : >> { %2765 = vmatpush.msra.mxu2 %v2637_v44  ;;  %2794 = vmatpush.msra.mxu3 %v2638_v4 }
 0x543   : >> { %v2578_v8 = vpop.f32.mrf.mxu2  ;;  %v2607_v36 = vpop.f32.mrf.mxu3 }
 0x544   : >> { %2766 = vmatpush.msra.mxu2 %v2629_v43  ;;  %2795 = vmatpush.msra.mxu3 %v2630_v35  ;;  %v2579_v38 = vadd.f32 %v2578_v8, %v7684_v6  ;;  %v7796_v8 = vpop.permute.xlu2 %2669 }
 0x545   : >> { %5674 = vmatmul.msk.f32.gmra.mxu0 %vm532_vm0, %v7696_v37  ;;  %5678 = vmatmul.msk.f32.gmra.mxu1 %vm532_vm0, %v7696_v37 }
 0x546   : >> { %2767 = vmatpush.msra.mxu2 %v2621_v62  ;;  %2796 = vmatpush.msra.mxu3 %v2622_v55 }
 0x547   : >> { %5665 = vmatmul.msk.f32.vlgmr.msra.gmra.mxu2 %vm532_vm0, %v7689_v3  ;;  %5669 = vmatmul.msk.f32.vlgmr.msra.gmra.mxu3 %vm532_vm0, %v7689_v3 }
 0x54b   : >> { %v2581_v1 = vpop.f32.mrf.mxu2  ;;  %v2610_v7 = vpop.f32.mrf.mxu3 }
 0x54c   : >> { %v2582_v63 = vadd.f32 %v2581_v1, %v7680_v59  ;;  %v2611_v48 = vadd.f32 %v2610_v7, %v7680_v59  ;;  %v2625_v59 = vmax.f32 %v2579_v38, 0.0  ;;  %v7800_v7 = vpop.permute.xlu0 %2664 }
 0x54d   : >> { %5675 = vmatmul.msk.f32.gmra.mxu0 %vm532_vm0, %v7703_v53  ;;  %5679 = vmatmul.msk.f32.gmra.mxu1 %vm532_vm0, %v7703_v53 }
 0x54e   : >> { %v2634_v54 = vmax.f32 %v2611_v48, 0.0 }
 0x54f   : >> { %5666 = vmatmul.msk.f32.gmra.mxu2 %vm532_vm0, %v7696_v37  ;;  %5670 = vmatmul.msk.f32.gmra.mxu3 %vm532_vm0, %v7696_v37 }
 0x553   : >> { %v2584_v61 = vpop.f32.mrf.mxu2  ;;  %v2613_v40 = vpop.f32.mrf.mxu3 }
 0x554   : >> { %v2585_v39 = vadd.f32 %v2584_v61, %v7674_v41  ;;  %v2614_v45 = vadd.f32 %v2613_v40, %v7674_v41  ;;  %v2608_v41 = vadd.f32 %v2607_v36, %v7684_v6 }
 0x555   : >> { %5676 = vmatmul.msk.f32.gmra.mxu0 %vm532_vm0, %v7710_v56  ;;  %5680 = vmatmul.msk.f32.gmra.mxu1 %vm532_vm0, %v7710_v56 }
 0x556   : >> { %v2641_v52 = vmax.f32 %v2585_v39, 0.0  ;;  %v2642_v46 = vmax.f32 %v2614_v45, 0.0  ;;  %v2626_v5 = vmax.f32 %v2608_v41, 0.0 }
 0x557   : >> { %5667 = vmatmul.msk.f32.gmra.mxu2 %vm532_vm0, %v7703_v53  ;;  %5671 = vmatmul.msk.f32.gmra.mxu3 %vm532_vm0, %v7703_v53 }
 0x55b   : >> { %v2587_v34 = vpop.f32.mrf.mxu2  ;;  %v2616_v47 = vpop.f32.mrf.mxu3 }
 0x55c   : >> { %v2588_v50 = vadd.f32 %v2587_v34, %v7672_v51  ;;  %v2617_v42 = vadd.f32 %v2616_v47, %v7672_v51  ;;  %v2633_v51 = vmax.f32 %v2582_v63, 0.0  ;;  %v7805_v63 = vld [vmem:[%s6826_s29 + $0x100] sm:$0xff] }
 0x55e   : >> { %v2649_v9 = vmax.f32 %v2588_v50, 0.0  ;;  %v2650_v58 = vmax.f32 %v2617_v42, 0.0 }
 0x55f   : >> { %5668 = vmatmul.msk.f32.gmra.mxu2 %vm532_vm0, %v7710_v56  ;;  %5672 = vmatmul.msk.f32.gmra.mxu3 %vm532_vm0, %v7710_v56 }
 0x560   : >> { %2880 = vmatpush.msrb.mxu2 %v2649_v9  ;;  %2909 = vmatpush.msrb.mxu3 %v2650_v58  ;;  %v7812_v58 = vld [vmem:[%s6826_s29 + $0x108] sm:$0xff] }
 0x562   : >> { %2881 = vmatpush.msrb.mxu2 %v2641_v52  ;;  %2910 = vmatpush.msrb.mxu3 %v2642_v46  ;;  %v7819_v52 = vld [vmem:[%s6826_s29 + $0x110] sm:$0xff] }
 0x564   : >> { %2882 = vmatpush.msrb.mxu2 %v2633_v51  ;;  %2911 = vmatpush.msrb.mxu3 %v2634_v54 }
 0x566   : >> { %2883 = vmatpush.msrb.mxu2 %v2625_v59  ;;  %2912 = vmatpush.msrb.mxu3 %v2626_v5  ;;  %v7826_v5 = vld [vmem:[%s6826_s29 + $0x118] sm:$0xff] }
 0x567   : >> { %5681 = vmatmul.msk.f32.vlgmr.msrb.gmra.mxu2 %vm532_vm0, %v7689_v3  ;;  %5685 = vmatmul.msk.f32.vlgmr.msrb.gmra.mxu3 %vm532_vm0, %v7689_v3 }
 0x56f   : >> { %5682 = vmatmul.msk.f32.gmra.mxu2 %vm532_vm0, %v7696_v37  ;;  %5686 = vmatmul.msk.f32.gmra.mxu3 %vm532_vm0, %v7696_v37  ;;  %v7790_v37 = vpop.permute.xlu1 %2674 }
 0x577   : >> { %5683 = vmatmul.msk.f32.gmra.mxu2 %vm532_vm0, %v7703_v53  ;;  %5687 = vmatmul.msk.f32.gmra.mxu3 %vm532_vm0, %v7703_v53 }
 0x57f   : >> { %5684 = vmatmul.msk.f32.gmra.mxu2 %vm532_vm0, %v7710_v56  ;;  %5688 = vmatmul.msk.f32.gmra.mxu3 %vm532_vm0, %v7710_v56 }
 0x598   : >> { %v2711_v6 = vpop.f32.mrf.mxu0  ;;  %v2740_v3 = vpop.f32.mrf.mxu1 }
 0x599   : >> { %v2712_v61 = vadd.f32 %v2711_v6, %v7800_v7  ;;  %v2741_v40 = vadd.f32 %v2740_v3, %v7800_v7 }
 0x59b   : >> { %v2926_v50 = vmax.f32 %v2712_v61, 0.0  ;;  %v2927_v42 = vmax.f32 %v2741_v40, 0.0 }
 0x5a0   : >> { %v2714_v0 = vpop.f32.mrf.mxu0  ;;  %v2743_v60 = vpop.f32.mrf.mxu1 }
 0x5a1   : >> { %v2715_v36 = vadd.f32 %v2714_v0, %v7796_v8  ;;  %v2744_v62 = vadd.f32 %v2743_v60, %v7796_v8 }
 0x5a3   : >> { %v2934_v39 = vmax.f32 %v2715_v36, 0.0  ;;  %v2935_v45 = vmax.f32 %v2744_v62, 0.0 }
 0x5a8   : >> { %v2717_v57 = vpop.f32.mrf.mxu0  ;;  %v2746_v2 = vpop.f32.mrf.mxu1 }
 0x5a9   : >> { %v2718_v53 = vadd.f32 %v2717_v57, %v7790_v37  ;;  %v2747_v43 = vadd.f32 %v2746_v2, %v7790_v37 }
 0x5ab   : >> { %v2942_v34 = vmax.f32 %v2718_v53, 0.0  ;;  %v2943_v47 = vmax.f32 %v2747_v43, 0.0 }
 0x5b0   : >> { %v2720_v44 = vpop.f32.mrf.mxu0  ;;  %v2749_v4 = vpop.f32.mrf.mxu1 }
 0x5b1   : >> { %v2721_v35 = vadd.f32 %v2720_v44, %v7788_v49  ;;  %v2750_v56 = vadd.f32 %v2749_v4, %v7788_v49 }
 0x5b3   : >> { %v2950_v55 = vmax.f32 %v2721_v35, 0.0  ;;  %v2951_v1 = vmax.f32 %v2750_v56, 0.0 }
 0x5b5   : >> { %3013 = vmatpush.msra.mxu0 %v2950_v55  ;;  %3042 = vmatpush.msra.mxu1 %v2951_v1 }
 0x5b7   : >> { %3014 = vmatpush.msra.mxu0 %v2942_v34  ;;  %3043 = vmatpush.msra.mxu1 %v2943_v47 }
 0x5b9   : >> { %3015 = vmatpush.msra.mxu0 %v2934_v39  ;;  %3044 = vmatpush.msra.mxu1 %v2935_v45 }
 0x5ba   : >> { %v2827_v48 = vpop.f32.mrf.mxu0  ;;  %v2856_v9 = vpop.f32.mrf.mxu1 }
 0x5bb   : >> { %3016 = vmatpush.msra.mxu0 %v2926_v50  ;;  %3045 = vmatpush.msra.mxu1 %v2927_v42  ;;  %v2828_v36 = vadd.f32 %v2827_v48, %v7800_v7  ;;  %v2857_v62 = vadd.f32 %v2856_v9, %v7800_v7 }
 0x5bc   : >> { %5697 = vmatmul.msk.f32.vlgmr.msra.gmra.mxu0 %vm532_vm0, %v7805_v63  ;;  %5701 = vmatmul.msk.f32.vlgmr.msra.gmra.mxu1 %vm532_vm0, %v7805_v63 }
 0x5bd   : >> { %v2930_v39 = vmax.f32 %v2828_v36, 0.0  ;;  %v2931_v45 = vmax.f32 %v2857_v62, 0.0 }
 0x5c2   : >> { %v2830_v38 = vpop.f32.mrf.mxu0  ;;  %v2859_v41 = vpop.f32.mrf.mxu1 }
 0x5c3   : >> { %v2831_v53 = vadd.f32 %v2830_v38, %v7796_v8  ;;  %v2860_v43 = vadd.f32 %v2859_v41, %v7796_v8 }
 0x5c4   : >> { %5698 = vmatmul.msk.f32.gmra.mxu0 %vm532_vm0, %v7812_v58  ;;  %5702 = vmatmul.msk.f32.gmra.mxu1 %vm532_vm0, %v7812_v58 }
 0x5c5   : >> { %v2938_v61 = vmax.f32 %v2831_v53, 0.0  ;;  %v2939_v40 = vmax.f32 %v2860_v43, 0.0 }
 0x5ca   : >> { %v2769_v46 = vpop.f32.mrf.mxu2  ;;  %v2798_v51 = vpop.f32.mrf.mxu3 }
 0x5cb   : >> { %v2833_v54 = vpop.f32.mrf.mxu0  ;;  %v2862_v59 = vpop.f32.mrf.mxu1 }
 0x5cc   : >> { %5699 = vmatmul.msk.f32.gmra.mxu0 %vm532_vm0, %v7819_v52  ;;  %5703 = vmatmul.msk.f32.gmra.mxu1 %vm532_vm0, %v7819_v52  ;;  %v2834_v0 = vadd.f32 %v2833_v54, %v7790_v37  ;;  %v2863_v2 = vadd.f32 %v2862_v59, %v7790_v37 }
 0x5ce   : >> { %v2946_v55 = vmax.f32 %v2834_v0, 0.0  ;;  %v2947_v1 = vmax.f32 %v2863_v2, 0.0  ;;  %v2799_v2 = vadd.f32 %v2798_v51, %v7800_v7 }
 0x5d2   : >> { %v2772_v6 = vpop.f32.mrf.mxu2  ;;  %v2801_v3 = vpop.f32.mrf.mxu3 }
 0x5d3   : >> { %v2836_v60 = vpop.f32.mrf.mxu0  ;;  %v2865_v57 = vpop.f32.mrf.mxu1  ;;  %v2773_v0 = vadd.f32 %v2772_v6, %v7796_v8 }
 0x5d4   : >> { %v2837_v44 = vadd.f32 %v2836_v60, %v7788_v49  ;;  %v2866_v4 = vadd.f32 %v2865_v57, %v7788_v49  ;;  %5700 = vmatmul.msk.f32.gmra.mxu0 %vm532_vm0, %v7826_v5  ;;  %5704 = vmatmul.msk.f32.gmra.mxu1 %vm532_vm0, %v7826_v5  ;;  %v2802_v60 = vadd.f32 %v2801_v3, %v7796_v8 }
 0x5d5   : >> { %v2770_v57 = vadd.f32 %v2769_v46, %v7800_v7  ;;  %v2936_v53 = vmax.f32 %v2773_v0, 0.0 }
 0x5d6   : >> { %v2954_v35 = vmax.f32 %v2837_v44, 0.0  ;;  %v2955_v56 = vmax.f32 %v2866_v4, 0.0  ;;  %v2937_v43 = vmax.f32 %v2802_v60, 0.0 }
 0x5d8   : >> { %3129 = vmatpush.msrb.mxu0 %v2954_v35  ;;  %3158 = vmatpush.msrb.mxu1 %v2955_v56  ;;  %v2928_v35 = vmax.f32 %v2770_v57, 0.0  ;;  %v2929_v56 = vmax.f32 %v2799_v2, 0.0  ;;  %v7904_v2 = vpop.permute.xlu1 %2986 }
 0x5da   : >> { %3130 = vmatpush.msrb.mxu0 %v2946_v55  ;;  %3159 = vmatpush.msrb.mxu1 %v2947_v1  ;;  %v2775_v34 = vpop.f32.mrf.mxu2  ;;  %v2804_v47 = vpop.f32.mrf.mxu3 }
 0x5db   : >> { %v2776_v38 = vadd.f32 %v2775_v34, %v7790_v37  ;;  %v2805_v41 = vadd.f32 %v2804_v47, %v7790_v37 }
 0x5dc   : >> { %3131 = vmatpush.msrb.mxu0 %v2938_v61  ;;  %3160 = vmatpush.msrb.mxu1 %v2939_v40 }
 0x5dd   : >> { %v2944_v44 = vmax.f32 %v2776_v38, 0.0  ;;  %v2945_v4 = vmax.f32 %v2805_v41, 0.0 }
 0x5de   : >> { %3132 = vmatpush.msrb.mxu0 %v2930_v39  ;;  %3161 = vmatpush.msrb.mxu1 %v2931_v45 }
 0x5df   : >> { %5713 = vmatmul.msk.f32.vlgmr.msrb.gmra.mxu0 %vm532_vm0, %v7805_v63  ;;  %5717 = vmatmul.msk.f32.vlgmr.msrb.gmra.mxu1 %vm532_vm0, %v7805_v63 }
 0x5e2   : >> { %v2778_v50 = vpop.f32.mrf.mxu2  ;;  %v2807_v42 = vpop.f32.mrf.mxu3 }
 0x5e3   : >> { %v2779_v48 = vadd.f32 %v2778_v50, %v7788_v49  ;;  %v2808_v9 = vadd.f32 %v2807_v42, %v7788_v49 }
 0x5e5   : >> { %v2952_v54 = vmax.f32 %v2779_v48, 0.0  ;;  %v2953_v59 = vmax.f32 %v2808_v9, 0.0 }
 0x5e7   : >> { %5714 = vmatmul.msk.f32.gmra.mxu0 %vm532_vm0, %v7812_v58  ;;  %5718 = vmatmul.msk.f32.gmra.mxu1 %vm532_vm0, %v7812_v58 }
 0x5e8   : >> { %3071 = vmatpush.msra.mxu2 %v2952_v54  ;;  %3100 = vmatpush.msra.mxu3 %v2953_v59 }
 0x5ea   : >> { %3072 = vmatpush.msra.mxu2 %v2944_v44  ;;  %3101 = vmatpush.msra.mxu3 %v2945_v4  ;;  %v2885_v6 = vpop.f32.mrf.mxu2  ;;  %v2914_v3 = vpop.f32.mrf.mxu3 }
 0x5eb   : >> { %v2886_v48 = vadd.f32 %v2885_v6, %v7800_v7  ;;  %v7912_v6 = vpop.permute.xlu0 %2976 }
 0x5ec   : >> { %3073 = vmatpush.msra.mxu2 %v2936_v53  ;;  %3102 = vmatpush.msra.mxu3 %v2937_v43 }
 0x5ed   : >> { %v2932_v54 = vmax.f32 %v2886_v48, 0.0 }
 0x5ee   : >> { %3074 = vmatpush.msra.mxu2 %v2928_v35  ;;  %3103 = vmatpush.msra.mxu3 %v2929_v56 }
 0x5ef   : >> { %5705 = vmatmul.msk.f32.vlgmr.msra.gmra.mxu2 %vm532_vm0, %v7805_v63  ;;  %5709 = vmatmul.msk.f32.vlgmr.msra.gmra.mxu3 %vm532_vm0, %v7805_v63 }
 0x5f0   : >> { %5715 = vmatmul.msk.f32.gmra.mxu0 %vm532_vm0, %v7819_v52  ;;  %5719 = vmatmul.msk.f32.gmra.mxu1 %vm532_vm0, %v7819_v52 }
 0x5f2   : >> { %v2888_v46 = vpop.f32.mrf.mxu2  ;;  %v2917_v51 = vpop.f32.mrf.mxu3 }
 0x5f3   : >> { %v2889_v50 = vadd.f32 %v2888_v46, %v7796_v8  ;;  %v2918_v42 = vadd.f32 %v2917_v51, %v7796_v8  ;;  %v7916_v51 = vpop.permute.xlu1 %2971 }
 0x5f5   : >> { %v2941_v41 = vmax.f32 %v2918_v42, 0.0  ;;  %v7928_v42 = vld [vmem:[%s6826_s29 + $0x128] sm:$0xff] }
 0x5f7   : >> { %5706 = vmatmul.msk.f32.gmra.mxu2 %vm532_vm0, %v7812_v58  ;;  %5710 = vmatmul.msk.f32.gmra.mxu3 %vm532_vm0, %v7812_v58 }
 0x5f8   : >> { %5716 = vmatmul.msk.f32.gmra.mxu0 %vm532_vm0, %v7826_v5  ;;  %5720 = vmatmul.msk.f32.gmra.mxu1 %vm532_vm0, %v7826_v5 }
 0x5fa   : >> { %v2891_v36 = vpop.f32.mrf.mxu2  ;;  %v2920_v62 = vpop.f32.mrf.mxu3 }
 0x5fb   : >> { %v2892_v34 = vadd.f32 %v2891_v36, %v7790_v37  ;;  %v2921_v47 = vadd.f32 %v2920_v62, %v7790_v37  ;;  %v2940_v37 = vmax.f32 %v2889_v50, 0.0 }
 0x5fd   : >> { %v2948_v9 = vmax.f32 %v2892_v34, 0.0  ;;  %v2949_v38 = vmax.f32 %v2921_v47, 0.0 }
 0x5ff   : >> { %5707 = vmatmul.msk.f32.gmra.mxu2 %vm532_vm0, %v7819_v52  ;;  %5711 = vmatmul.msk.f32.gmra.mxu3 %vm532_vm0, %v7819_v52 }
 0x602   : >> { %v2894_v55 = vpop.f32.mrf.mxu2  ;;  %v2923_v1 = vpop.f32.mrf.mxu3 }
 0x603   : >> { %v2895_v61 = vadd.f32 %v2894_v55, %v7788_v49  ;;  %v2924_v40 = vadd.f32 %v2923_v1, %v7788_v49  ;;  %v2915_v49 = vadd.f32 %v2914_v3, %v7800_v7 }
 0x605   : >> { %v2956_v39 = vmax.f32 %v2895_v61, 0.0  ;;  %v2957_v45 = vmax.f32 %v2924_v40, 0.0  ;;  %v2933_v8 = vmax.f32 %v2915_v49, 0.0 }
 0x607   : >> { %5708 = vmatmul.msk.f32.gmra.mxu2 %vm532_vm0, %v7826_v5  ;;  %5712 = vmatmul.msk.f32.gmra.mxu3 %vm532_vm0, %v7826_v5 }
 0x608   : >> { %3187 = vmatpush.msrb.mxu2 %v2956_v39  ;;  %3216 = vmatpush.msrb.mxu3 %v2957_v45  ;;  %v7921_v39 = vld [vmem:[%s6826_s29 + $0x120] sm:$0xff] }
 0x60a   : >> { %3188 = vmatpush.msrb.mxu2 %v2948_v9  ;;  %3217 = vmatpush.msrb.mxu3 %v2949_v38  ;;  %v7935_v9 = vld [vmem:[%s6826_s29 + $0x130] sm:$0xff] }
 0x60c   : >> { %3189 = vmatpush.msrb.mxu2 %v2940_v37  ;;  %3218 = vmatpush.msrb.mxu3 %v2941_v41 }
 0x60e   : >> { %3190 = vmatpush.msrb.mxu2 %v2932_v54  ;;  %3219 = vmatpush.msrb.mxu3 %v2933_v8  ;;  %v7942_v8 = vld [vmem:[%s6826_s29 + $0x138] sm:$0xff] }
 0x60f   : >> { %5721 = vmatmul.msk.f32.vlgmr.msrb.gmra.mxu2 %vm532_vm0, %v7805_v63  ;;  %5725 = vmatmul.msk.f32.vlgmr.msrb.gmra.mxu3 %vm532_vm0, %v7805_v63 }
 0x617   : >> { %5722 = vmatmul.msk.f32.gmra.mxu2 %vm532_vm0, %v7812_v58  ;;  %5726 = vmatmul.msk.f32.gmra.mxu3 %vm532_vm0, %v7812_v58  ;;  %v7906_v58 = vpop.permute.xlu2 %2981 }
 0x61f   : >> { %5723 = vmatmul.msk.f32.gmra.mxu2 %vm532_vm0, %v7819_v52  ;;  %5727 = vmatmul.msk.f32.gmra.mxu3 %vm532_vm0, %v7819_v52 }
 0x627   : >> { %5724 = vmatmul.msk.f32.gmra.mxu2 %vm532_vm0, %v7826_v5  ;;  %5728 = vmatmul.msk.f32.gmra.mxu3 %vm532_vm0, %v7826_v5 }
 0x639   : >> { %v3018_v7 = vpop.f32.mrf.mxu0  ;;  %v3047_v63 = vpop.f32.mrf.mxu1 }
 0x63a   : >> { %v3019_v36 = vadd.f32 %v3018_v7, %v7916_v51  ;;  %v3048_v62 = vadd.f32 %v3047_v63, %v7916_v51 }
 0x63c   : >> { %v3233_v34 = vmax.f32 %v3019_v36, 0.0  ;;  %v3234_v47 = vmax.f32 %v3048_v62, 0.0 }
 0x641   : >> { %v3021_v59 = vpop.f32.mrf.mxu0  ;;  %v3050_v0 = vpop.f32.mrf.mxu1 }
 0x642   : >> { %v3022_v3 = vadd.f32 %v3021_v59, %v7912_v6  ;;  %v3051_v35 = vadd.f32 %v3050_v0, %v7912_v6 }
 0x644   : >> { %v3241_v61 = vmax.f32 %v3022_v3, 0.0  ;;  %v3242_v40 = vmax.f32 %v3051_v35, 0.0 }
 0x649   : >> { %v3024_v60 = vpop.f32.mrf.mxu0  ;;  %v3053_v57 = vpop.f32.mrf.mxu1 }
 0x64a   : >> { %v3025_v52 = vadd.f32 %v3024_v60, %v7906_v58  ;;  %v3054_v53 = vadd.f32 %v3053_v57, %v7906_v58 }
 0x64c   : >> { %v3249_v55 = vmax.f32 %v3025_v52, 0.0  ;;  %v3250_v1 = vmax.f32 %v3054_v53, 0.0 }
 0x651   : >> { %v3027_v44 = vpop.f32.mrf.mxu0  ;;  %v3056_v4 = vpop.f32.mrf.mxu1 }
 0x652   : >> { %v3028_v43 = vadd.f32 %v3027_v44, %v7904_v2  ;;  %v3057_v5 = vadd.f32 %v3056_v4, %v7904_v2 }
 0x654   : >> { %v3257_v56 = vmax.f32 %v3028_v43, 0.0  ;;  %v3258_v46 = vmax.f32 %v3057_v5, 0.0 }
 0x656   : >> { %3320 = vmatpush.msra.mxu0 %v3257_v56  ;;  %3349 = vmatpush.msra.mxu1 %v3258_v46 }
 0x658   : >> { %3321 = vmatpush.msra.mxu0 %v3249_v55  ;;  %3350 = vmatpush.msra.mxu1 %v3250_v1 }
 0x65a   : >> { %3322 = vmatpush.msra.mxu0 %v3241_v61  ;;  %3351 = vmatpush.msra.mxu1 %v3242_v40 }
 0x65c   : >> { %v3134_v45 = vpop.f32.mrf.mxu0  ;;  %v3163_v50 = vpop.f32.mrf.mxu1  ;;  %3323 = vmatpush.msra.mxu0 %v3233_v34  ;;  %3352 = vmatpush.msra.mxu1 %v3234_v47 }
 0x65d   : >> { %5737 = vmatmul.msk.f32.vlgmr.msra.gmra.mxu0 %vm532_vm0, %v7921_v39  ;;  %5741 = vmatmul.msk.f32.vlgmr.msra.gmra.mxu1 %vm532_vm0, %v7921_v39  ;;  %v3135_v43 = vadd.f32 %v3134_v45, %v7916_v51  ;;  %v3164_v5 = vadd.f32 %v3163_v50, %v7916_v51 }
 0x65f   : >> { %v3237_v55 = vmax.f32 %v3135_v43, 0.0  ;;  %v3238_v1 = vmax.f32 %v3164_v5, 0.0 }
 0x664   : >> { %v3137_v48 = vpop.f32.mrf.mxu0  ;;  %v3166_v49 = vpop.f32.mrf.mxu1 }
 0x665   : >> { %5738 = vmatmul.msk.f32.gmra.mxu0 %vm532_vm0, %v7928_v42  ;;  %5742 = vmatmul.msk.f32.gmra.mxu1 %vm532_vm0, %v7928_v42  ;;  %v3138_v44 = vadd.f32 %v3137_v48, %v7912_v6  ;;  %v3167_v4 = vadd.f32 %v3166_v49, %v7912_v6 }
 0x667   : >> { %v3245_v36 = vmax.f32 %v3138_v44, 0.0  ;;  %v3246_v62 = vmax.f32 %v3167_v4, 0.0 }
 0x66d   : >> { %v3140_v38 = vpop.f32.mrf.mxu0  ;;  %v3169_v37 = vpop.f32.mrf.mxu1  ;;  %5739 = vmatmul.msk.f32.gmra.mxu0 %vm532_vm0, %v7935_v9  ;;  %5743 = vmatmul.msk.f32.gmra.mxu1 %vm532_vm0, %v7935_v9 }
 0x66e   : >> { %v3141_v59 = vadd.f32 %v3140_v38, %v7906_v58  ;;  %v3170_v0 = vadd.f32 %v3169_v37, %v7906_v58 }
 0x670   : >> { %v3253_v3 = vmax.f32 %v3141_v59, 0.0  ;;  %v3254_v35 = vmax.f32 %v3170_v0, 0.0 }
 0x672   : >> { %v3076_v41 = vpop.f32.mrf.mxu2  ;;  %v3105_v54 = vpop.f32.mrf.mxu3 }
 0x673   : >> { %v3077_v59 = vadd.f32 %v3076_v41, %v7916_v51  ;;  %v3106_v0 = vadd.f32 %v3105_v54, %v7916_v51 }
 0x675   : >> { %v3143_v7 = vpop.f32.mrf.mxu0  ;;  %v3172_v63 = vpop.f32.mrf.mxu1  ;;  %5740 = vmatmul.msk.f32.gmra.mxu0 %vm532_vm0, %v7942_v8  ;;  %5744 = vmatmul.msk.f32.gmra.mxu1 %vm532_vm0, %v7942_v8  ;;  %v3235_v43 = vmax.f32 %v3077_v59, 0.0  ;;  %v3236_v5 = vmax.f32 %v3106_v0, 0.0 }
 0x676   : >> { %v3144_v60 = vadd.f32 %v3143_v7, %v7904_v2  ;;  %v3173_v57 = vadd.f32 %v3172_v63, %v7904_v2  ;;  %v8020_v0 = vpop.permute.xlu2 %3293 }
 0x678   : >> { %v3261_v52 = vmax.f32 %v3144_v60, 0.0  ;;  %v3262_v53 = vmax.f32 %v3173_v57, 0.0 }
 0x67a   : >> { %3436 = vmatpush.msrb.mxu0 %v3261_v52  ;;  %3465 = vmatpush.msrb.mxu1 %v3262_v53  ;;  %v3079_v56 = vpop.f32.mrf.mxu2  ;;  %v3108_v46 = vpop.f32.mrf.mxu3 }
 0x67b   : >> { %v3080_v7 = vadd.f32 %v3079_v56, %v7912_v6  ;;  %v3109_v63 = vadd.f32 %v3108_v46, %v7912_v6 }
 0x67c   : >> { %3437 = vmatpush.msrb.mxu0 %v3253_v3  ;;  %3466 = vmatpush.msrb.mxu1 %v3254_v35 }
 0x67d   : >> { %v3243_v44 = vmax.f32 %v3080_v7, 0.0  ;;  %v3244_v4 = vmax.f32 %v3109_v63, 0.0 }
 0x67e   : >> { %3438 = vmatpush.msrb.mxu0 %v3245_v36  ;;  %3467 = vmatpush.msrb.mxu1 %v3246_v62 }
 0x680   : >> { %3439 = vmatpush.msrb.mxu0 %v3237_v55  ;;  %3468 = vmatpush.msrb.mxu1 %v3238_v1 }
 0x681   : >> { %5753 = vmatmul.msk.f32.vlgmr.msrb.gmra.mxu0 %vm532_vm0, %v7921_v39  ;;  %5757 = vmatmul.msk.f32.vlgmr.msrb.gmra.mxu1 %vm532_vm0, %v7921_v39 }
 0x682   : >> { %v3082_v61 = vpop.f32.mrf.mxu2  ;;  %v3111_v40 = vpop.f32.mrf.mxu3 }
 0x683   : >> { %v3083_v48 = vadd.f32 %v3082_v61, %v7906_v58  ;;  %v3112_v49 = vadd.f32 %v3111_v40, %v7906_v58 }
 0x685   : >> { %v3251_v60 = vmax.f32 %v3083_v48, 0.0  ;;  %v3252_v57 = vmax.f32 %v3112_v49, 0.0 }
 0x689   : >> { %5754 = vmatmul.msk.f32.gmra.mxu0 %vm532_vm0, %v7928_v42  ;;  %5758 = vmatmul.msk.f32.gmra.mxu1 %vm532_vm0, %v7928_v42 }
 0x68a   : >> { %v3085_v34 = vpop.f32.mrf.mxu2  ;;  %v3114_v47 = vpop.f32.mrf.mxu3 }
 0x68b   : >> { %v3086_v45 = vadd.f32 %v3085_v34, %v7904_v2  ;;  %v3115_v50 = vadd.f32 %v3114_v47, %v7904_v2 }
 0x68d   : >> { %v3259_v38 = vmax.f32 %v3086_v45, 0.0  ;;  %v3260_v37 = vmax.f32 %v3115_v50, 0.0 }
 0x68f   : >> { %3378 = vmatpush.msra.mxu2 %v3259_v38  ;;  %3407 = vmatpush.msra.mxu3 %v3260_v37 }
 0x691   : >> { %5755 = vmatmul.msk.f32.gmra.mxu0 %vm532_vm0, %v7935_v9  ;;  %5759 = vmatmul.msk.f32.gmra.mxu1 %vm532_vm0, %v7935_v9 }
 0x692   : >> { %3379 = vmatpush.msra.mxu2 %v3251_v60  ;;  %3408 = vmatpush.msra.mxu3 %v3252_v57  ;;  %v3192_v52 = vpop.f32.mrf.mxu2  ;;  %v3221_v53 = vpop.f32.mrf.mxu3 }
 0x693   : >> { %v3193_v45 = vadd.f32 %v3192_v52, %v7916_v51  ;;  %v8028_v52 = vpop.permute.xlu1 %3283 }
 0x694   : >> { %3380 = vmatpush.msra.mxu2 %v3243_v44  ;;  %3409 = vmatpush.msra.mxu3 %v3244_v4 }
 0x695   : >> { %v3239_v38 = vmax.f32 %v3193_v45, 0.0 }
 0x696   : >> { %3381 = vmatpush.msra.mxu2 %v3235_v43  ;;  %3410 = vmatpush.msra.mxu3 %v3236_v5 }
 0x697   : >> { %5745 = vmatmul.msk.f32.vlgmr.msra.gmra.mxu2 %vm532_vm0, %v7921_v39  ;;  %5749 = vmatmul.msk.f32.vlgmr.msra.gmra.mxu3 %vm532_vm0, %v7921_v39 }
 0x699   : >> { %5756 = vmatmul.msk.f32.gmra.mxu0 %vm532_vm0, %v7942_v8  ;;  %5760 = vmatmul.msk.f32.gmra.mxu1 %vm532_vm0, %v7942_v8 }
 0x69a   : >> { %v3195_v41 = vpop.f32.mrf.mxu2  ;;  %v3224_v54 = vpop.f32.mrf.mxu3 }
 0x69b   : >> { %v3196_v34 = vadd.f32 %v3195_v41, %v7912_v6  ;;  %v3225_v47 = vadd.f32 %v3224_v54, %v7912_v6  ;;  %v8032_v54 = vpop.permute.xlu2 %3278 }
 0x69d   : >> { %v3248_v49 = vmax.f32 %v3225_v47, 0.0  ;;  %v8044_v47 = vld [vmem:[%s6826_s29 + $0x148] sm:$0xff] }
 0x69f   : >> { %5746 = vmatmul.msk.f32.gmra.mxu2 %vm532_vm0, %v7928_v42  ;;  %5750 = vmatmul.msk.f32.gmra.mxu3 %vm532_vm0, %v7928_v42 }
 0x6a2   : >> { %v3198_v3 = vpop.f32.mrf.mxu2  ;;  %v3227_v35 = vpop.f32.mrf.mxu3 }
 0x6a3   : >> { %v3199_v55 = vadd.f32 %v3198_v3, %v7906_v58  ;;  %v3228_v1 = vadd.f32 %v3227_v35, %v7906_v58  ;;  %v3247_v58 = vmax.f32 %v3196_v34, 0.0 }
 0x6a5   : >> { %v3255_v50 = vmax.f32 %v3199_v55, 0.0  ;;  %v3256_v48 = vmax.f32 %v3228_v1, 0.0 }
 0x6a7   : >> { %5747 = vmatmul.msk.f32.gmra.mxu2 %vm532_vm0, %v7935_v9  ;;  %5751 = vmatmul.msk.f32.gmra.mxu3 %vm532_vm0, %v7935_v9 }
 0x6aa   : >> { %v3201_v56 = vpop.f32.mrf.mxu2  ;;  %v3230_v46 = vpop.f32.mrf.mxu3 }
 0x6ab   : >> { %v3202_v36 = vadd.f32 %v3201_v56, %v7904_v2  ;;  %v3231_v62 = vadd.f32 %v3230_v46, %v7904_v2  ;;  %v3222_v2 = vadd.f32 %v3221_v53, %v7916_v51 }
 0x6ad   : >> { %v3263_v61 = vmax.f32 %v3202_v36, 0.0  ;;  %v3264_v40 = vmax.f32 %v3231_v62, 0.0  ;;  %v3240_v6 = vmax.f32 %v3222_v2, 0.0 }
 0x6af   : >> { %5748 = vmatmul.msk.f32.gmra.mxu2 %vm532_vm0, %v7942_v8  ;;  %5752 = vmatmul.msk.f32.gmra.mxu3 %vm532_vm0, %v7942_v8 }
 0x6b0   : >> { %3494 = vmatpush.msrb.mxu2 %v3263_v61  ;;  %3523 = vmatpush.msrb.mxu3 %v3264_v40  ;;  %v8037_v61 = vld [vmem:[%s6826_s29 + $0x140] sm:$0xff] }
 0x6b2   : >> { %3495 = vmatpush.msrb.mxu2 %v3255_v50  ;;  %3524 = vmatpush.msrb.mxu3 %v3256_v48  ;;  %v8051_v50 = vld [vmem:[%s6826_s29 + $0x150] sm:$0xff] }
 0x6b4   : >> { %3496 = vmatpush.msrb.mxu2 %v3247_v58  ;;  %3525 = vmatpush.msrb.mxu3 %v3248_v49  ;;  %v8058_v49 = vld [vmem:[%s6826_s29 + $0x158] sm:$0xff] }
 0x6b6   : >> { %3497 = vmatpush.msrb.mxu2 %v3239_v38  ;;  %3526 = vmatpush.msrb.mxu3 %v3240_v6 }
 0x6b7   : >> { %5761 = vmatmul.msk.f32.vlgmr.msrb.gmra.mxu2 %vm532_vm0, %v7921_v39  ;;  %5765 = vmatmul.msk.f32.vlgmr.msrb.gmra.mxu3 %vm532_vm0, %v7921_v39 }
 0x6bf   : >> { %5762 = vmatmul.msk.f32.gmra.mxu2 %vm532_vm0, %v7928_v42  ;;  %5766 = vmatmul.msk.f32.gmra.mxu3 %vm532_vm0, %v7928_v42  ;;  %v8022_v42 = vpop.permute.xlu0 %3288 }
 0x6c7   : >> { %5763 = vmatmul.msk.f32.gmra.mxu2 %vm532_vm0, %v7935_v9  ;;  %5767 = vmatmul.msk.f32.gmra.mxu3 %vm532_vm0, %v7935_v9 }
 0x6cf   : >> { %5764 = vmatmul.msk.f32.gmra.mxu2 %vm532_vm0, %v7942_v8  ;;  %5768 = vmatmul.msk.f32.gmra.mxu3 %vm532_vm0, %v7942_v8 }
 0x6da   : >> { %v3325_v51 = vpop.f32.mrf.mxu0  ;;  %v3354_v39 = vpop.f32.mrf.mxu1 }
 0x6db   : >> { %v3326_v3 = vadd.f32 %v3325_v51, %v8032_v54  ;;  %v3355_v35 = vadd.f32 %v3354_v39, %v8032_v54 }
 0x6dd   : >> { %v3540_v55 = vmax.f32 %v3326_v3, 0.0  ;;  %v3541_v1 = vmax.f32 %v3355_v35, 0.0 }
 0x6e2   : >> { %v3328_v37 = vpop.f32.mrf.mxu0  ;;  %v3357_v7 = vpop.f32.mrf.mxu1 }
 0x6e3   : >> { %v3329_v53 = vadd.f32 %v3328_v37, %v8028_v52  ;;  %v3358_v43 = vadd.f32 %v3357_v7, %v8028_v52 }
 0x6e5   : >> { %v3548_v36 = vmax.f32 %v3329_v53, 0.0  ;;  %v3549_v62 = vmax.f32 %v3358_v43, 0.0 }
 0x6ea   : >> { %v3331_v63 = vpop.f32.mrf.mxu0  ;;  %v3360_v59 = vpop.f32.mrf.mxu1 }
 0x6eb   : >> { %v3332_v9 = vadd.f32 %v3331_v63, %v8022_v42  ;;  %v3361_v44 = vadd.f32 %v3360_v59, %v8022_v42 }
 0x6ed   : >> { %v3556_v56 = vmax.f32 %v3332_v9, 0.0  ;;  %v3557_v46 = vmax.f32 %v3361_v44, 0.0 }
 0x6f2   : >> { %v3334_v60 = vpop.f32.mrf.mxu0  ;;  %v3363_v57 = vpop.f32.mrf.mxu1 }
 0x6f3   : >> { %v3335_v4 = vadd.f32 %v3334_v60, %v8020_v0  ;;  %v3364_v8 = vadd.f32 %v3363_v57, %v8020_v0 }
 0x6f5   : >> { %v3564_v5 = vmax.f32 %v3335_v4, 0.0  ;;  %v3565_v41 = vmax.f32 %v3364_v8, 0.0 }
 0x6f7   : >> { %3627 = vmatpush.msra.mxu0 %v3564_v5  ;;  %3656 = vmatpush.msra.mxu1 %v3565_v41 }
 0x6f9   : >> { %3628 = vmatpush.msra.mxu0 %v3556_v56  ;;  %3657 = vmatpush.msra.mxu1 %v3557_v46 }
 0x6fb   : >> { %3629 = vmatpush.msra.mxu0 %v3548_v36  ;;  %3658 = vmatpush.msra.mxu1 %v3549_v62 }
 0x6fd   : >> { %3630 = vmatpush.msra.mxu0 %v3540_v55  ;;  %3659 = vmatpush.msra.mxu1 %v3541_v1 }
 0x6fe   : >> { %v3441_v40 = vpop.f32.mrf.mxu0  ;;  %v3470_v34 = vpop.f32.mrf.mxu1  ;;  %5777 = vmatmul.msk.f32.vlgmr.msra.gmra.mxu0 %vm532_vm0, %v8037_v61  ;;  %5781 = vmatmul.msk.f32.vlgmr.msra.gmra.mxu1 %vm532_vm0, %v8037_v61 }
 0x6ff   : >> { %v3442_v4 = vadd.f32 %v3441_v40, %v8032_v54  ;;  %v3471_v8 = vadd.f32 %v3470_v34, %v8032_v54 }
 0x701   : >> { %v3544_v3 = vmax.f32 %v3442_v4, 0.0  ;;  %v3545_v35 = vmax.f32 %v3471_v8, 0.0 }
 0x706   : >> { %v3444_v45 = vpop.f32.mrf.mxu0  ;;  %v3473_v2 = vpop.f32.mrf.mxu1  ;;  %5778 = vmatmul.msk.f32.gmra.mxu0 %vm532_vm0, %v8044_v47  ;;  %5782 = vmatmul.msk.f32.gmra.mxu1 %vm532_vm0, %v8044_v47 }
 0x707   : >> { %v3445_v63 = vadd.f32 %v3444_v45, %v8028_v52  ;;  %v3474_v59 = vadd.f32 %v3473_v2, %v8028_v52 }
 0x709   : >> { %v3552_v5 = vmax.f32 %v3445_v63, 0.0  ;;  %v3553_v41 = vmax.f32 %v3474_v59, 0.0 }
 0x70e   : >> { %v3447_v48 = vpop.f32.mrf.mxu0  ;;  %v3476_v58 = vpop.f32.mrf.mxu1  ;;  %5779 = vmatmul.msk.f32.gmra.mxu0 %vm532_vm0, %v8051_v50  ;;  %5783 = vmatmul.msk.f32.gmra.mxu1 %vm532_vm0, %v8051_v50 }
 0x70f   : >> { %v3448_v51 = vadd.f32 %v3447_v48, %v8022_v42  ;;  %v3477_v39 = vadd.f32 %v3476_v58, %v8022_v42 }
 0x711   : >> { %v3560_v53 = vmax.f32 %v3448_v51, 0.0  ;;  %v3561_v43 = vmax.f32 %v3477_v39, 0.0 }
 0x716   : >> { %v3450_v38 = vpop.f32.mrf.mxu0  ;;  %v3479_v6 = vpop.f32.mrf.mxu1  ;;  %5780 = vmatmul.msk.f32.gmra.mxu0 %vm532_vm0, %v8058_v49  ;;  %5784 = vmatmul.msk.f32.gmra.mxu1 %vm532_vm0, %v8058_v49 }
 0x717   : >> { %v3451_v37 = vadd.f32 %v3450_v38, %v8020_v0  ;;  %v3480_v7 = vadd.f32 %v3479_v6, %v8020_v0 }
 0x719   : >> { %v3568_v60 = vmax.f32 %v3451_v37, 0.0  ;;  %v3569_v57 = vmax.f32 %v3480_v7, 0.0 }
 0x71a   : >> { %v3383_v9 = vpop.f32.mrf.mxu2  ;;  %v3412_v44 = vpop.f32.mrf.mxu3 }
 0x71b   : >> { %3743 = vmatpush.msrb.mxu0 %v3568_v60  ;;  %3772 = vmatpush.msrb.mxu1 %v3569_v57  ;;  %v3384_v51 = vadd.f32 %v3383_v9, %v8032_v54  ;;  %v3413_v39 = vadd.f32 %v3412_v44, %v8032_v54 }
 0x71d   : >> { %3744 = vmatpush.msrb.mxu0 %v3560_v53  ;;  %3773 = vmatpush.msrb.mxu1 %v3561_v43  ;;  %v3542_v4 = vmax.f32 %v3384_v51, 0.0  ;;  %v3543_v9 = vmax.f32 %v3413_v39, 0.0  ;;  %v8136_v39 = vpop.permute.xlu0 %3600 }
 0x71f   : >> { %3745 = vmatpush.msrb.mxu0 %v3552_v5  ;;  %3774 = vmatpush.msrb.mxu1 %v3553_v41 }
 0x721   : >> { %3746 = vmatpush.msrb.mxu0 %v3544_v3  ;;  %3775 = vmatpush.msrb.mxu1 %v3545_v35 }
 0x722   : >> { %v3386_v56 = vpop.f32.mrf.mxu2  ;;  %v3415_v46 = vpop.f32.mrf.mxu3  ;;  %5793 = vmatmul.msk.f32.vlgmr.msrb.gmra.mxu0 %vm532_vm0, %v8037_v61  ;;  %5797 = vmatmul.msk.f32.vlgmr.msrb.gmra.mxu1 %vm532_vm0, %v8037_v61 }
 0x723   : >> { %v3387_v48 = vadd.f32 %v3386_v56, %v8028_v52  ;;  %v3416_v58 = vadd.f32 %v3415_v46, %v8028_v52 }
 0x725   : >> { %v3550_v63 = vmax.f32 %v3387_v48, 0.0  ;;  %v3551_v59 = vmax.f32 %v3416_v58, 0.0 }
 0x72a   : >> { %v3389_v36 = vpop.f32.mrf.mxu2  ;;  %v3418_v62 = vpop.f32.mrf.mxu3  ;;  %5794 = vmatmul.msk.f32.gmra.mxu0 %vm532_vm0, %v8044_v47  ;;  %5798 = vmatmul.msk.f32.gmra.mxu1 %vm532_vm0, %v8044_v47 }
 0x72b   : >> { %v3390_v40 = vadd.f32 %v3389_v36, %v8022_v42  ;;  %v3419_v34 = vadd.f32 %v3418_v62, %v8022_v42 }
 0x72d   : >> { %v3558_v37 = vmax.f32 %v3390_v40, 0.0  ;;  %v3559_v7 = vmax.f32 %v3419_v34, 0.0 }
 0x732   : >> { %v3392_v55 = vpop.f32.mrf.mxu2  ;;  %v3421_v1 = vpop.f32.mrf.mxu3  ;;  %5795 = vmatmul.msk.f32.gmra.mxu0 %vm532_vm0, %v8051_v50  ;;  %5799 = vmatmul.msk.f32.gmra.mxu1 %vm532_vm0, %v8051_v50 }
 0x733   : >> { %v3393_v45 = vadd.f32 %v3392_v55, %v8020_v0  ;;  %v3422_v2 = vadd.f32 %v3421_v1, %v8020_v0 }
 0x735   : >> { %v3566_v38 = vmax.f32 %v3393_v45, 0.0  ;;  %v3567_v6 = vmax.f32 %v3422_v2, 0.0 }
 0x737   : >> { %3685 = vmatpush.msra.mxu2 %v3566_v38  ;;  %3714 = vmatpush.msra.mxu3 %v3567_v6 }
 0x739   : >> { %3686 = vmatpush.msra.mxu2 %v3558_v37  ;;  %3715 = vmatpush.msra.mxu3 %v3559_v7 }
 0x73a   : >> { %v3499_v60 = vpop.f32.mrf.mxu2  ;;  %v3528_v57 = vpop.f32.mrf.mxu3  ;;  %5796 = vmatmul.msk.f32.gmra.mxu0 %vm532_vm0, %v8058_v49  ;;  %5800 = vmatmul.msk.f32.gmra.mxu1 %vm532_vm0, %v8058_v49 }
 0x73b   : >> { %3687 = vmatpush.msra.mxu2 %v3550_v63  ;;  %3716 = vmatpush.msra.mxu3 %v3551_v59  ;;  %v3500_v40 = vadd.f32 %v3499_v60, %v8032_v54  ;;  %v8144_v60 = vpop.permute.xlu2 %3590 }
 0x73d   : >> { %3688 = vmatpush.msra.mxu2 %v3542_v4  ;;  %3717 = vmatpush.msra.mxu3 %v3543_v9 }
 0x73e   : >> { %5785 = vmatmul.msk.f32.vlgmr.msra.gmra.mxu2 %vm532_vm0, %v8037_v61  ;;  %5789 = vmatmul.msk.f32.vlgmr.msra.gmra.mxu3 %vm532_vm0, %v8037_v61 }
 0x742   : >> { %v3502_v44 = vpop.f32.mrf.mxu2  ;;  %v3531_v8 = vpop.f32.mrf.mxu3 }
 0x743   : >> { %v3503_v36 = vadd.f32 %v3502_v44, %v8028_v52  ;;  %v3532_v62 = vadd.f32 %v3531_v8, %v8028_v52  ;;  %v3546_v52 = vmax.f32 %v3500_v40, 0.0  ;;  %v8148_v8 = vpop.permute.xlu0 %3585 }
 0x745   : >> { %v3555_v2 = vmax.f32 %v3532_v62, 0.0 }
 0x746   : >> { %5786 = vmatmul.msk.f32.gmra.mxu2 %vm532_vm0, %v8044_v47  ;;  %5790 = vmatmul.msk.f32.gmra.mxu3 %vm532_vm0, %v8044_v47 }
 0x74a   : >> { %v3505_v53 = vpop.f32.mrf.mxu2  ;;  %v3534_v43 = vpop.f32.mrf.mxu3 }
 0x74b   : >> { %v3506_v3 = vadd.f32 %v3505_v53, %v8022_v42  ;;  %v3535_v35 = vadd.f32 %v3534_v43, %v8022_v42  ;;  %v3529_v42 = vadd.f32 %v3528_v57, %v8032_v54 }
 0x74d   : >> { %v3562_v34 = vmax.f32 %v3506_v3, 0.0  ;;  %v3563_v45 = vmax.f32 %v3535_v35, 0.0  ;;  %v3547_v48 = vmax.f32 %v3529_v42, 0.0 }
 0x74e   : >> { %5787 = vmatmul.msk.f32.gmra.mxu2 %vm532_vm0, %v8051_v50  ;;  %5791 = vmatmul.msk.f32.gmra.mxu3 %vm532_vm0, %v8051_v50 }
 0x752   : >> { %v3508_v5 = vpop.f32.mrf.mxu2  ;;  %v3537_v41 = vpop.f32.mrf.mxu3 }
 0x753   : >> { %v3509_v56 = vadd.f32 %v3508_v5, %v8020_v0  ;;  %v3538_v46 = vadd.f32 %v3537_v41, %v8020_v0  ;;  %v3554_v0 = vmax.f32 %v3503_v36, 0.0  ;;  %v8153_v36 = vld [vmem:[%s6826_s29 + $0x160] sm:$0xff] }
 0x755   : >> { %v3570_v55 = vmax.f32 %v3509_v56, 0.0  ;;  %v3571_v1 = vmax.f32 %v3538_v46, 0.0 }
 0x756   : >> { %5788 = vmatmul.msk.f32.gmra.mxu2 %vm532_vm0, %v8058_v49  ;;  %5792 = vmatmul.msk.f32.gmra.mxu3 %vm532_vm0, %v8058_v49 }
 0x757   : >> { %3801 = vmatpush.msrb.mxu2 %v3570_v55  ;;  %3830 = vmatpush.msrb.mxu3 %v3571_v1  ;;  %v8160_v1 = vld [vmem:[%s6826_s29 + $0x168] sm:$0xff] }
 0x759   : >> { %3802 = vmatpush.msrb.mxu2 %v3562_v34  ;;  %3831 = vmatpush.msrb.mxu3 %v3563_v45  ;;  %v8167_v34 = vld [vmem:[%s6826_s29 + $0x170] sm:$0xff] }
 0x75b   : >> { %3803 = vmatpush.msrb.mxu2 %v3554_v0  ;;  %3832 = vmatpush.msrb.mxu3 %v3555_v2  ;;  %v8174_v2 = vld [vmem:[%s6826_s29 + $0x178] sm:$0xff] }
 0x75d   : >> { %3804 = vmatpush.msrb.mxu2 %v3546_v52  ;;  %3833 = vmatpush.msrb.mxu3 %v3547_v48 }
 0x75e   : >> { %5801 = vmatmul.msk.f32.vlgmr.msrb.gmra.mxu2 %vm532_vm0, %v8037_v61  ;;  %5805 = vmatmul.msk.f32.vlgmr.msrb.gmra.mxu3 %vm532_vm0, %v8037_v61 }
 0x766   : >> { %5802 = vmatmul.msk.f32.gmra.mxu2 %vm532_vm0, %v8044_v47  ;;  %5806 = vmatmul.msk.f32.gmra.mxu3 %vm532_vm0, %v8044_v47  ;;  %v8138_v47 = vpop.permute.xlu1 %3595 }
 0x76e   : >> { %5803 = vmatmul.msk.f32.gmra.mxu2 %vm532_vm0, %v8051_v50  ;;  %5807 = vmatmul.msk.f32.gmra.mxu3 %vm532_vm0, %v8051_v50 }
 0x776   : >> { %5804 = vmatmul.msk.f32.gmra.mxu2 %vm532_vm0, %v8058_v49  ;;  %5808 = vmatmul.msk.f32.gmra.mxu3 %vm532_vm0, %v8058_v49 }
 0x77b   : >> { %v3632_v54 = vpop.f32.mrf.mxu0  ;;  %v3661_v61 = vpop.f32.mrf.mxu1 }
 0x77c   : >> { %v3633_v53 = vadd.f32 %v3632_v54, %v8148_v8  ;;  %v3662_v43 = vadd.f32 %v3661_v61, %v8148_v8 }
 0x77e   : >> { %v3847_v56 = vmax.f32 %v3633_v53, 0.0  ;;  %v3848_v46 = vmax.f32 %v3662_v43, 0.0 }
 0x783   : >> { %v3635_v58 = vpop.f32.mrf.mxu0  ;;  %v3664_v38 = vpop.f32.mrf.mxu1 }
 0x784   : >> { %v3636_v57 = vadd.f32 %v3635_v58, %v8144_v60  ;;  %v3665_v4 = vadd.f32 %v3664_v38, %v8144_v60 }
 0x786   : >> { %v3855_v3 = vmax.f32 %v3636_v57, 0.0  ;;  %v3856_v35 = vmax.f32 %v3665_v4, 0.0 }
 0x78b   : >> { %v3638_v6 = vpop.f32.mrf.mxu0  ;;  %v3667_v51 = vpop.f32.mrf.mxu1 }
 0x78c   : >> { %v3639_v50 = vadd.f32 %v3638_v6, %v8138_v47  ;;  %v3668_v63 = vadd.f32 %v3667_v51, %v8138_v47 }
 0x78e   : >> { %v3863_v5 = vmax.f32 %v3639_v50, 0.0  ;;  %v3864_v41 = vmax.f32 %v3668_v63, 0.0 }
 0x793   : >> { %v3641_v37 = vpop.f32.mrf.mxu0  ;;  %v3670_v7 = vpop.f32.mrf.mxu1 }
 0x794   : >> { %v3642_v59 = vadd.f32 %v3641_v37, %v8136_v39  ;;  %v3671_v49 = vadd.f32 %v3670_v7, %v8136_v39 }
 0x796   : >> { %v3871_v9 = vmax.f32 %v3642_v59, 0.0  ;;  %v3872_v44 = vmax.f32 %v3671_v49, 0.0 }
 0x798   : >> { %3934 = vmatpush.msra.mxu0 %v3871_v9  ;;  %3963 = vmatpush.msra.mxu1 %v3872_v44 }
 0x79a   : >> { %3935 = vmatpush.msra.mxu0 %v3863_v5  ;;  %3964 = vmatpush.msra.mxu1 %v3864_v41 }
 0x79c   : >> { %3936 = vmatpush.msra.mxu0 %v3855_v3  ;;  %3965 = vmatpush.msra.mxu1 %v3856_v35 }
 0x79e   : >> { %3937 = vmatpush.msra.mxu0 %v3847_v56  ;;  %3966 = vmatpush.msra.mxu1 %v3848_v46 }
 0x79f   : >> { %v3748_v62 = vpop.f32.mrf.mxu0  ;;  %v3777_v55 = vpop.f32.mrf.mxu1  ;;  %5817 = vmatmul.msk.f32.vlgmr.msra.gmra.mxu0 %vm532_vm0, %v8153_v36  ;;  %5821 = vmatmul.msk.f32.vlgmr.msra.gmra.mxu1 %vm532_vm0, %v8153_v36 }
 0x7a0   : >> { %v3749_v50 = vadd.f32 %v3748_v62, %v8148_v8  ;;  %v3778_v63 = vadd.f32 %v3777_v55, %v8148_v8 }
 0x7a2   : >> { %v3851_v9 = vmax.f32 %v3749_v50, 0.0  ;;  %v3852_v44 = vmax.f32 %v3778_v63, 0.0 }
 0x7a7   : >> { %v3751_v40 = vpop.f32.mrf.mxu0  ;;  %v3780_v42 = vpop.f32.mrf.mxu1  ;;  %5818 = vmatmul.msk.f32.gmra.mxu0 %vm532_vm0, %v8160_v1  ;;  %5822 = vmatmul.msk.f32.gmra.mxu1 %vm532_vm0, %v8160_v1 }
 0x7a8   : >> { %v3752_v6 = vadd.f32 %v3751_v40, %v8144_v60  ;;  %v3781_v51 = vadd.f32 %v3780_v42, %v8144_v60 }
 0x7aa   : >> { %v3859_v57 = vmax.f32 %v3752_v6, 0.0  ;;  %v3860_v4 = vmax.f32 %v3781_v51, 0.0 }
 0x7af   : >> { %v3754_v45 = vpop.f32.mrf.mxu0  ;;  %v3783_v0 = vpop.f32.mrf.mxu1  ;;  %5819 = vmatmul.msk.f32.gmra.mxu0 %vm532_vm0, %v8167_v34  ;;  %5823 = vmatmul.msk.f32.gmra.mxu1 %vm532_vm0, %v8167_v34 }
 0x7b0   : >> { %v3755_v54 = vadd.f32 %v3754_v45, %v8138_v47  ;;  %v3784_v61 = vadd.f32 %v3783_v0, %v8138_v47 }
 0x7b2   : >> { %v3867_v59 = vmax.f32 %v3755_v54, 0.0  ;;  %v3868_v49 = vmax.f32 %v3784_v61, 0.0 }
 0x7b7   : >> { %v3757_v52 = vpop.f32.mrf.mxu0  ;;  %v3786_v48 = vpop.f32.mrf.mxu1  ;;  %5820 = vmatmul.msk.f32.gmra.mxu0 %vm532_vm0, %v8174_v2  ;;  %5824 = vmatmul.msk.f32.gmra.mxu1 %vm532_vm0, %v8174_v2 }
 0x7b8   : >> { %v3758_v58 = vadd.f32 %v3757_v52, %v8136_v39  ;;  %v3787_v38 = vadd.f32 %v3786_v48, %v8136_v39 }
 0x7ba   : >> { %v3875_v37 = vmax.f32 %v3758_v58, 0.0  ;;  %v3876_v7 = vmax.f32 %v3787_v38, 0.0 }
 0x7bc   : >> { %4050 = vmatpush.msrb.mxu0 %v3875_v37  ;;  %4079 = vmatpush.msrb.mxu1 %v3876_v7 }
 0x7be   : >> { %4051 = vmatpush.msrb.mxu0 %v3867_v59  ;;  %4080 = vmatpush.msrb.mxu1 %v3868_v49 }
 0x7c0   : >> { %4052 = vmatpush.msrb.mxu0 %v3859_v57  ;;  %4081 = vmatpush.msrb.mxu1 %v3860_v4 }
 0x7c1   : >> { %v3690_v53 = vpop.f32.mrf.mxu2  ;;  %v3719_v43 = vpop.f32.mrf.mxu3 }
 0x7c2   : >> { %4053 = vmatpush.msrb.mxu0 %v3851_v9  ;;  %4082 = vmatpush.msrb.mxu1 %v3852_v44  ;;  %v3691_v54 = vadd.f32 %v3690_v53, %v8148_v8  ;;  %v3720_v61 = vadd.f32 %v3719_v43, %v8148_v8 }
 0x7c3   : >> { %5833 = vmatmul.msk.f32.vlgmr.msrb.gmra.mxu0 %vm532_vm0, %v8153_v36  ;;  %5837 = vmatmul.msk.f32.vlgmr.msrb.gmra.mxu1 %vm532_vm0, %v8153_v36 }
 0x7c4   : >> { %v3849_v50 = vmax.f32 %v3691_v54, 0.0  ;;  %v3850_v63 = vmax.f32 %v3720_v61, 0.0  ;;  %v8252_v61 = vpop.permute.xlu1 %3907 }
 0x7c9   : >> { %v3693_v5 = vpop.f32.mrf.mxu2  ;;  %v3722_v41 = vpop.f32.mrf.mxu3 }
 0x7ca   : >> { %v3694_v45 = vadd.f32 %v3693_v5, %v8144_v60  ;;  %v3723_v0 = vadd.f32 %v3722_v41, %v8144_v60 }
 0x7cb   : >> { %5834 = vmatmul.msk.f32.gmra.mxu0 %vm532_vm0, %v8160_v1  ;;  %5838 = vmatmul.msk.f32.gmra.mxu1 %vm532_vm0, %v8160_v1 }
 0x7cc   : >> { %v3857_v6 = vmax.f32 %v3694_v45, 0.0  ;;  %v3858_v51 = vmax.f32 %v3723_v0, 0.0 }
 0x7d1   : >> { %v3696_v3 = vpop.f32.mrf.mxu2  ;;  %v3725_v35 = vpop.f32.mrf.mxu3 }
 0x7d2   : >> { %v3697_v62 = vadd.f32 %v3696_v3, %v8138_v47  ;;  %v3726_v55 = vadd.f32 %v3725_v35, %v8138_v47 }
 0x7d3   : >> { %5835 = vmatmul.msk.f32.gmra.mxu0 %vm532_vm0, %v8167_v34  ;;  %5839 = vmatmul.msk.f32.gmra.mxu1 %vm532_vm0, %v8167_v34 }
 0x7d4   : >> { %v3865_v58 = vmax.f32 %v3697_v62, 0.0  ;;  %v3866_v38 = vmax.f32 %v3726_v55, 0.0 }
 0x7d9   : >> { %v3699_v56 = vpop.f32.mrf.mxu2  ;;  %v3728_v46 = vpop.f32.mrf.mxu3 }
 0x7da   : >> { %v3700_v40 = vadd.f32 %v3699_v56, %v8136_v39  ;;  %v3729_v42 = vadd.f32 %v3728_v46, %v8136_v39 }
 0x7db   : >> { %5836 = vmatmul.msk.f32.gmra.mxu0 %vm532_vm0, %v8174_v2  ;;  %5840 = vmatmul.msk.f32.gmra.mxu1 %vm532_vm0, %v8174_v2 }
 0x7dc   : >> { %v3873_v52 = vmax.f32 %v3700_v40, 0.0  ;;  %v3874_v48 = vmax.f32 %v3729_v42, 0.0 }
 0x7de   : >> { %3992 = vmatpush.msra.mxu2 %v3873_v52  ;;  %4021 = vmatpush.msra.mxu3 %v3874_v48 }
 0x7e0   : >> { %3993 = vmatpush.msra.mxu2 %v3865_v58  ;;  %4022 = vmatpush.msra.mxu3 %v3866_v38 }
 0x7e1   : >> { %v3806_v37 = vpop.f32.mrf.mxu2  ;;  %v3835_v7 = vpop.f32.mrf.mxu3 }
 0x7e2   : >> { %3994 = vmatpush.msra.mxu2 %v3857_v6  ;;  %4023 = vmatpush.msra.mxu3 %v3858_v51  ;;  %v3807_v62 = vadd.f32 %v3806_v37, %v8148_v8 }
 0x7e4   : >> { %3995 = vmatpush.msra.mxu2 %v3849_v50  ;;  %4024 = vmatpush.msra.mxu3 %v3850_v63 }
 0x7e5   : >> { %5825 = vmatmul.msk.f32.vlgmr.msra.gmra.mxu2 %vm532_vm0, %v8153_v36  ;;  %5829 = vmatmul.msk.f32.vlgmr.msra.gmra.mxu3 %vm532_vm0, %v8153_v36 }
 0x7e9   : >> { %v3809_v59 = vpop.f32.mrf.mxu2  ;;  %v3838_v49 = vpop.f32.mrf.mxu3 }
 0x7ea   : >> { %v3810_v3 = vadd.f32 %v3809_v59, %v8144_v60  ;;  %v3839_v35 = vadd.f32 %v3838_v49, %v8144_v60  ;;  %v3853_v60 = vmax.f32 %v3807_v62, 0.0  ;;  %v8264_v49 = vpop.permute.xlu1 %3892 }
 0x7ec   : >> { %v3862_v42 = vmax.f32 %v3839_v35, 0.0 }
 0x7ed   : >> { %5826 = vmatmul.msk.f32.gmra.mxu2 %vm532_vm0, %v8160_v1  ;;  %5830 = vmatmul.msk.f32.gmra.mxu3 %vm532_vm0, %v8160_v1 }
 0x7f1   : >> { %v3812_v57 = vpop.f32.mrf.mxu2  ;;  %v3841_v4 = vpop.f32.mrf.mxu3 }
 0x7f2   : >> { %v3813_v53 = vadd.f32 %v3812_v57, %v8138_v47  ;;  %v3842_v43 = vadd.f32 %v3841_v4, %v8138_v47  ;;  %v3836_v47 = vadd.f32 %v3835_v7, %v8148_v8  ;;  %v8260_v7 = vpop.permute.xlu0 %3897 }
 0x7f4   : >> { %v3869_v55 = vmax.f32 %v3813_v53, 0.0  ;;  %v3870_v40 = vmax.f32 %v3842_v43, 0.0  ;;  %v3854_v45 = vmax.f32 %v3836_v47, 0.0 }
 0x7f5   : >> { %5827 = vmatmul.msk.f32.gmra.mxu2 %vm532_vm0, %v8167_v34  ;;  %5831 = vmatmul.msk.f32.gmra.mxu3 %vm532_vm0, %v8167_v34 }
 0x7f9   : >> { %v3815_v9 = vpop.f32.mrf.mxu2  ;;  %v3844_v44 = vpop.f32.mrf.mxu3 }
 0x7fa   : >> { %v3816_v5 = vadd.f32 %v3815_v9, %v8136_v39  ;;  %v3845_v41 = vadd.f32 %v3844_v44, %v8136_v39  ;;  %v3861_v39 = vmax.f32 %v3810_v3, 0.0  ;;  %v8269_v3 = vld [vmem:[%s6826_s29 + $0x180] sm:$0xff] }
 0x7fc   : >> { %v3877_v56 = vmax.f32 %v3816_v5, 0.0  ;;  %v3878_v46 = vmax.f32 %v3845_v41, 0.0 }
 0x7fd   : >> { %5828 = vmatmul.msk.f32.gmra.mxu2 %vm532_vm0, %v8174_v2  ;;  %5832 = vmatmul.msk.f32.gmra.mxu3 %vm532_vm0, %v8174_v2 }
 0x7fe   : >> { %4108 = vmatpush.msrb.mxu2 %v3877_v56  ;;  %4137 = vmatpush.msrb.mxu3 %v3878_v46  ;;  %v8276_v46 = vld [vmem:[%s6826_s29 + $0x188] sm:$0xff] }
 0x800   : >> { %4109 = vmatpush.msrb.mxu2 %v3869_v55  ;;  %4138 = vmatpush.msrb.mxu3 %v3870_v40  ;;  %v8283_v55 = vld [vmem:[%s6826_s29 + $0x190] sm:$0xff] }
 0x802   : >> { %4110 = vmatpush.msrb.mxu2 %v3861_v39  ;;  %4139 = vmatpush.msrb.mxu3 %v3862_v42  ;;  %v8290_v42 = vld [vmem:[%s6826_s29 + $0x198] sm:$0xff] }
 0x804   : >> { %4111 = vmatpush.msrb.mxu2 %v3853_v60  ;;  %4140 = vmatpush.msrb.mxu3 %v3854_v45 }
 0x805   : >> { %5841 = vmatmul.msk.f32.vlgmr.msrb.gmra.mxu2 %vm532_vm0, %v8153_v36  ;;  %5845 = vmatmul.msk.f32.vlgmr.msrb.gmra.mxu3 %vm532_vm0, %v8153_v36 }
 0x80d   : >> { %5842 = vmatmul.msk.f32.gmra.mxu2 %vm532_vm0, %v8160_v1  ;;  %5846 = vmatmul.msk.f32.gmra.mxu3 %vm532_vm0, %v8160_v1  ;;  %v8254_v1 = vpop.permute.xlu2 %3902 }
 0x815   : >> { %5843 = vmatmul.msk.f32.gmra.mxu2 %vm532_vm0, %v8167_v34  ;;  %5847 = vmatmul.msk.f32.gmra.mxu3 %vm532_vm0, %v8167_v34 }
 0x81c   : >> { %v3939_v8 = vpop.f32.mrf.mxu0  ;;  %v3968_v0 = vpop.f32.mrf.mxu1 }
 0x81d   : >> { %5844 = vmatmul.msk.f32.gmra.mxu2 %vm532_vm0, %v8174_v2  ;;  %5848 = vmatmul.msk.f32.gmra.mxu3 %vm532_vm0, %v8174_v2  ;;  %v3940_v57 = vadd.f32 %v3939_v8, %v8264_v49  ;;  %v3969_v4 = vadd.f32 %v3968_v0, %v8264_v49 }
 0x81f   : >> { %v4154_v5 = vmax.f32 %v3940_v57, 0.0  ;;  %v4155_v41 = vmax.f32 %v3969_v4, 0.0 }
 0x824   : >> { %v3942_v36 = vpop.f32.mrf.mxu0  ;;  %v3971_v52 = vpop.f32.mrf.mxu1 }
 0x825   : >> { %v3943_v2 = vadd.f32 %v3942_v36, %v8260_v7  ;;  %v3972_v50 = vadd.f32 %v3971_v52, %v8260_v7 }
 0x827   : >> { %v4162_v53 = vmax.f32 %v3943_v2, 0.0  ;;  %v4163_v43 = vmax.f32 %v3972_v50, 0.0 }
 0x82c   : >> { %v3945_v48 = vpop.f32.mrf.mxu0  ;;  %v3974_v54 = vpop.f32.mrf.mxu1 }
 0x82d   : >> { %v3946_v34 = vadd.f32 %v3945_v48, %v8254_v1  ;;  %v3975_v6 = vadd.f32 %v3974_v54, %v8254_v1 }
 0x82f   : >> { %v4170_v9 = vmax.f32 %v3946_v34, 0.0  ;;  %v4171_v44 = vmax.f32 %v3975_v6, 0.0 }
 0x834   : >> { %v3948_v58 = vpop.f32.mrf.mxu0  ;;  %v3977_v38 = vpop.f32.mrf.mxu1 }
 0x835   : >> { %v3949_v51 = vadd.f32 %v3948_v58, %v8252_v61  ;;  %v3978_v37 = vadd.f32 %v3977_v38, %v8252_v61 }
 0x837   : >> { %v4178_v63 = vmax.f32 %v3949_v51, 0.0  ;;  %v4179_v59 = vmax.f32 %v3978_v37, 0.0 }
 0x839   : >> { %4241 = vmatpush.msra.mxu0 %v4178_v63  ;;  %4270 = vmatpush.msra.mxu1 %v4179_v59 }
 0x83b   : >> { %4242 = vmatpush.msra.mxu0 %v4170_v9  ;;  %4271 = vmatpush.msra.mxu1 %v4171_v44 }
 0x83d   : >> { %4243 = vmatpush.msra.mxu0 %v4162_v53  ;;  %4272 = vmatpush.msra.mxu1 %v4163_v43 }
 0x83f   : >> { %4244 = vmatpush.msra.mxu0 %v4154_v5  ;;  %4273 = vmatpush.msra.mxu1 %v4155_v41 }
 0x840   : >> { %v4055_v35 = vpop.f32.mrf.mxu0  ;;  %v4084_v56 = vpop.f32.mrf.mxu1  ;;  %5857 = vmatmul.msk.f32.vlgmr.msra.gmra.mxu0 %vm532_vm0, %v8269_v3  ;;  %5861 = vmatmul.msk.f32.vlgmr.msra.gmra.mxu1 %vm532_vm0, %v8269_v3 }
 0x841   : >> { %v4056_v34 = vadd.f32 %v4055_v35, %v8264_v49  ;;  %v4085_v6 = vadd.f32 %v4084_v56, %v8264_v49 }
 0x843   : >> { %v4158_v63 = vmax.f32 %v4056_v34, 0.0  ;;  %v4159_v59 = vmax.f32 %v4085_v6, 0.0 }
 0x848   : >> { %v4058_v62 = vpop.f32.mrf.mxu0  ;;  %v4087_v47 = vpop.f32.mrf.mxu1  ;;  %5858 = vmatmul.msk.f32.gmra.mxu0 %vm532_vm0, %v8276_v46  ;;  %5862 = vmatmul.msk.f32.gmra.mxu1 %vm532_vm0, %v8276_v46 }
 0x849   : >> { %v4059_v48 = vadd.f32 %v4058_v62, %v8260_v7  ;;  %v4088_v54 = vadd.f32 %v4087_v47, %v8260_v7 }
 0x84b   : >> { %v4166_v2 = vmax.f32 %v4059_v48, 0.0  ;;  %v4167_v50 = vmax.f32 %v4088_v54, 0.0 }
 0x850   : >> { %v4061_v40 = vpop.f32.mrf.mxu0  ;;  %v4090_v39 = vpop.f32.mrf.mxu1  ;;  %5859 = vmatmul.msk.f32.gmra.mxu0 %vm532_vm0, %v8283_v55  ;;  %5863 = vmatmul.msk.f32.gmra.mxu1 %vm532_vm0, %v8283_v55 }
 0x851   : >> { %v4062_v8 = vadd.f32 %v4061_v40, %v8254_v1  ;;  %v4091_v0 = vadd.f32 %v4090_v39, %v8254_v1 }
 0x853   : >> { %v4174_v51 = vmax.f32 %v4062_v8, 0.0  ;;  %v4175_v37 = vmax.f32 %v4091_v0, 0.0 }
 0x858   : >> { %v4064_v60 = vpop.f32.mrf.mxu0  ;;  %v4093_v45 = vpop.f32.mrf.mxu1  ;;  %5860 = vmatmul.msk.f32.gmra.mxu0 %vm532_vm0, %v8290_v42  ;;  %5864 = vmatmul.msk.f32.gmra.mxu1 %vm532_vm0, %v8290_v42 }
 0x859   : >> { %v4065_v36 = vadd.f32 %v4064_v60, %v8252_v61  ;;  %v4094_v52 = vadd.f32 %v4093_v45, %v8252_v61 }
 0x85b   : >> { %v4182_v58 = vmax.f32 %v4065_v36, 0.0  ;;  %v4183_v38 = vmax.f32 %v4094_v52, 0.0 }
 0x85d   : >> { %4357 = vmatpush.msrb.mxu0 %v4182_v58  ;;  %4386 = vmatpush.msrb.mxu1 %v4183_v38 }
 0x85f   : >> { %4358 = vmatpush.msrb.mxu0 %v4174_v51  ;;  %4387 = vmatpush.msrb.mxu1 %v4175_v37 }
 0x861   : >> { %4359 = vmatpush.msrb.mxu0 %v4166_v2  ;;  %4388 = vmatpush.msrb.mxu1 %v4167_v50 }
 0x863   : >> { %4360 = vmatpush.msrb.mxu0 %v4158_v63  ;;  %4389 = vmatpush.msrb.mxu1 %v4159_v59 }
 0x864   : >> { %5873 = vmatmul.msk.f32.vlgmr.msrb.gmra.mxu0 %vm532_vm0, %v8269_v3  ;;  %5877 = vmatmul.msk.f32.vlgmr.msrb.gmra.mxu1 %vm532_vm0, %v8269_v3 }
 0x868   : >> { %v3997_v57 = vpop.f32.mrf.mxu2  ;;  %v4026_v4 = vpop.f32.mrf.mxu3 }
 0x869   : >> { %v3998_v8 = vadd.f32 %v3997_v57, %v8264_v49  ;;  %v4027_v0 = vadd.f32 %v4026_v4, %v8264_v49 }
 0x86b   : >> { %v4156_v34 = vmax.f32 %v3998_v8, 0.0  ;;  %v4157_v6 = vmax.f32 %v4027_v0, 0.0  ;;  %v8368_v0 = vpop.permute.xlu2 %4214 }
 0x86c   : >> { %5874 = vmatmul.msk.f32.gmra.mxu0 %vm532_vm0, %v8276_v46  ;;  %5878 = vmatmul.msk.f32.gmra.mxu1 %vm532_vm0, %v8276_v46 }
 0x870   : >> { %v4000_v9 = vpop.f32.mrf.mxu2  ;;  %v4029_v44 = vpop.f32.mrf.mxu3 }
 0x871   : >> { %v4001_v40 = vadd.f32 %v4000_v9, %v8260_v7  ;;  %v4030_v39 = vadd.f32 %v4029_v44, %v8260_v7 }
 0x873   : >> { %v4164_v48 = vmax.f32 %v4001_v40, 0.0  ;;  %v4165_v54 = vmax.f32 %v4030_v39, 0.0 }
 0x874   : >> { %5875 = vmatmul.msk.f32.gmra.mxu0 %vm532_vm0, %v8283_v55  ;;  %5879 = vmatmul.msk.f32.gmra.mxu1 %vm532_vm0, %v8283_v55 }
 0x878   : >> { %v4003_v53 = vpop.f32.mrf.mxu2  ;;  %v4032_v43 = vpop.f32.mrf.mxu3 }
 0x879   : >> { %v4004_v35 = vadd.f32 %v4003_v53, %v8254_v1  ;;  %v4033_v56 = vadd.f32 %v4032_v43, %v8254_v1 }
 0x87b   : >> { %v4172_v36 = vmax.f32 %v4004_v35, 0.0  ;;  %v4173_v52 = vmax.f32 %v4033_v56, 0.0 }
 0x87c   : >> { %5876 = vmatmul.msk.f32.gmra.mxu0 %vm532_vm0, %v8290_v42  ;;  %5880 = vmatmul.msk.f32.gmra.mxu1 %vm532_vm0, %v8290_v42 }
 0x880   : >> { %v4006_v5 = vpop.f32.mrf.mxu2  ;;  %v4035_v41 = vpop.f32.mrf.mxu3 }
 0x881   : >> { %v4007_v62 = vadd.f32 %v4006_v5, %v8252_v61  ;;  %v4036_v47 = vadd.f32 %v4035_v41, %v8252_v61 }
 0x883   : >> { %v4180_v60 = vmax.f32 %v4007_v62, 0.0  ;;  %v4181_v45 = vmax.f32 %v4036_v47, 0.0 }
 0x885   : >> { %4299 = vmatpush.msra.mxu2 %v4180_v60  ;;  %4328 = vmatpush.msra.mxu3 %v4181_v45 }
 0x887   : >> { %4300 = vmatpush.msra.mxu2 %v4172_v36  ;;  %4329 = vmatpush.msra.mxu3 %v4173_v52 }
 0x888   : >> { %v4113_v58 = vpop.f32.mrf.mxu2  ;;  %v4142_v38 = vpop.f32.mrf.mxu3 }
 0x889   : >> { %4301 = vmatpush.msra.mxu2 %v4164_v48  ;;  %4330 = vmatpush.msra.mxu3 %v4165_v54  ;;  %v4114_v35 = vadd.f32 %v4113_v58, %v8264_v49 }
 0x88b   : >> { %4302 = vmatpush.msra.mxu2 %v4156_v34  ;;  %4331 = vmatpush.msra.mxu3 %v4157_v6 }
 0x88c   : >> { %5865 = vmatmul.msk.f32.vlgmr.msra.gmra.mxu2 %vm532_vm0, %v8269_v3  ;;  %5869 = vmatmul.msk.f32.vlgmr.msra.gmra.mxu3 %vm532_vm0, %v8269_v3 }
 0x890   : >> { %v4116_v51 = vpop.f32.mrf.mxu2  ;;  %v4145_v37 = vpop.f32.mrf.mxu3 }
 0x891   : >> { %v4117_v53 = vadd.f32 %v4116_v51, %v8260_v7  ;;  %v4146_v43 = vadd.f32 %v4145_v37, %v8260_v7  ;;  %v4160_v7 = vmax.f32 %v4114_v35, 0.0  ;;  %v8380_v37 = vpop.permute.xlu2 %4199 }
 0x893   : >> { %v4169_v47 = vmax.f32 %v4146_v43, 0.0 }
 0x894   : >> { %5866 = vmatmul.msk.f32.gmra.mxu2 %vm532_vm0, %v8276_v46  ;;  %5870 = vmatmul.msk.f32.gmra.mxu3 %vm532_vm0, %v8276_v46 }
 0x898   : >> { %v4119_v2 = vpop.f32.mrf.mxu2  ;;  %v4148_v50 = vpop.f32.mrf.mxu3 }
 0x899   : >> { %v4120_v57 = vadd.f32 %v4119_v2, %v8254_v1  ;;  %v4149_v4 = vadd.f32 %v4148_v50, %v8254_v1  ;;  %v4143_v1 = vadd.f32 %v4142_v38, %v8264_v49  ;;  %v8376_v38 = vpop.permute.xlu1 %4204 }
 0x89b   : >> { %v4176_v56 = vmax.f32 %v4120_v57, 0.0  ;;  %v4177_v62 = vmax.f32 %v4149_v4, 0.0  ;;  %v4161_v40 = vmax.f32 %v4143_v1, 0.0 }
 0x89c   : >> { %5867 = vmatmul.msk.f32.gmra.mxu2 %vm532_vm0, %v8283_v55  ;;  %5871 = vmatmul.msk.f32.gmra.mxu3 %vm532_vm0, %v8283_v55 }
 0x8a0   : >> { %v4122_v63 = vpop.f32.mrf.mxu2  ;;  %v4151_v59 = vpop.f32.mrf.mxu3 }
 0x8a1   : >> { %v4123_v9 = vadd.f32 %v4122_v63, %v8252_v61  ;;  %v4152_v44 = vadd.f32 %v4151_v59, %v8252_v61  ;;  %v4168_v61 = vmax.f32 %v4117_v53, 0.0  ;;  %v8385_v53 = vld [vmem:[%s6826_s29 + $0x1a0] sm:$0xff] }
 0x8a3   : >> { %v4184_v5 = vmax.f32 %v4123_v9, 0.0  ;;  %v4185_v41 = vmax.f32 %v4152_v44, 0.0 }
 0x8a4   : >> { %5868 = vmatmul.msk.f32.gmra.mxu2 %vm532_vm0, %v8290_v42  ;;  %5872 = vmatmul.msk.f32.gmra.mxu3 %vm532_vm0, %v8290_v42 }
 0x8a5   : >> { %4415 = vmatpush.msrb.mxu2 %v4184_v5  ;;  %4444 = vmatpush.msrb.mxu3 %v4185_v41  ;;  %v8392_v41 = vld [vmem:[%s6826_s29 + $0x1a8] sm:$0xff] }
 0x8a7   : >> { %4416 = vmatpush.msrb.mxu2 %v4176_v56  ;;  %4445 = vmatpush.msrb.mxu3 %v4177_v62  ;;  %v8399_v56 = vld [vmem:[%s6826_s29 + $0x1b0] sm:$0xff] }
 0x8a9   : >> { %4417 = vmatpush.msrb.mxu2 %v4168_v61  ;;  %4446 = vmatpush.msrb.mxu3 %v4169_v47  ;;  %v8406_v47 = vld [vmem:[%s6826_s29 + $0x1b8] sm:$0xff]  ;;  %s5140_s29 = sshll.u32 (%p8602_p11), %s6565_s20, 4  ;;  %s5141_s29 = int_to_ptr.vmem [resolvable:$true] %s5140_s29 }
 0x8ab   : >> { %4418 = vmatpush.msrb.mxu2 %v4160_v7  ;;  %4447 = vmatpush.msrb.mxu3 %v4161_v40 }
 0x8ac   : >> { %5881 = vmatmul.msk.f32.vlgmr.msrb.gmra.mxu2 %vm532_vm0, %v8269_v3  ;;  %5885 = vmatmul.msk.f32.vlgmr.msrb.gmra.mxu3 %vm532_vm0, %v8269_v3 }
 0x8b4   : >> { %5882 = vmatmul.msk.f32.gmra.mxu2 %vm532_vm0, %v8276_v46  ;;  %5886 = vmatmul.msk.f32.gmra.mxu3 %vm532_vm0, %v8276_v46  ;;  %v8370_v46 = vpop.permute.xlu0 %4209 }
 0x8bc   : >> { %5883 = vmatmul.msk.f32.gmra.mxu2 %vm532_vm0, %v8283_v55  ;;  %5887 = vmatmul.msk.f32.gmra.mxu3 %vm532_vm0, %v8283_v55 }
 0x8bd   : >> { %v4246_v49 = vpop.f32.mrf.mxu0  ;;  %v4275_v39 = vpop.f32.mrf.mxu1 }
 0x8be   : >> { %v4247_v2 = vadd.f32 %v4246_v49, %v8380_v37  ;;  %v4276_v50 = vadd.f32 %v4275_v39, %v8380_v37 }
 0x8c0   : >> { %v4461_v9 = vmax.f32 %v4247_v2, 0.0  ;;  %v4462_v44 = vmax.f32 %v4276_v50, 0.0 }
 0x8c4   : >> { %5884 = vmatmul.msk.f32.gmra.mxu2 %vm532_vm0, %v8290_v42  ;;  %5888 = vmatmul.msk.f32.gmra.mxu3 %vm532_vm0, %v8290_v42 }
 0x8c5   : >> { %v4249_v3 = vpop.f32.mrf.mxu0  ;;  %v4278_v60 = vpop.f32.mrf.mxu1 }
 0x8c6   : >> { %v4250_v42 = vadd.f32 %v4249_v3, %v8376_v38  ;;  %v4279_v34 = vadd.f32 %v4278_v60, %v8376_v38 }
 0x8c8   : >> { %v4469_v57 = vmax.f32 %v4250_v42, 0.0  ;;  %v4470_v4 = vmax.f32 %v4279_v34, 0.0 }
 0x8cd   : >> { %v4252_v45 = vpop.f32.mrf.mxu0  ;;  %v4281_v8 = vpop.f32.mrf.mxu1 }
 0x8ce   : >> { %v4253_v55 = vadd.f32 %v4252_v45, %v8370_v46  ;;  %v4282_v48 = vadd.f32 %v4281_v8, %v8370_v46 }
 0x8d0   : >> { %v4477_v63 = vmax.f32 %v4253_v55, 0.0  ;;  %v4478_v59 = vmax.f32 %v4282_v48, 0.0 }
 0x8d5   : >> { %v4255_v36 = vpop.f32.mrf.mxu0  ;;  %v4284_v52 = vpop.f32.mrf.mxu1 }
 0x8d6   : >> { %v4256_v54 = vadd.f32 %v4255_v36, %v8368_v0  ;;  %v4285_v58 = vadd.f32 %v4284_v52, %v8368_v0 }
 0x8d8   : >> { %v4485_v6 = vmax.f32 %v4256_v54, 0.0  ;;  %v4486_v51 = vmax.f32 %v4285_v58, 0.0 }
 0x8da   : >> { %4548 = vmatpush.msra.mxu0 %v4485_v6  ;;  %4577 = vmatpush.msra.mxu1 %v4486_v51 }
 0x8dc   : >> { %4549 = vmatpush.msra.mxu0 %v4477_v63  ;;  %4578 = vmatpush.msra.mxu1 %v4478_v59 }
 0x8de   : >> { %4550 = vmatpush.msra.mxu0 %v4469_v57  ;;  %4579 = vmatpush.msra.mxu1 %v4470_v4 }
 0x8e0   : >> { %4551 = vmatpush.msra.mxu0 %v4461_v9  ;;  %4580 = vmatpush.msra.mxu1 %v4462_v44 }
 0x8e1   : >> { %v4362_v43 = vpop.f32.mrf.mxu0  ;;  %v4391_v5 = vpop.f32.mrf.mxu1  ;;  %5897 = vmatmul.msk.f32.vlgmr.msra.gmra.mxu0 %vm532_vm0, %v8385_v53  ;;  %5901 = vmatmul.msk.f32.vlgmr.msra.gmra.mxu1 %vm532_vm0, %v8385_v53 }
 0x8e2   : >> { %v4363_v55 = vadd.f32 %v4362_v43, %v8380_v37  ;;  %v4392_v48 = vadd.f32 %v4391_v5, %v8380_v37 }
 0x8e4   : >> { %v4465_v6 = vmax.f32 %v4363_v55, 0.0  ;;  %v4466_v51 = vmax.f32 %v4392_v48, 0.0 }
 0x8e9   : >> { %v4365_v35 = vpop.f32.mrf.mxu0  ;;  %v4394_v1 = vpop.f32.mrf.mxu1  ;;  %5898 = vmatmul.msk.f32.gmra.mxu0 %vm532_vm0, %v8392_v41  ;;  %5902 = vmatmul.msk.f32.gmra.mxu1 %vm532_vm0, %v8392_v41 }
 0x8ea   : >> { %v4366_v45 = vadd.f32 %v4365_v35, %v8376_v38  ;;  %v4395_v8 = vadd.f32 %v4394_v1, %v8376_v38 }
 0x8ec   : >> { %v4473_v42 = vmax.f32 %v4366_v45, 0.0  ;;  %v4474_v34 = vmax.f32 %v4395_v8, 0.0 }
 0x8f1   : >> { %v4368_v62 = vpop.f32.mrf.mxu0  ;;  %v4397_v61 = vpop.f32.mrf.mxu1  ;;  %5899 = vmatmul.msk.f32.gmra.mxu0 %vm532_vm0, %v8399_v56  ;;  %5903 = vmatmul.msk.f32.gmra.mxu1 %vm532_vm0, %v8399_v56 }
 0x8f2   : >> { %v4369_v49 = vadd.f32 %v4368_v62, %v8370_v46  ;;  %v4398_v39 = vadd.f32 %v4397_v61, %v8370_v46 }
 0x8f4   : >> { %v4481_v54 = vmax.f32 %v4369_v49, 0.0  ;;  %v4482_v58 = vmax.f32 %v4398_v39, 0.0 }
 0x8f9   : >> { %v4371_v7 = vpop.f32.mrf.mxu0  ;;  %v4400_v40 = vpop.f32.mrf.mxu1  ;;  %5900 = vmatmul.msk.f32.gmra.mxu0 %vm532_vm0, %v8406_v47  ;;  %5904 = vmatmul.msk.f32.gmra.mxu1 %vm532_vm0, %v8406_v47 }
 0x8fa   : >> { %v4372_v3 = vadd.f32 %v4371_v7, %v8368_v0  ;;  %v4401_v60 = vadd.f32 %v4400_v40, %v8368_v0 }
 0x8fc   : >> { %v4489_v36 = vmax.f32 %v4372_v3, 0.0  ;;  %v4490_v52 = vmax.f32 %v4401_v60, 0.0 }
 0x8fe   : >> { %4664 = vmatpush.msrb.mxu0 %v4489_v36  ;;  %4693 = vmatpush.msrb.mxu1 %v4490_v52 }
 0x900   : >> { %4665 = vmatpush.msrb.mxu0 %v4481_v54  ;;  %4694 = vmatpush.msrb.mxu1 %v4482_v58 }
 0x902   : >> { %4666 = vmatpush.msrb.mxu0 %v4473_v42  ;;  %4695 = vmatpush.msrb.mxu1 %v4474_v34 }
 0x904   : >> { %4667 = vmatpush.msrb.mxu0 %v4465_v6  ;;  %4696 = vmatpush.msrb.mxu1 %v4466_v51 }
 0x905   : >> { %5913 = vmatmul.msk.f32.vlgmr.msrb.gmra.mxu0 %vm532_vm0, %v8385_v53  ;;  %5917 = vmatmul.msk.f32.vlgmr.msrb.gmra.mxu1 %vm532_vm0, %v8385_v53 }
 0x90d   : >> { %5914 = vmatmul.msk.f32.gmra.mxu0 %vm532_vm0, %v8392_v41  ;;  %5918 = vmatmul.msk.f32.gmra.mxu1 %vm532_vm0, %v8392_v41 }
 0x90f   : >> { %v4304_v2 = vpop.f32.mrf.mxu2  ;;  %v4333_v50 = vpop.f32.mrf.mxu3 }
 0x910   : >> { %v4305_v49 = vadd.f32 %v4304_v2, %v8380_v37  ;;  %v4334_v39 = vadd.f32 %v4333_v50, %v8380_v37 }
 0x912   : >> { %v4463_v55 = vmax.f32 %v4305_v49, 0.0  ;;  %v4464_v48 = vmax.f32 %v4334_v39, 0.0  ;;  %v8484_v39 = vpop.permute.xlu0 %4521 }
 0x915   : >> { %5915 = vmatmul.msk.f32.gmra.mxu0 %vm532_vm0, %v8399_v56  ;;  %5919 = vmatmul.msk.f32.gmra.mxu1 %vm532_vm0, %v8399_v56 }
 0x917   : >> { %v4307_v63 = vpop.f32.mrf.mxu2  ;;  %v4336_v59 = vpop.f32.mrf.mxu3 }
 0x918   : >> { %v4308_v62 = vadd.f32 %v4307_v63, %v8376_v38  ;;  %v4337_v61 = vadd.f32 %v4336_v59, %v8376_v38 }
 0x91a   : >> { %v4471_v45 = vmax.f32 %v4308_v62, 0.0  ;;  %v4472_v8 = vmax.f32 %v4337_v61, 0.0 }
 0x91d   : >> { %5916 = vmatmul.msk.f32.gmra.mxu0 %vm532_vm0, %v8406_v47  ;;  %5920 = vmatmul.msk.f32.gmra.mxu1 %vm532_vm0, %v8406_v47 }
 0x91f   : >> { %v4310_v57 = vpop.f32.mrf.mxu2  ;;  %v4339_v4 = vpop.f32.mrf.mxu3 }
 0x920   : >> { %v4311_v43 = vadd.f32 %v4310_v57, %v8370_v46  ;;  %v4340_v5 = vadd.f32 %v4339_v4, %v8370_v46 }
 0x922   : >> { %v4479_v3 = vmax.f32 %v4311_v43, 0.0  ;;  %v4480_v60 = vmax.f32 %v4340_v5, 0.0 }
 0x927   : >> { %v4313_v9 = vpop.f32.mrf.mxu2  ;;  %v4342_v44 = vpop.f32.mrf.mxu3 }
 0x928   : >> { %v4314_v35 = vadd.f32 %v4313_v9, %v8368_v0  ;;  %v4343_v1 = vadd.f32 %v4342_v44, %v8368_v0 }
 0x92a   : >> { %v4487_v7 = vmax.f32 %v4314_v35, 0.0  ;;  %v4488_v40 = vmax.f32 %v4343_v1, 0.0 }
 0x92c   : >> { %4606 = vmatpush.msra.mxu2 %v4487_v7  ;;  %4635 = vmatpush.msra.mxu3 %v4488_v40 }
 0x92e   : >> { %4607 = vmatpush.msra.mxu2 %v4479_v3  ;;  %4636 = vmatpush.msra.mxu3 %v4480_v60 }
 0x92f   : >> { %v4420_v36 = vpop.f32.mrf.mxu2  ;;  %v4449_v52 = vpop.f32.mrf.mxu3 }
 0x930   : >> { %4608 = vmatpush.msra.mxu2 %v4471_v45  ;;  %4637 = vmatpush.msra.mxu3 %v4472_v8  ;;  %v4421_v43 = vadd.f32 %v4420_v36, %v8380_v37 }
 0x932   : >> { %4609 = vmatpush.msra.mxu2 %v4463_v55  ;;  %4638 = vmatpush.msra.mxu3 %v4464_v48 }
 0x933   : >> { %5905 = vmatmul.msk.f32.vlgmr.msra.gmra.mxu2 %vm532_vm0, %v8385_v53  ;;  %5909 = vmatmul.msk.f32.vlgmr.msra.gmra.mxu3 %vm532_vm0, %v8385_v53 }
 0x937   : >> { %v4423_v54 = vpop.f32.mrf.mxu2  ;;  %v4452_v58 = vpop.f32.mrf.mxu3 }
 0x938   : >> { %v4424_v57 = vadd.f32 %v4423_v54, %v8376_v38  ;;  %v4453_v4 = vadd.f32 %v4452_v58, %v8376_v38  ;;  %v4467_v38 = vmax.f32 %v4421_v43, 0.0  ;;  %v8496_v58 = vpop.permute.xlu0 %4506 }
 0x93a   : >> { %v4476_v1 = vmax.f32 %v4453_v4, 0.0 }
 0x93b   : >> { %5906 = vmatmul.msk.f32.gmra.mxu2 %vm532_vm0, %v8392_v41  ;;  %5910 = vmatmul.msk.f32.gmra.mxu3 %vm532_vm0, %v8392_v41 }
 0x93f   : >> { %v4426_v42 = vpop.f32.mrf.mxu2  ;;  %v4455_v34 = vpop.f32.mrf.mxu3 }
 0x940   : >> { %v4427_v2 = vadd.f32 %v4426_v42, %v8370_v46  ;;  %v4456_v50 = vadd.f32 %v4455_v34, %v8370_v46  ;;  %v4450_v46 = vadd.f32 %v4449_v52, %v8380_v37  ;;  %v8492_v52 = vpop.permute.xlu2 %4511 }
 0x942   : >> { %v4483_v5 = vmax.f32 %v4427_v2, 0.0  ;;  %v4484_v35 = vmax.f32 %v4456_v50, 0.0  ;;  %v4468_v62 = vmax.f32 %v4450_v46, 0.0 }
 0x943   : >> { %5907 = vmatmul.msk.f32.gmra.mxu2 %vm532_vm0, %v8399_v56  ;;  %5911 = vmatmul.msk.f32.gmra.mxu3 %vm532_vm0, %v8399_v56 }
 0x947   : >> { %v4429_v6 = vpop.f32.mrf.mxu2  ;;  %v4458_v51 = vpop.f32.mrf.mxu3 }
 0x948   : >> { %v4430_v63 = vadd.f32 %v4429_v6, %v8368_v0  ;;  %v4459_v59 = vadd.f32 %v4458_v51, %v8368_v0  ;;  %v4475_v0 = vmax.f32 %v4424_v57, 0.0 }
 0x94a   : >> { %v4491_v9 = vmax.f32 %v4430_v63, 0.0  ;;  %v4492_v44 = vmax.f32 %v4459_v59, 0.0  ;;  %v8505_v63 = vld [vmem:[%s4801_s18] sm:$0x3]  ;;  %s6225_s18 = scalar_lea.hbm (%p8602_p11), %s8767_s7, 128 }
 0x94b   : >> { %5908 = vmatmul.msk.f32.gmra.mxu2 %vm532_vm0, %v8406_v47  ;;  %5912 = vmatmul.msk.f32.gmra.mxu3 %vm532_vm0, %v8406_v47  ;;  %p6227_p2 = scmp.lt.s32.totalorder (%p8602_p11), %s6225_s18, %s6221_s15 }
 0x94c   : >> { %4722 = vmatpush.msrb.mxu2 %v4491_v9  ;;  %4751 = vmatpush.msrb.mxu3 %v4492_v44 }
 0x94d   : > { %p6228_p3 = por (%p8602_p11), %p6227_p2, %p6226_p1 }
 0x94e   : >> { %4723 = vmatpush.msrb.mxu2 %v4483_v5  ;;  %4752 = vmatpush.msrb.mxu3 %v4484_v35 }
 0x94f   : > { %p6229_p4 = pnand (%p8602_p11), %p6228_p3, %p6224_p0 }
 0x950   : >> { %4724 = vmatpush.msrb.mxu2 %v4475_v0  ;;  %4753 = vmatpush.msrb.mxu3 %v4476_v1 }
 0x952   : >> { %4725 = vmatpush.msrb.mxu2 %v4467_v38  ;;  %4754 = vmatpush.msrb.mxu3 %v4468_v62 }
 0x953   : >> { %5921 = vmatmul.msk.f32.vlgmr.msrb.gmra.mxu2 %vm532_vm0, %v8385_v53  ;;  %5925 = vmatmul.msk.f32.vlgmr.msrb.gmra.mxu3 %vm532_vm0, %v8385_v53 }
 0x95b   : >> { %5922 = vmatmul.msk.f32.gmra.mxu2 %vm532_vm0, %v8392_v41  ;;  %5926 = vmatmul.msk.f32.gmra.mxu3 %vm532_vm0, %v8392_v41  ;;  %v8486_v41 = vpop.permute.xlu1 %4516 }
 0x95e   : >> { %v4553_v37 = vpop.f32.mrf.mxu0  ;;  %v4582_v61 = vpop.f32.mrf.mxu1 }
 0x95f   : >> { %v4554_v42 = vadd.f32 %v4553_v37, %v8496_v58  ;;  %v4583_v34 = vadd.f32 %v4582_v61, %v8496_v58 }
 0x961   : >> { %v4768_v59 = vmax.f32 %v4554_v42, 0.0  ;;  %v4769_v57 = vmax.f32 %v4583_v34, 0.0 }
 0x963   : >> { %5923 = vmatmul.msk.f32.gmra.mxu2 %vm532_vm0, %v8399_v56  ;;  %5927 = vmatmul.msk.f32.gmra.mxu3 %vm532_vm0, %v8399_v56 }
 0x966   : >> { %v4556_v7 = vpop.f32.mrf.mxu0  ;;  %v4585_v40 = vpop.f32.mrf.mxu1 }
 0x967   : >> { %v4586_v55 = vadd.f32 %v4585_v40, %v8492_v52 }
 0x969   : >> { %v4777_v50 = vmax.f32 %v4586_v55, 0.0 }
 0x96b   : >> { %5924 = vmatmul.msk.f32.gmra.mxu2 %vm532_vm0, %v8406_v47  ;;  %5928 = vmatmul.msk.f32.gmra.mxu3 %vm532_vm0, %v8406_v47  ;;  %v4557_v47 = vadd.f32 %v4556_v7, %v8492_v52 }
 0x96d   : >> { %v4776_v2 = vmax.f32 %v4557_v47, 0.0 }
 0x96e   : >> { %v4559_v53 = vpop.f32.mrf.mxu0  ;;  %v4588_v49 = vpop.f32.mrf.mxu1 }
 0x96f   : >> { %v4560_v45 = vadd.f32 %v4559_v53, %v8486_v41  ;;  %v4589_v56 = vadd.f32 %v4588_v49, %v8486_v41 }
 0x971   : >> { %v4784_v6 = vmax.f32 %v4560_v45, 0.0  ;;  %v4785_v51 = vmax.f32 %v4589_v56, 0.0 }
 0x976   : >> { %v4562_v3 = vpop.f32.mrf.mxu0  ;;  %v4591_v60 = vpop.f32.mrf.mxu1 }
 0x977   : >> { %v4563_v8 = vadd.f32 %v4562_v3, %v8484_v39  ;;  %v4592_v36 = vadd.f32 %v4591_v60, %v8484_v39 }
 0x979   : >> { %v4792_v48 = vmax.f32 %v4563_v8, 0.0  ;;  %v4793_v54 = vmax.f32 %v4592_v36, 0.0 }
 0x97b   : >> { %4825 = vmatpush.msra.mxu0 %v4792_v48  ;;  %4845 = vmatpush.msra.mxu1 %v4793_v54 }
 0x97d   : >> { %4826 = vmatpush.msra.mxu0 %v4784_v6  ;;  %4846 = vmatpush.msra.mxu1 %v4785_v51 }
 0x97f   : >> { %4827 = vmatpush.msra.mxu0 %v4776_v2  ;;  %4847 = vmatpush.msra.mxu1 %v4777_v50 }
 0x981   : >> { %4828 = vmatpush.msra.mxu0 %v4768_v59  ;;  %4848 = vmatpush.msra.mxu1 %v4769_v57 }
 0x982   : >> { %v4669_v4 = vpop.f32.mrf.mxu0  ;;  %v4698_v9 = vpop.f32.mrf.mxu1  ;;  %5930 = vmatmul.msk.f32.vlgmr.msra.gmra.mxu0 %vm532_vm0, %v8505_v63  ;;  %5931 = vmatmul.msk.f32.vlgmr.msra.gmra.mxu1 %vm532_vm0, %v8505_v63 }
 0x983   : >> { %v4670_v49 = vadd.f32 %v4669_v4, %v8496_v58  ;;  %v4699_v3 = vadd.f32 %v4698_v9, %v8496_v58 }
 0x985   : >> { %v4772_v36 = vmax.f32 %v4670_v49, 0.0  ;;  %v4773_v47 = vmax.f32 %v4699_v3, 0.0 }
 0x98a   : >> { %v4672_v44 = vpop.f32.mrf.mxu0  ;;  %v4701_v43 = vpop.f32.mrf.mxu1 }
 0x98b   : >> { %v4673_v61 = vadd.f32 %v4672_v44, %v8492_v52  ;;  %v4702_v7 = vadd.f32 %v4701_v43, %v8492_v52 }
 0x98d   : >> { %v4780_v56 = vmax.f32 %v4673_v61, 0.0  ;;  %v4781_v8 = vmax.f32 %v4702_v7, 0.0 }
 0x992   : >> { %v4675_v46 = vpop.f32.mrf.mxu0  ;;  %v4704_v5 = vpop.f32.mrf.mxu1 }
 0x993   : >> { %v4676_v1 = vadd.f32 %v4675_v46, %v8486_v41  ;;  %v4705_v38 = vadd.f32 %v4704_v5, %v8486_v41 }
 0x995   : >> { %v4788_v60 = vmax.f32 %v4676_v1, 0.0  ;;  %v4789_v45 = vmax.f32 %v4705_v38, 0.0 }
 0x99a   : >> { %v4678_v35 = vpop.f32.mrf.mxu0  ;;  %v4707_v0 = vpop.f32.mrf.mxu1 }
 0x99b   : >> { %v4679_v62 = vadd.f32 %v4678_v35, %v8484_v39  ;;  %v4708_v37 = vadd.f32 %v4707_v0, %v8484_v39 }
 0x99d   : >> { %v4796_v40 = vmax.f32 %v4679_v62, 0.0  ;;  %v4797_v53 = vmax.f32 %v4708_v37, 0.0 }
 0x99f   : >> { %4905 = vmatpush.msrb.mxu0 %v4796_v40  ;;  %4925 = vmatpush.msrb.mxu1 %v4797_v53 }
 0x9a1   : >> { %4906 = vmatpush.msrb.mxu0 %v4788_v60  ;;  %4926 = vmatpush.msrb.mxu1 %v4789_v45 }
 0x9a3   : >> { %4907 = vmatpush.msrb.mxu0 %v4780_v56  ;;  %4927 = vmatpush.msrb.mxu1 %v4781_v8 }
 0x9a5   : >> { %4908 = vmatpush.msrb.mxu0 %v4772_v36  ;;  %4928 = vmatpush.msrb.mxu1 %v4773_v47 }
 0x9a6   : >> { %5934 = vmatmul.msk.f32.vlgmr.msrb.gmra.mxu0 %vm532_vm0, %v8505_v63  ;;  %5935 = vmatmul.msk.f32.vlgmr.msrb.gmra.mxu1 %vm532_vm0, %v8505_v63 }
 0x9b6   : >> { %v4611_v55 = vpop.f32.mrf.mxu2  ;;  %v4640_v48 = vpop.f32.mrf.mxu3 }
 0x9b7   : >> { %v4612_v5 = vadd.f32 %v4611_v55, %v8496_v58  ;;  %v4641_v35 = vadd.f32 %v4640_v48, %v8496_v58 }
 0x9b9   : >> { %v4770_v7 = vmax.f32 %v4612_v5, 0.0  ;;  %v4771_v40 = vmax.f32 %v4641_v35, 0.0 }
 0x9be   : >> { %v4614_v54 = vpop.f32.mrf.mxu2  ;;  %v4643_v42 = vpop.f32.mrf.mxu3 }
 0x9bf   : >> { %v4615_v9 = vadd.f32 %v4614_v54, %v8492_v52  ;;  %v4644_v44 = vadd.f32 %v4643_v42, %v8492_v52 }
 0x9c1   : >> { %v4778_v38 = vmax.f32 %v4615_v9, 0.0  ;;  %v4779_v62 = vmax.f32 %v4644_v44, 0.0 }
 0x9c6   : >> { %v4617_v34 = vpop.f32.mrf.mxu2  ;;  %v4646_v6 = vpop.f32.mrf.mxu3 }
 0x9c7   : >> { %v4618_v50 = vadd.f32 %v4617_v34, %v8486_v41  ;;  %v4647_v59 = vadd.f32 %v4646_v6, %v8486_v41 }
 0x9c9   : >> { %v4786_v0 = vmax.f32 %v4618_v50, 0.0  ;;  %v4787_v1 = vmax.f32 %v4647_v59, 0.0 }
 0x9ce   : >> { %v4620_v51 = vpop.f32.mrf.mxu2  ;;  %v4649_v2 = vpop.f32.mrf.mxu3 }
 0x9cf   : >> { %v4621_v57 = vadd.f32 %v4620_v51, %v8484_v39  ;;  %v4650_v4 = vadd.f32 %v4649_v2, %v8484_v39 }
 0x9d1   : >> { %v4794_v43 = vmax.f32 %v4621_v57, 0.0  ;;  %v4795_v46 = vmax.f32 %v4650_v4, 0.0 }
 0x9d3   : >> { %4865 = vmatpush.msra.mxu2 %v4794_v43  ;;  %4885 = vmatpush.msra.mxu3 %v4795_v46 }
 0x9d5   : >> { %4866 = vmatpush.msra.mxu2 %v4786_v0  ;;  %4886 = vmatpush.msra.mxu3 %v4787_v1 }
 0x9d6   : >> { %v4727_v37 = vpop.f32.mrf.mxu2  ;;  %v4756_v61 = vpop.f32.mrf.mxu3 }
 0x9d7   : >> { %4867 = vmatpush.msra.mxu2 %v4778_v38  ;;  %4887 = vmatpush.msra.mxu3 %v4779_v62  ;;  %v4728_v6 = vadd.f32 %v4727_v37, %v8496_v58  ;;  %v4757_v51 = vadd.f32 %v4756_v61, %v8496_v58 }
 0x9d9   : >> { %4868 = vmatpush.msra.mxu2 %v4770_v7  ;;  %4888 = vmatpush.msra.mxu3 %v4771_v40  ;;  %v4774_v57 = vmax.f32 %v4728_v6, 0.0 }
 0x9da   : >> { %5932 = vmatmul.msk.f32.vlgmr.msra.gmra.mxu2 %vm532_vm0, %v8505_v63  ;;  %5933 = vmatmul.msk.f32.vlgmr.msra.gmra.mxu3 %vm532_vm0, %v8505_v63 }
 0x9de   : >> { %v4730_v53 = vpop.f32.mrf.mxu2  ;;  %v4759_v49 = vpop.f32.mrf.mxu3 }
 0x9df   : >> { %v4731_v48 = vadd.f32 %v4730_v53, %v8492_v52  ;;  %v4760_v54 = vadd.f32 %v4759_v49, %v8492_v52  ;;  %v8547_v52 = vpop.permute.xlu1 %4807 }
 0x9e1   : >> { %v4782_v59 = vmax.f32 %v4731_v48, 0.0 }
 0x9e6   : >> { %v4733_v3 = vpop.f32.mrf.mxu2  ;;  %v4762_v60 = vpop.f32.mrf.mxu3 }
 0x9e7   : >> { %v4734_v8 = vadd.f32 %v4733_v3, %v8486_v41  ;;  %v4763_v36 = vadd.f32 %v4762_v60, %v8486_v41  ;;  %v4783_v41 = vmax.f32 %v4760_v54, 0.0 }
 0x9e9   : >> { %v4790_v2 = vmax.f32 %v4734_v8, 0.0  ;;  %v4791_v50 = vmax.f32 %v4763_v36, 0.0 }
 0x9ee   : >> { %v4736_v45 = vpop.f32.mrf.mxu2  ;;  %v4765_v56 = vpop.f32.mrf.mxu3 }
 0x9ef   : >> { %v4737_v47 = vadd.f32 %v4736_v45, %v8484_v39  ;;  %v4766_v55 = vadd.f32 %v4765_v56, %v8484_v39  ;;  %v4775_v39 = vmax.f32 %v4757_v51, 0.0 }
 0x9f1   : >> { %v4798_v42 = vmax.f32 %v4737_v47, 0.0  ;;  %v4799_v34 = vmax.f32 %v4766_v55, 0.0 }
 0x9f3   : >> { %4945 = vmatpush.msrb.mxu2 %v4798_v42  ;;  %4965 = vmatpush.msrb.mxu3 %v4799_v34 }
 0x9f5   : >> { %4946 = vmatpush.msrb.mxu2 %v4790_v2  ;;  %4966 = vmatpush.msrb.mxu3 %v4791_v50 }
 0x9f7   : >> { %4947 = vmatpush.msrb.mxu2 %v4782_v59  ;;  %4967 = vmatpush.msrb.mxu3 %v4783_v41 }
 0x9f9   : >> { %4948 = vmatpush.msrb.mxu2 %v4774_v57  ;;  %4968 = vmatpush.msrb.mxu3 %v4775_v39 }
 0x9fa   : >> { %5936 = vmatmul.msk.f32.vlgmr.msrb.gmra.mxu2 %vm532_vm0, %v8505_v63  ;;  %5937 = vmatmul.msk.f32.vlgmr.msrb.gmra.mxu3 %vm532_vm0, %v8505_v63 }
 0x9ff   : >> { %v4830_v58 = vpop.f32.mrf.mxu0  ;;  %v4850_v4 = vpop.f32.mrf.mxu1 }
 0xa00   : >> { %v4831_v9 = vadd.f32 %v4830_v58, %v8547_v52  ;;  %v4851_v44 = vadd.f32 %v4850_v4, %v8547_v52 }
 0xa02   : >> { %v4973_v43 = vand.u32 2147483647, %v4831_v9  ;;  %v4974_v46 = vand.u32 2147483647, %v4851_v44  ;;  %v4997_v5 = vrot.slane %v4831_v9, 1  ;;  %v4998_v1 = vrot.slane %v4851_v44, 1 }
 0xa04   : >> { %v4981_v35 = vmul.f32 %v6431_v10, %v4973_v43  ;;  %6189 = vlog2.f32 %v4973_v43  ;;  %v4982_v0 = vmul.f32 %v6427_v11, %v4974_v46 }
 0xa05   : >> { %6191 = vlog2.f32 %v4974_v46 }
 0xa06   : >> { %v8553_v2 = vadd.f32 %v4997_v5, %v4981_v35   ;;  %v8555_v3 = vadd.f32 %v4998_v1, %v4982_v0  }
 0xa08   : >> { %v8778_v63 = vmov %v8553_v2  ;;  %v8779_v38 = vmov %v8555_v3 }
 0xa0a   : >> { %v6190_v62 = vpop.eup %6189 }
 0xa0b   : >> { %v6192_v37 = vpop.eup %6191  ;;  %v5022_v61 = vmul.f32 0.6931472, %v6190_v62 }
 0xa0c   : >> { %v5024_v7 = vmul.f32 0.6931472, %v6192_v37 }
 0xa0d   : >> { %v8558_v25 = vadd.f32 %v6399_v25, %v5022_v61  }
 0xa0e   : >> { %v8561_v24 = vadd.f32 %v6395_v24, %v5024_v7  }
 0xa0f   : >> { %v8780_v40 = vmov %v8558_v25 }
 0xa10   : >> { %v8781_v53 = vmov %v8561_v24 }
 0xa23   : >> { %v4910_v10 = vpop.f32.mrf.mxu0  ;;  %v4930_v49 = vpop.f32.mrf.mxu1 }
 0xa24   : >> { %v4911_v11 = vadd.f32 %v4910_v10, %v8547_v52  ;;  %v4931_v60 = vadd.f32 %v4930_v49, %v8547_v52 }
 0xa26   : >> { %v4977_v45 = vand.u32 2147483647, %v4911_v11  ;;  %v4978_v56 = vand.u32 2147483647, %v4931_v60  ;;  %v5001_v8 = vrot.slane %v4911_v11, 1  ;;  %v5002_v47 = vrot.slane %v4931_v60, 1 }
 0xa28   : >> { %v4985_v3 = vmul.f32 %v6415_v14, %v4977_v45  ;;  %6193 = vlog2.f32 %v4977_v45  ;;  %v4986_v36 = vmul.f32 %v6411_v15, %v4978_v56 }
 0xa29   : >> { %6195 = vlog2.f32 %v4978_v56 }
 0xa2a   : >> { %v8567_v6 = vadd.f32 %v5001_v8, %v4985_v3   ;;  %v8569_v7 = vadd.f32 %v5002_v47, %v4986_v36   ;;  %v8815_v3 = vmov %v8779_v38  ;;  %v5053_v36 = vrot.slane (%p8602_p11), %v8779_v38, 7 }
 0xa2b   : > { %v5084_v38 = vrot.slane (%p8602_p11), %v8776_v32, 7  ;;  %v5086_v3 = vrot.slane (%p8602_p11), %v8774_v30, 5 }
 0xa2c   : >> { %v8782_v55 = vmov %v8567_v6  ;;  %v8783_v48 = vmov %v8569_v7 }
 0xa2e   : >> { %v6194_v24 = vpop.eup %6193 }
 0xa2f   : >> { %v6196_v25 = vpop.eup %6195  ;;  %v5030_v54 = vmul.f32 0.6931472, %v6194_v24  ;;  %v8799_v24 = vmov %v8781_v53 }
 0xa30   : >> { %v5032_v42 = vmul.f32 0.6931472, %v6196_v25  ;;  %v8800_v25 = vmov %v8780_v40  ;;  %v5088_v24 = vrot.slane (%p8602_p11), %v8772_v28, 3 }
 0xa31   : >> { %v8572_v21 = vadd.f32 %v6383_v21, %v5030_v54   ;;  %v5089_v25 = vrot.slane (%p8602_p11), %v8771_v27, 2 }
 0xa32   : >> { %v8575_v20 = vadd.f32 %v6379_v20, %v5032_v42   ;;  %v5056_v42 = vrot.slane (%p8602_p11), %v8782_v55, 4 }
 0xa33   : >> { %v8784_v34 = vmov %v8572_v21 }
 0xa34   : >> { %v8785_v51 = vmov %v8575_v20 }
 0xa5d   : >> { %v4870_v14 = vpop.f32.mrf.mxu2  ;;  %v4890_v2 = vpop.f32.mrf.mxu3 }
 0xa5e   : >> { %v4871_v15 = vadd.f32 %v4870_v14, %v8547_v52  ;;  %v4891_v50 = vadd.f32 %v4890_v2, %v8547_v52  ;;  %v8804_v14 = vmov %v8773_v29  ;;  %v8816_v2 = vmov %v8778_v63 }
 0xa5f   : > { %v5057_v2 = vrot.slane (%p8602_p11), %v8783_v48, 3  ;;  %v5090_v14 = vrot.slane (%p8602_p11), %v8770_v26, 1 }
 0xa60   : >> { %v4975_v59 = vand.u32 2147483647, %v4871_v15  ;;  %v4976_v6 = vand.u32 2147483647, %v4891_v50  ;;  %v4999_v41 = vrot.slane %v4871_v15, 1  ;;  %v5000_v58 = vrot.slane %v4891_v50, 1 }
 0xa61   : >> { %v8803_v15 = vmov %v8772_v28  ;;  %v5095_v28 = vsel (%p8602_p11), %vm5068_vm5, %v5089_v25, %v5090_v14 }
 0xa62   : >> { %v4983_v57 = vmul.f32 %v6423_v12, %v4975_v59  ;;  %6197 = vlog2.f32 %v4975_v59  ;;  %v4984_v39 = vmul.f32 %v6419_v13, %v4976_v6 }
 0xa63   : >> { %6199 = vlog2.f32 %v4976_v6  ;;  %v8812_v6 = vmov %v8782_v55  ;;  %v5087_v55 = vrot.slane (%p8602_p11), %v8773_v29, 4 }
 0xa64   : >> { %v8581_v4 = vadd.f32 %v4999_v41, %v4983_v57   ;;  %v8583_v5 = vadd.f32 %v5000_v58, %v4984_v39   ;;  %v5061_v41 = vsel (%p8602_p11), %vm5060_vm1, %v8778_v63, %v5053_v36  ;;  %v5112_v6 = vrot.slane (%p8602_p11), %v8784_v34, 4 }
 0xa66   : >> { %v8786_v44 = vmov %v8581_v4  ;;  %v8787_v43 = vmov %v8583_v5 }
 0xa67   : > { %v5054_v47 = vrot.slane (%p8602_p11), %v8786_v44, 6  ;;  %v5055_v54 = vrot.slane (%p8602_p11), %v8787_v43, 5 }
 0xa68   : >> { %v6198_v20 = vpop.eup %6197 }
 0xa69   : >> { %v6200_v21 = vpop.eup %6199  ;;  %v5026_v9 = vmul.f32 0.6931472, %v6198_v20  ;;  %v8795_v20 = vmov %v8785_v51 }
 0xa6a   : >> { %v5028_v46 = vmul.f32 0.6931472, %v6200_v21  ;;  %v8796_v21 = vmov %v8784_v34 }
 0xa6b   : >> { %v8586_v23 = vadd.f32 %v6391_v23, %v5026_v9  }
 0xa6c   : >> { %v8589_v22 = vadd.f32 %v6387_v22, %v5028_v46  }
 0xa6d   : >> { %v8788_v35 = vmov %v8586_v23 }
 0xa6e   : >> { %v8789_v0 = vmov %v8589_v22 }
 0xa6f   : > { %v5111_v29 = vrot.slane (%p8602_p11), %v8789_v0, 5 }
 0xa7d   : >> { %v4950_v12 = vpop.f32.mrf.mxu2  ;;  %v4970_v1 = vpop.f32.mrf.mxu3 }
 0xa7e   : >> { %v4951_v13 = vadd.f32 %v4950_v12, %v8547_v52  ;;  %v4971_v62 = vadd.f32 %v4970_v1, %v8547_v52  ;;  %v8806_v12 = vmov %v8775_v31 }
 0xa80   : >> { %v4979_v37 = vand.u32 2147483647, %v4951_v13  ;;  %v4980_v4 = vand.u32 2147483647, %v4971_v62  ;;  %v5003_v61 = vrot.slane %v4951_v13, 1  ;;  %v5004_v10 = vrot.slane %v4971_v62, 1 }
 0xa81   : >> { %v8805_v13 = vmov %v8774_v30  ;;  %v5110_v30 = vrot.slane (%p8602_p11), %v8788_v35, 6 }
 0xa82   : >> { %v4987_v5 = vmul.f32 %v6407_v16, %v4979_v37  ;;  %6201 = vlog2.f32 %v4979_v37  ;;  %v4988_v7 = vmul.f32 %v6403_v17, %v4980_v4  ;;  %v8801_v17 = vmov %v8770_v26 }
 0xa83   : >> { %6203 = vlog2.f32 %v4980_v4  ;;  %v8802_v16 = vmov %v8771_v27  ;;  %v8814_v4 = vmov %v8786_v44  ;;  %v5067_v17 = vsel (%p8602_p11), %vm5066_vm4, %v5056_v42, %v5057_v2 }
 0xa84   : >> { %v5019_v49 = vadd.f32 %v5003_v61, %v4987_v5   ;;  %v5020_v60 = vadd.f32 %v5004_v10, %v4988_v7   ;;  %v8808_v10 = vmov %v8777_v33  ;;  %v8811_v7 = vmov %v8783_v48 }
 0xa85   : >> { %v8813_v5 = vmov %v8787_v43  ;;  %v5063_v16 = vsel (%p8602_p11), %vm5062_vm2, %v5054_v47, %v5055_v54  ;;  %v5094_v26 = vsel (%p8602_p11), %vm5066_vm4, %v5087_v55, %v5088_v24  ;;  %v5117_v43 = vsel (%p8602_p11), %vm5062_vm2, %v5110_v30, %v5111_v29 }
 0xa86   : >> { %v8809_v9 = vmov %v5020_v60  ;;  %v8810_v8 = vmov %v5019_v49  ;;  %v5058_v50 = vrot.slane (%p8602_p11), %v5019_v49, 2  ;;  %v5059_v59 = vrot.slane (%p8602_p11), %v5020_v60, 1 }
 0xa87   : > { %v5085_v8 = vrot.slane (%p8602_p11), %v8775_v31, 6  ;;  %v5109_v31 = vrot.slane (%p8602_p11), %v8781_v53, 7  ;;  %v5113_v53 = vrot.slane (%p8602_p11), %v8785_v51, 3 }
 0xa88   : >> { %v6202_v23 = vpop.eup %6201 }
 0xa89   : >> { %v6204_v22 = vpop.eup %6203  ;;  %v5034_v11 = vmul.f32 0.6931472, %v6202_v23  ;;  %v8798_v23 = vmov %v8788_v35  ;;  %v5092_v15 = vsel (%p8602_p11), %vm5062_vm2, %v5085_v8, %v5086_v3  ;;  %v5116_v44 = vsel (%p8602_p11), %vm5060_vm1, %v8780_v40, %v5109_v31 }
 0xa8a   : >> { %v5036_v45 = vmul.f32 0.6931472, %v6204_v22  ;;  %v8797_v22 = vmov %v8789_v0  ;;  %v5118_v34 = vsel (%p8602_p11), %vm5064_vm3, %v5116_v44, %v5117_v43  ;;  %v5119_v51 = vsel (%p8602_p11), %vm5066_vm4, %v5112_v6, %v5113_v53 }
 0xa8b   : >> { %v8596_v19 = vadd.f32 %v6375_v19, %v5034_v11   ;;  %v8807_v11 = vmov %v8776_v32  ;;  %320 = sbr.rel (!%p8602_p11) target bundleno = 27 (0x1b), region = 124  ;;  %v5091_v32 = vsel (%p8602_p11), %vm5060_vm1, %v8777_v33, %v5084_v38  ;;  %v5096_v33 = vsel (%p8602_p11), %vm5070_vm6, %v5094_v26, %v5095_v28 }
 0xa8c   : >> { %v8599_v18 = vadd.f32 %v6371_v18, %v5036_v45   ;;  %v5093_v27 = vsel (%p8602_p11), %vm5064_vm3, %v5091_v32, %v5092_v15 }
 0xa8d   : >> { %v8790_v56 = vmov %v8596_v19  ;;  %v5097_v39 = vsel (%p8602_p11), %vm5072_vm7, %v5093_v27, %v5096_v33 }
 0xa8e   : >> { %v8791_v52 = vmov %v8599_v18  ;;  %v8794_v19 = vmov %v8790_v56  ;;  %v5114_v57 = vrot.slane (%p8602_p11), %v8790_v56, 2  ;;  %5938 = vst [vmem:[%s6565_s20 + $0x1] ss:$4 sm:$0xff] (%p8602_p11), %v5097_v39 }
 0xa8f   : >> { %v8793_v18 = vmov %v8791_v52  ;;  %v5069_v19 = vsel (%p8602_p11), %vm5068_vm5, %v5058_v50, %v5059_v59  ;;  %v5115_v58 = vrot.slane (%p8602_p11), %v8791_v52, 1 }
 0xa90   : > { %v5065_v18 = vsel %vm5064_vm3, %v5061_v41, %v5063_v16  ;;  %v5071_v63 = vsel %vm5070_vm6, %v5067_v17, %v5069_v19 }
 0xa91   : > { %v5073_v48 = vsel %vm5072_vm7, %v5065_v18, %v5071_v63  ;;  %v5120_v20 = vsel %vm5068_vm5, %v5114_v57, %v5115_v58 }
 0xa92   : > { %5075 = vst [vmem:[%s6565_s20] ss:$4 sm:$0xff] %v5073_v48  ;;  %v5121_v21 = vsel %vm5070_vm6, %v5119_v51, %v5120_v20 }
 0xa93   : > { %v5122_v9 = vsel %vm5072_vm7, %v5118_v34, %v5121_v21 }
 0xa94   : > { %5939 = vst [vmem:[%s6565_s20 + $0x2] ss:$4 sm:$0xff] %v5122_v9 }
 0xa95   : > { %6232 = shalt.err (!%p6229_p4)
}
 0xa96   : > { %5946 = dma.vmem_to_hbm [thread:$0]  (%p6548_p5), %s5141_s29, 512, %s5143_s8, %s5127_s9  }
 0xa97 PF: > { %p5952_p7 = scmp.ge.s32.totalorder %s6367_s27, 2  ;;  %s5154_s13 = sand.u32 1, %s6355_s24  }
 0xa98   : > { %s5155_s20 = scalar_lea.sflag [#allocation3], %s5154_s13 }
 0xa99   : > { %p5949_p8 = pnand %p5952_p7, %p6552_p6 }
 0xa9b   : > { %p5950_p9 = pneg %p5949_p8 }
 0xa9d   : > { %6350 = dma.done.wait (%p5950_p9), %s5155_s20, 512  }
 0xa9e   : > { %6352 = vsyncadd (%p5950_p9), %s5155_s20, 4294966784  ;;  %p17_p10 = scmp.ge.s32.totalorder %s6535_s30, 6   ;;  %s8817_s24 = smov %s6359_s25 }
 0xa9f   : > { %s8818_s25 = smov %s6363_s26  ;;  %s8819_s26 = smov %s6546_s10 }
 0xaa0   : > { %s8820_s27 = smov %s6535_s30  ;;  %19 = sbr.rel (!%p17_p10) target bundleno = 3 (0x3), region = 135 }
 0xaa5   :  { %5161 = vsyncpa [#allocation3], 1 }
 0xaa6   :  { %5163 = vsyncpa [#allocation3 + $0x1], 1 }

</bundles_post_ra>
